<compile_context>
chip_gen: v5e
topology: v5e:2x2
jax: 0.10.0
libtpu: 0.0.40
codegen_flags: <defaults>
</compile_context>

<pallas_src>
import jax
import jax.numpy as jnp
from jax import lax
from jax.experimental import pallas as pl
from jax.experimental.pallas import tpu as pltpu

N_FEATS = 4
SEQ_LEN = 8
N_NODES = 8
N_HIDDEN = 6
N_LAYERS = 5
H_PAD = 8                       # hidden padded to 8 lanes per gate -> aligned gate slices


# ----------------------------------------------------------------------------
# Fused kernel: GCN aggregation + 5-layer LSTM (wavefront recurrence).
#   adj_ref : (N, N)                 dense adjacency, adj[v,u]=1 iff edge u->v
#   x_ref   : (N, S*F)               node features, flattened time-major per node
#   w0_ref  : (S*F + HP, S*4*HP)     rows 0..S*F-1: block-diag layer-0 input weights,
#                                    row  S*F     : tiled layer-0 bias (rest zero pad)
#   rec_ref : (HP + (L-1)*2HP + (L-1)*HP, 4*HP)
#                                    rows 0..HP-1            : U0 (layer-0 recurrent)
#                                    next (L-1) blocks of 2HP: fused [W_ih; W_hh] per layer
#                                    last (L-1) blocks of HP : bias row per layer (row 0)
#   o_ref   : (N, S*HP)              lane-dense output slab: o[n, t*HP + k] = h_t[n, k]
# ----------------------------------------------------------------------------
def fused_gcn_lstm_kernel(adj_ref, x_ref, w0_ref, rec_ref, o_ref):
    N = adj_ref.shape[0]
    HP = H_PAD
    G = 4 * HP
    S = o_ref.shape[1] // HP
    SF = w0_ref.shape[0] - HP                         # S * F
    L = 1 + (rec_ref.shape[0] - HP) // (3 * HP)       # layer count from slab layout

    adj = adj_ref[...]
    x = x_ref[...]
    w0 = w0_ref[...]
    rec = rec_ref[...]

    # ---- GCN message passing + ALL-timestep layer-0 input projection (2 matmuls) ----
    agg = jnp.dot(adj, x, preferred_element_type=jnp.float32)               # (N, S*F)
    pre0 = jnp.dot(agg, w0[:SF, :],
                   preferred_element_type=jnp.float32) + w0[SF:SF + 1, :]   # (N, S*G)

    # ---- hoisted, loop-invariant weight/bias views (NOT re-read inside the unroll) ----
    u0 = rec[:HP, :]                                                        # (HP, G)
    wu = [rec[HP + 2 * HP * l: HP + 2 * HP * (l + 1), :] for l in range(L - 1)]
    bbase = HP + 2 * HP * (L - 1)
    bias = [jnp.broadcast_to(rec[bbase + HP * l: bbase + HP * l + 1, :], (N, G))
            for l in range(L - 1)]                                          # hoisted bcasts

    def cell(gates, c_prev):
        # gate order [i | f | o | g]: one tanh-based sigmoid over 3 contiguous gates.
        sg = 0.5 * jnp.tanh(0.5 * gates[:, :3 * HP]) + 0.5
        i = sg[:, 0 * HP:1 * HP]
        f = sg[:, 1 * HP:2 * HP]
        o = sg[:, 2 * HP:3 * HP]
        g = jnp.tanh(gates[:, 3 * HP:4 * HP])
        c_new = f * c_prev + i * g
        h_new = o * jnp.tanh(c_new)
        return h_new, c_new

    zeros = jnp.zeros((N, HP), jnp.float32)
    h = [zeros] * L
    c = [zeros] * L

    # ---- fully unrolled wavefront: step (l,t) depends only on (l-1,t) and (l,t-1) ----
    for t in range(S):
        g0 = pre0[:, t * G:(t + 1) * G] + jnp.dot(
            h[0], u0, preferred_element_type=jnp.float32)                   # (N, G)
        h[0], c[0] = cell(g0, c[0])
        for l in range(1, L):
            cat = jnp.concatenate([h[l - 1], h[l]], axis=1)                 # (N, 2*HP)
            gl = jnp.dot(cat, wu[l - 1],
                         preferred_element_type=jnp.float32) + bias[l - 1]  # (N, G)
            h[l], c[l] = cell(gl, c[l])
        o_ref[:, t * HP:(t + 1) * HP] = h[L - 1]        # per-step store, off the chain


# ----------------------------------------------------------------------------
# Wrapper-side, one-time weight packing: transpose, gate reorder [i,f,o,g],
# pad H=6 -> HP=8, build the block-diagonal layer-0 projection, fuse [W;U] per
# deep layer and collapse everything into two contiguous slabs.
# ----------------------------------------------------------------------------
def pack_params(params, n_hidden=N_HIDDEN, hp=H_PAD, seq_len=SEQ_LEN):
    wih0, whh0, b0, wih_r, whh_r, b_r = params
    H = n_hidden
    G = 4 * hp
    S = seq_len
    GATE_ORDER = (0, 1, 3, 2)          # PyTorch [i,f,g,o] -> kernel [i,f,o,g]

    def pack_w(w, rows_pad):
        # w: (4H, Fin) PyTorch layout -> (rows_pad, G), transposed, reordered, padded.
        fin = w.shape[1]
        blocks = []
        for g in GATE_ORDER:
            blk = w[g * H:(g + 1) * H, :].T                               # (fin, H)
            blk = jnp.pad(blk, ((0, rows_pad - fin), (0, hp - H)))
            blocks.append(blk)
        return jnp.concatenate(blocks, axis=1)                            # (rows_pad, G)

    def pack_b(b):
        segs = [jnp.pad(b[:, g * H:(g + 1) * H], ((0, 0), (0, hp - H)))
                for g in GATE_ORDER]
        return jnp.concatenate(segs, axis=1)                              # (1, G)

    F = wih0.shape[1]
    n_rest = wih_r.shape[0]

    # layer 0: block-diagonal input projection over all timesteps + tiled bias row
    w0p = pack_w(wih0, F)                                                 # (F, G)
    w0bd = jnp.zeros((S * F, S * G), jnp.float32)
    for t in range(S):
        w0bd = w0bd.at[t * F:(t + 1) * F, t * G:(t + 1) * G].set(w0p)
    b0bd = jnp.tile(pack_b(b0), (1, S))                                   # (1, S*G)
    w0slab = jnp.concatenate(
        [w0bd, jnp.pad(b0bd, ((0, hp - 1), (0, 0)))], axis=0)             # (S*F+hp, S*G)

    # recurrent slab: U0 | fused [W_ih; W_hh] per deep layer | bias rows per deep layer
    parts = [pack_w(whh0, hp)]                                            # (hp, G)
    for l in range(n_rest):
        parts.append(jnp.concatenate(
            [pack_w(wih_r[l], hp), pack_w(whh_r[l], hp)], axis=0))        # (2*hp, G)
    for l in range(n_rest):
        parts.append(jnp.pad(pack_b(b_r[l]), ((0, hp - 1), (0, 0))))      # (hp, G)
    recslab = jnp.concatenate(parts, axis=0)                              # (hp*(1+3*n_rest), G)

    return w0slab, recslab


def gcn_lstm_forward(adj, feature, packed):
    """adj: (N,N) with adj[v,u]=1 iff u->v;  feature: (N,S,F).  Returns (N,S,H)."""
    w0slab, recslab = packed
    n, s, f = feature.shape
    hp = H_PAD
    x_flat = feature.reshape(n, s * f)            # contiguous, metadata-only reshape

    vmem = pl.BlockSpec(memory_space=pltpu.MemorySpace.VMEM)
    out = pl.pallas_call(
        fused_gcn_lstm_kernel,
        out_shape=jax.ShapeDtypeStruct((n, s * hp), jnp.float32),
        in_specs=[vmem] * 4,
        out_specs=vmem,
    )(adj, x_flat, w0slab, recslab)
    return out.reshape(n, s, hp)[:, :, :N_HIDDEN]


# ----------------------------------------------------------------------------
# Pure-JAX reference (original PyTorch-layout params) — correctness check only.
# ----------------------------------------------------------------------------
def reference_forward(adj, feature, params):
    n, s, f = feature.shape
    h = (adj @ feature.reshape(n, s * f)).reshape(n, s, f)
    wih0, whh0, b0, wih_r, whh_r, b_r = params
    layer_params = [(wih0, whh0, b0)] + [
        (wih_r[l], whh_r[l], b_r[l]) for l in range(wih_r.shape[0])
    ]
    out = h
    for (wih, whh, b) in layer_params:
        H = whh.shape[1]
        zero = jnp.zeros((n, H), jnp.float32)

        def step(carry, x_t):
            hh, cc = carry
            gates = x_t @ wih.T + hh @ whh.T + b
            i, ff, g, o = jnp.split(gates, 4, axis=-1)
            i = jax.nn.sigmoid(i); ff = jax.nn.sigmoid(ff)
            g = jnp.tanh(g); o = jax.nn.sigmoid(o)
            cc = ff * cc + i * g
            hh = o * jnp.tanh(cc)
            return (hh, cc), hh

        _, ys = lax.scan(step, (zero, zero), jnp.transpose(out, (1, 0, 2)))
        out = jnp.transpose(ys, (1, 0, 2))
    return out


def init_params(key, n_feats, n_hidden, n_layers):
    ks = jax.random.split(key, 6)
    scale = 1.0 / jnp.sqrt(n_hidden)
    wih0 = jax.random.uniform(ks[0], (4 * n_hidden, n_feats), jnp.float32, -scale, scale)
    whh0 = jax.random.uniform(ks[1], (4 * n_hidden, n_hidden), jnp.float32, -scale, scale)
    b0 = jax.random.uniform(ks[2], (1, 4 * n_hidden), jnp.float32, -scale, scale)
    wih_r = jax.random.uniform(ks[3], (n_layers - 1, 4 * n_hidden, n_hidden),
                               jnp.float32, -scale, scale)
    whh_r = jax.random.uniform(ks[4], (n_layers - 1, 4 * n_hidden, n_hidden),
                               jnp.float32, -scale, scale)
    b_r = jax.random.uniform(ks[5], (n_layers - 1, 1, 4 * n_hidden),
                             jnp.float32, -scale, scale)
    return (wih0, whh0, b0, wih_r, whh_r, b_r)


if __name__ == "__main__":
    key = jax.random.PRNGKey(0)
    k_adj, k_feat, k_param = jax.random.split(key, 3)

    # Random directed graph adjacency: A[v, u] = 1 iff edge u -> v.
    adj = jax.random.bernoulli(k_adj, 0.4, (N_NODES, N_NODES)).astype(jnp.float32)
    feature = jax.random.normal(k_feat, (N_NODES, SEQ_LEN, N_FEATS), jnp.float32)
    params = init_params(k_param, N_FEATS, N_HIDDEN, N_LAYERS)

    # One-time weight layout transformation (outside the hot path).
    packed = jax.tree_util.tree_map(jax.block_until_ready, pack_params(params))

    out = jax.jit(gcn_lstm_forward)(adj, feature, packed)
    out = jax.block_until_ready(out)

    ref = reference_forward(adj, feature, params)
    assert out.shape == (N_NODES, SEQ_LEN, N_HIDDEN)
    assert jnp.allclose(out, ref, atol=2e-5, rtol=2e-5), (
        f"max abs err {jnp.max(jnp.abs(out - ref))}")

    print("KERNEL_OK")
</pallas_src>

<mosaic_0001>
module attributes {stable_mosaic.version = 11 : i64} {
  func.func @fused_gcn_lstm_kernel(%arg0: memref<8x8xf32, #tpu.memory_space<vmem>>, %arg1: memref<8x32xf32, #tpu.memory_space<vmem>>, %arg2: memref<40x256xf32, #tpu.memory_space<vmem>>, %arg3: memref<104x32xf32, #tpu.memory_space<vmem>>, %arg4: memref<8x64xf32, #tpu.memory_space<vmem>>) attributes {dimension_semantics = [], scalar_prefetch = 0 : i64, scratch_operands = 0 : i64, tpu.core_type = #tpu.core_type<tc>} {
    %c0 = arith.constant 0 : index
    %c0_0 = arith.constant 0 : index
    %0 = vector.load %arg0[%c0, %c0_0] : memref<8x8xf32, #tpu.memory_space<vmem>>, vector<8x8xf32>
    %c0_1 = arith.constant 0 : index
    %c0_2 = arith.constant 0 : index
    %1 = vector.load %arg1[%c0_1, %c0_2] : memref<8x32xf32, #tpu.memory_space<vmem>>, vector<8x32xf32>
    %c0_3 = arith.constant 0 : index
    %c0_4 = arith.constant 0 : index
    %2 = vector.load %arg2[%c0_3, %c0_4] : memref<40x256xf32, #tpu.memory_space<vmem>>, vector<40x256xf32>
    %c0_5 = arith.constant 0 : index
    %c0_6 = arith.constant 0 : index
    %3 = vector.load %arg3[%c0_5, %c0_6] : memref<104x32xf32, #tpu.memory_space<vmem>>, vector<104x32xf32>
    %cst = arith.constant dense<0.000000e+00> : vector<8x32xf32>
    %4 = tpu.matmul %0, %1, %cst {dimension_numbers = #tpu.dot_dimension_numbers<[1], [0], [0], [1], [0, 0, 1, 1], [], []>} : vector<8x8xf32>, vector<8x32xf32>, vector<8x32xf32> -> vector<8x32xf32>
    %5 = vector.extract_strided_slice %2 {offsets = [0, 0], sizes = [32, 256], strides = [1, 1]} : vector<40x256xf32> to vector<32x256xf32>
    %cst_7 = arith.constant dense<0.000000e+00> : vector<8x256xf32>
    %6 = tpu.matmul %4, %5, %cst_7 {dimension_numbers = #tpu.dot_dimension_numbers<[1], [0], [0], [1], [0, 0, 1, 1], [], []>} : vector<8x32xf32>, vector<32x256xf32>, vector<8x256xf32> -> vector<8x256xf32>
    %7 = vector.extract_strided_slice %2 {offsets = [32, 0], sizes = [1, 256], strides = [1, 1]} : vector<40x256xf32> to vector<1x256xf32>
    %8 = vector.broadcast %7 : vector<1x256xf32> to vector<8x256xf32>
    %9 = arith.addf %6, %8 : vector<8x256xf32>
    %10 = vector.extract_strided_slice %3 {offsets = [0, 0], sizes = [8, 32], strides = [1, 1]} : vector<104x32xf32> to vector<8x32xf32>
    %11 = vector.extract_strided_slice %3 {offsets = [8, 0], sizes = [16, 32], strides = [1, 1]} : vector<104x32xf32> to vector<16x32xf32>
    %12 = vector.extract_strided_slice %3 {offsets = [24, 0], sizes = [16, 32], strides = [1, 1]} : vector<104x32xf32> to vector<16x32xf32>
    %13 = vector.extract_strided_slice %3 {offsets = [40, 0], sizes = [16, 32], strides = [1, 1]} : vector<104x32xf32> to vector<16x32xf32>
    %14 = vector.extract_strided_slice %3 {offsets = [56, 0], sizes = [16, 32], strides = [1, 1]} : vector<104x32xf32> to vector<16x32xf32>
    %15 = vector.extract_strided_slice %3 {offsets = [72, 0], sizes = [1, 32], strides = [1, 1]} : vector<104x32xf32> to vector<1x32xf32>
    %16 = vector.shape_cast %15 : vector<1x32xf32> to vector<1x32xf32>
    %17 = vector.broadcast %16 : vector<1x32xf32> to vector<8x32xf32>
    %18 = vector.extract_strided_slice %3 {offsets = [80, 0], sizes = [1, 32], strides = [1, 1]} : vector<104x32xf32> to vector<1x32xf32>
    %19 = vector.shape_cast %18 : vector<1x32xf32> to vector<1x32xf32>
    %20 = vector.broadcast %19 : vector<1x32xf32> to vector<8x32xf32>
    %21 = vector.extract_strided_slice %3 {offsets = [88, 0], sizes = [1, 32], strides = [1, 1]} : vector<104x32xf32> to vector<1x32xf32>
    %22 = vector.shape_cast %21 : vector<1x32xf32> to vector<1x32xf32>
    %23 = vector.broadcast %22 : vector<1x32xf32> to vector<8x32xf32>
    %24 = vector.extract_strided_slice %3 {offsets = [96, 0], sizes = [1, 32], strides = [1, 1]} : vector<104x32xf32> to vector<1x32xf32>
    %25 = vector.shape_cast %24 : vector<1x32xf32> to vector<1x32xf32>
    %26 = vector.broadcast %25 : vector<1x32xf32> to vector<8x32xf32>
    %cst_8 = arith.constant 0.000000e+00 : f32
    %27 = vector.broadcast %cst_8 : f32 to vector<8x8xf32>
    %28 = vector.extract_strided_slice %9 {offsets = [0, 0], sizes = [8, 32], strides = [1, 1]} : vector<8x256xf32> to vector<8x32xf32>
    %cst_9 = arith.constant dense<0.000000e+00> : vector<8x32xf32>
    %29 = tpu.matmul %27, %10, %cst_9 {dimension_numbers = #tpu.dot_dimension_numbers<[1], [0], [0], [1], [0, 0, 1, 1], [], []>} : vector<8x8xf32>, vector<8x32xf32>, vector<8x32xf32> -> vector<8x32xf32>
    %30 = arith.addf %28, %29 : vector<8x32xf32>
    %31 = vector.extract_strided_slice %30 {offsets = [0, 0], sizes = [8, 24], strides = [1, 1]} : vector<8x32xf32> to vector<8x24xf32>
    %cst_10 = arith.constant 5.000000e-01 : f32
    %32 = vector.broadcast %cst_10 : f32 to vector<8x24xf32>
    %33 = arith.mulf %32, %31 : vector<8x24xf32>
    %34 = math.tanh %33 : vector<8x24xf32>
    %cst_11 = arith.constant 5.000000e-01 : f32
    %35 = vector.broadcast %cst_11 : f32 to vector<8x24xf32>
    %36 = arith.mulf %35, %34 : vector<8x24xf32>
    %cst_12 = arith.constant 5.000000e-01 : f32
    %37 = vector.broadcast %cst_12 : f32 to vector<8x24xf32>
    %38 = arith.addf %36, %37 : vector<8x24xf32>
    %39 = vector.extract_strided_slice %38 {offsets = [0, 0], sizes = [8, 8], strides = [1, 1]} : vector<8x24xf32> to vector<8x8xf32>
    %40 = vector.extract_strided_slice %38 {offsets = [0, 8], sizes = [8, 8], strides = [1, 1]} : vector<8x24xf32> to vector<8x8xf32>
    %41 = vector.extract_strided_slice %38 {offsets = [0, 16], sizes = [8, 8], strides = [1, 1]} : vector<8x24xf32> to vector<8x8xf32>
    %42 = vector.extract_strided_slice %30 {offsets = [0, 24], sizes = [8, 8], strides = [1, 1]} : vector<8x32xf32> to vector<8x8xf32>
    %43 = math.tanh %42 : vector<8x8xf32>
    %44 = arith.mulf %40, %27 : vector<8x8xf32>
    %45 = arith.mulf %39, %43 : vector<8x8xf32>
    %46 = arith.addf %44, %45 : vector<8x8xf32>
    %47 = math.tanh %46 : vector<8x8xf32>
    %48 = arith.mulf %41, %47 : vector<8x8xf32>
    %49 = tpu.concatenate %48, %27 in 1 : vector<8x8xf32>, vector<8x8xf32> -> vector<8x16xf32>
    %cst_13 = arith.constant dense<0.000000e+00> : vector<8x32xf32>
    %50 = tpu.matmul %49, %11, %cst_13 {dimension_numbers = #tpu.dot_dimension_numbers<[1], [0], [0], [1], [0, 0, 1, 1], [], []>} : vector<8x16xf32>, vector<16x32xf32>, vector<8x32xf32> -> vector<8x32xf32>
    %51 = arith.addf %50, %17 : vector<8x32xf32>
    %52 = vector.extract_strided_slice %51 {offsets = [0, 0], sizes = [8, 24], strides = [1, 1]} : vector<8x32xf32> to vector<8x24xf32>
    %cst_14 = arith.constant 5.000000e-01 : f32
    %53 = vector.broadcast %cst_14 : f32 to vector<8x24xf32>
    %54 = arith.mulf %53, %52 : vector<8x24xf32>
    %55 = math.tanh %54 : vector<8x24xf32>
    %cst_15 = arith.constant 5.000000e-01 : f32
    %56 = vector.broadcast %cst_15 : f32 to vector<8x24xf32>
    %57 = arith.mulf %56, %55 : vector<8x24xf32>
    %cst_16 = arith.constant 5.000000e-01 : f32
    %58 = vector.broadcast %cst_16 : f32 to vector<8x24xf32>
    %59 = arith.addf %57, %58 : vector<8x24xf32>
    %60 = vector.extract_strided_slice %59 {offsets = [0, 0], sizes = [8, 8], strides = [1, 1]} : vector<8x24xf32> to vector<8x8xf32>
    %61 = vector.extract_strided_slice %59 {offsets = [0, 8], sizes = [8, 8], strides = [1, 1]} : vector<8x24xf32> to vector<8x8xf32>
    %62 = vector.extract_strided_slice %59 {offsets = [0, 16], sizes = [8, 8], strides = [1, 1]} : vector<8x24xf32> to vector<8x8xf32>
    %63 = vector.extract_strided_slice %51 {offsets = [0, 24], sizes = [8, 8], strides = [1, 1]} : vector<8x32xf32> to vector<8x8xf32>
    %64 = math.tanh %63 : vector<8x8xf32>
    %65 = arith.mulf %61, %27 : vector<8x8xf32>
    %66 = arith.mulf %60, %64 : vector<8x8xf32>
    %67 = arith.addf %65, %66 : vector<8x8xf32>
    %68 = math.tanh %67 : vector<8x8xf32>
    %69 = arith.mulf %62, %68 : vector<8x8xf32>
    %70 = tpu.concatenate %69, %27 in 1 : vector<8x8xf32>, vector<8x8xf32> -> vector<8x16xf32>
    %cst_17 = arith.constant dense<0.000000e+00> : vector<8x32xf32>
    %71 = tpu.matmul %70, %12, %cst_17 {dimension_numbers = #tpu.dot_dimension_numbers<[1], [0], [0], [1], [0, 0, 1, 1], [], []>} : vector<8x16xf32>, vector<16x32xf32>, vector<8x32xf32> -> vector<8x32xf32>
    %72 = arith.addf %71, %20 : vector<8x32xf32>
    %73 = vector.extract_strided_slice %72 {offsets = [0, 0], sizes = [8, 24], strides = [1, 1]} : vector<8x32xf32> to vector<8x24xf32>
    %cst_18 = arith.constant 5.000000e-01 : f32
    %74 = vector.broadcast %cst_18 : f32 to vector<8x24xf32>
    %75 = arith.mulf %74, %73 : vector<8x24xf32>
    %76 = math.tanh %75 : vector<8x24xf32>
    %cst_19 = arith.constant 5.000000e-01 : f32
    %77 = vector.broadcast %cst_19 : f32 to vector<8x24xf32>
    %78 = arith.mulf %77, %76 : vector<8x24xf32>
    %cst_20 = arith.constant 5.000000e-01 : f32
    %79 = vector.broadcast %cst_20 : f32 to vector<8x24xf32>
    %80 = arith.addf %78, %79 : vector<8x24xf32>
    %81 = vector.extract_strided_slice %80 {offsets = [0, 0], sizes = [8, 8], strides = [1, 1]} : vector<8x24xf32> to vector<8x8xf32>
    %82 = vector.extract_strided_slice %80 {offsets = [0, 8], sizes = [8, 8], strides = [1, 1]} : vector<8x24xf32> to vector<8x8xf32>
    %83 = vector.extract_strided_slice %80 {offsets = [0, 16], sizes = [8, 8], strides = [1, 1]} : vector<8x24xf32> to vector<8x8xf32>
    %84 = vector.extract_strided_slice %72 {offsets = [0, 24], sizes = [8, 8], strides = [1, 1]} : vector<8x32xf32> to vector<8x8xf32>
    %85 = math.tanh %84 : vector<8x8xf32>
    %86 = arith.mulf %82, %27 : vector<8x8xf32>
    %87 = arith.mulf %81, %85 : vector<8x8xf32>
    %88 = arith.addf %86, %87 : vector<8x8xf32>
    %89 = math.tanh %88 : vector<8x8xf32>
    %90 = arith.mulf %83, %89 : vector<8x8xf32>
    %91 = tpu.concatenate %90, %27 in 1 : vector<8x8xf32>, vector<8x8xf32> -> vector<8x16xf32>
    %cst_21 = arith.constant dense<0.000000e+00> : vector<8x32xf32>
    %92 = tpu.matmul %91, %13, %cst_21 {dimension_numbers = #tpu.dot_dimension_numbers<[1], [0], [0], [1], [0, 0, 1, 1], [], []>} : vector<8x16xf32>, vector<16x32xf32>, vector<8x32xf32> -> vector<8x32xf32>
    %93 = arith.addf %92, %23 : vector<8x32xf32>
    %94 = vector.extract_strided_slice %93 {offsets = [0, 0], sizes = [8, 24], strides = [1, 1]} : vector<8x32xf32> to vector<8x24xf32>
    %cst_22 = arith.constant 5.000000e-01 : f32
    %95 = vector.broadcast %cst_22 : f32 to vector<8x24xf32>
    %96 = arith.mulf %95, %94 : vector<8x24xf32>
    %97 = math.tanh %96 : vector<8x24xf32>
    %cst_23 = arith.constant 5.000000e-01 : f32
    %98 = vector.broadcast %cst_23 : f32 to vector<8x24xf32>
    %99 = arith.mulf %98, %97 : vector<8x24xf32>
    %cst_24 = arith.constant 5.000000e-01 : f32
    %100 = vector.broadcast %cst_24 : f32 to vector<8x24xf32>
    %101 = arith.addf %99, %100 : vector<8x24xf32>
    %102 = vector.extract_strided_slice %101 {offsets = [0, 0], sizes = [8, 8], strides = [1, 1]} : vector<8x24xf32> to vector<8x8xf32>
    %103 = vector.extract_strided_slice %101 {offsets = [0, 8], sizes = [8, 8], strides = [1, 1]} : vector<8x24xf32> to vector<8x8xf32>
    %104 = vector.extract_strided_slice %101 {offsets = [0, 16], sizes = [8, 8], strides = [1, 1]} : vector<8x24xf32> to vector<8x8xf32>
    %105 = vector.extract_strided_slice %93 {offsets = [0, 24], sizes = [8, 8], strides = [1, 1]} : vector<8x32xf32> to vector<8x8xf32>
    %106 = math.tanh %105 : vector<8x8xf32>
    %107 = arith.mulf %103, %27 : vector<8x8xf32>
    %108 = arith.mulf %102, %106 : vector<8x8xf32>
    %109 = arith.addf %107, %108 : vector<8x8xf32>
    %110 = math.tanh %109 : vector<8x8xf32>
    %111 = arith.mulf %104, %110 : vector<8x8xf32>
    %112 = tpu.concatenate %111, %27 in 1 : vector<8x8xf32>, vector<8x8xf32> -> vector<8x16xf32>
    %cst_25 = arith.constant dense<0.000000e+00> : vector<8x32xf32>
    %113 = tpu.matmul %112, %14, %cst_25 {dimension_numbers = #tpu.dot_dimension_numbers<[1], [0], [0], [1], [0, 0, 1, 1], [], []>} : vector<8x16xf32>, vector<16x32xf32>, vector<8x32xf32> -> vector<8x32xf32>
    %114 = arith.addf %113, %26 : vector<8x32xf32>
    %115 = vector.extract_strided_slice %114 {offsets = [0, 0], sizes = [8, 24], strides = [1, 1]} : vector<8x32xf32> to vector<8x24xf32>
    %cst_26 = arith.constant 5.000000e-01 : f32
    %116 = vector.broadcast %cst_26 : f32 to vector<8x24xf32>
    %117 = arith.mulf %116, %115 : vector<8x24xf32>
    %118 = math.tanh %117 : vector<8x24xf32>
    %cst_27 = arith.constant 5.000000e-01 : f32
    %119 = vector.broadcast %cst_27 : f32 to vector<8x24xf32>
    %120 = arith.mulf %119, %118 : vector<8x24xf32>
    %cst_28 = arith.constant 5.000000e-01 : f32
    %121 = vector.broadcast %cst_28 : f32 to vector<8x24xf32>
    %122 = arith.addf %120, %121 : vector<8x24xf32>
    %123 = vector.extract_strided_slice %122 {offsets = [0, 0], sizes = [8, 8], strides = [1, 1]} : vector<8x24xf32> to vector<8x8xf32>
    %124 = vector.extract_strided_slice %122 {offsets = [0, 8], sizes = [8, 8], strides = [1, 1]} : vector<8x24xf32> to vector<8x8xf32>
    %125 = vector.extract_strided_slice %122 {offsets = [0, 16], sizes = [8, 8], strides = [1, 1]} : vector<8x24xf32> to vector<8x8xf32>
    %126 = vector.extract_strided_slice %114 {offsets = [0, 24], sizes = [8, 8], strides = [1, 1]} : vector<8x32xf32> to vector<8x8xf32>
    %127 = math.tanh %126 : vector<8x8xf32>
    %128 = arith.mulf %124, %27 : vector<8x8xf32>
    %129 = arith.mulf %123, %127 : vector<8x8xf32>
    %130 = arith.addf %128, %129 : vector<8x8xf32>
    %131 = math.tanh %130 : vector<8x8xf32>
    %132 = arith.mulf %125, %131 : vector<8x8xf32>
    %c0_29 = arith.constant 0 : index
    %c0_30 = arith.constant 0 : index
    %133 = vector.load %arg4[%c0_29, %c0_30] : memref<8x64xf32, #tpu.memory_space<vmem>>, vector<8x8xf32>
    tpu.vector_store %arg4[%c0_29, %c0_30], %132 {strides = array<i32>} : memref<8x64xf32, #tpu.memory_space<vmem>>, vector<8x8xf32>,
    %134 = vector.extract_strided_slice %9 {offsets = [0, 32], sizes = [8, 32], strides = [1, 1]} : vector<8x256xf32> to vector<8x32xf32>
    %cst_31 = arith.constant dense<0.000000e+00> : vector<8x32xf32>
    %135 = tpu.matmul %48, %10, %cst_31 {dimension_numbers = #tpu.dot_dimension_numbers<[1], [0], [0], [1], [0, 0, 1, 1], [], []>} : vector<8x8xf32>, vector<8x32xf32>, vector<8x32xf32> -> vector<8x32xf32>
    %136 = arith.addf %134, %135 : vector<8x32xf32>
    %137 = vector.extract_strided_slice %136 {offsets = [0, 0], sizes = [8, 24], strides = [1, 1]} : vector<8x32xf32> to vector<8x24xf32>
    %cst_32 = arith.constant 5.000000e-01 : f32
    %138 = vector.broadcast %cst_32 : f32 to vector<8x24xf32>
    %139 = arith.mulf %138, %137 : vector<8x24xf32>
    %140 = math.tanh %139 : vector<8x24xf32>
    %cst_33 = arith.constant 5.000000e-01 : f32
    %141 = vector.broadcast %cst_33 : f32 to vector<8x24xf32>
    %142 = arith.mulf %141, %140 : vector<8x24xf32>
    %cst_34 = arith.constant 5.000000e-01 : f32
    %143 = vector.broadcast %cst_34 : f32 to vector<8x24xf32>
    %144 = arith.addf %142, %143 : vector<8x24xf32>
    %145 = vector.extract_strided_slice %144 {offsets = [0, 0], sizes = [8, 8], strides = [1, 1]} : vector<8x24xf32> to vector<8x8xf32>
    %146 = vector.extract_strided_slice %144 {offsets = [0, 8], sizes = [8, 8], strides = [1, 1]} : vector<8x24xf32> to vector<8x8xf32>
    %147 = vector.extract_strided_slice %144 {offsets = [0, 16], sizes = [8, 8], strides = [1, 1]} : vector<8x24xf32> to vector<8x8xf32>
    %148 = vector.extract_strided_slice %136 {offsets = [0, 24], sizes = [8, 8], strides = [1, 1]} : vector<8x32xf32> to vector<8x8xf32>
    %149 = math.tanh %148 : vector<8x8xf32>
    %150 = arith.mulf %146, %46 : vector<8x8xf32>
    %151 = arith.mulf %145, %149 : vector<8x8xf32>
    %152 = arith.addf %150, %151 : vector<8x8xf32>
    %153 = math.tanh %152 : vector<8x8xf32>
    %154 = arith.mulf %147, %153 : vector<8x8xf32>
    %155 = tpu.concatenate %154, %69 in 1 : vector<8x8xf32>, vector<8x8xf32> -> vector<8x16xf32>
    %cst_35 = arith.constant dense<0.000000e+00> : vector<8x32xf32>
    %156 = tpu.matmul %155, %11, %cst_35 {dimension_numbers = #tpu.dot_dimension_numbers<[1], [0], [0], [1], [0, 0, 1, 1], [], []>} : vector<8x16xf32>, vector<16x32xf32>, vector<8x32xf32> -> vector<8x32xf32>
    %157 = arith.addf %156, %17 : vector<8x32xf32>
    %158 = vector.extract_strided_slice %157 {offsets = [0, 0], sizes = [8, 24], strides = [1, 1]} : vector<8x32xf32> to vector<8x24xf32>
    %cst_36 = arith.constant 5.000000e-01 : f32
    %159 = vector.broadcast %cst_36 : f32 to vector<8x24xf32>
    %160 = arith.mulf %159, %158 : vector<8x24xf32>
    %161 = math.tanh %160 : vector<8x24xf32>
    %cst_37 = arith.constant 5.000000e-01 : f32
    %162 = vector.broadcast %cst_37 : f32 to vector<8x24xf32>
    %163 = arith.mulf %162, %161 : vector<8x24xf32>
    %cst_38 = arith.constant 5.000000e-01 : f32
    %164 = vector.broadcast %cst_38 : f32 to vector<8x24xf32>
    %165 = arith.addf %163, %164 : vector<8x24xf32>
    %166 = vector.extract_strided_slice %165 {offsets = [0, 0], sizes = [8, 8], strides = [1, 1]} : vector<8x24xf32> to vector<8x8xf32>
    %167 = vector.extract_strided_slice %165 {offsets = [0, 8], sizes = [8, 8], strides = [1, 1]} : vector<8x24xf32> to vector<8x8xf32>
    %168 = vector.extract_strided_slice %165 {offsets = [0, 16], sizes = [8, 8], strides = [1, 1]} : vector<8x24xf32> to vector<8x8xf32>
    %169 = vector.extract_strided_slice %157 {offsets = [0, 24], sizes = [8, 8], strides = [1, 1]} : vector<8x32xf32> to vector<8x8xf32>
    %170 = math.tanh %169 : vector<8x8xf32>
    %171 = arith.mulf %167, %67 : vector<8x8xf32>
    %172 = arith.mulf %166, %170 : vector<8x8xf32>
    %173 = arith.addf %171, %172 : vector<8x8xf32>
    %174 = math.tanh %173 : vector<8x8xf32>
    %175 = arith.mulf %168, %174 : vector<8x8xf32>
    %176 = tpu.concatenate %175, %90 in 1 : vector<8x8xf32>, vector<8x8xf32> -> vector<8x16xf32>
    %cst_39 = arith.constant dense<0.000000e+00> : vector<8x32xf32>
    %177 = tpu.matmul %176, %12, %cst_39 {dimension_numbers = #tpu.dot_dimension_numbers<[1], [0], [0], [1], [0, 0, 1, 1], [], []>} : vector<8x16xf32>, vector<16x32xf32>, vector<8x32xf32> -> vector<8x32xf32>
    %178 = arith.addf %177, %20 : vector<8x32xf32>
    %179 = vector.extract_strided_slice %178 {offsets = [0, 0], sizes = [8, 24], strides = [1, 1]} : vector<8x32xf32> to vector<8x24xf32>
    %cst_40 = arith.constant 5.000000e-01 : f32
    %180 = vector.broadcast %cst_40 : f32 to vector<8x24xf32>
    %181 = arith.mulf %180, %179 : vector<8x24xf32>
    %182 = math.tanh %181 : vector<8x24xf32>
    %cst_41 = arith.constant 5.000000e-01 : f32
    %183 = vector.broadcast %cst_41 : f32 to vector<8x24xf32>
    %184 = arith.mulf %183, %182 : vector<8x24xf32>
    %cst_42 = arith.constant 5.000000e-01 : f32
    %185 = vector.broadcast %cst_42 : f32 to vector<8x24xf32>
    %186 = arith.addf %184, %185 : vector<8x24xf32>
    %187 = vector.extract_strided_slice %186 {offsets = [0, 0], sizes = [8, 8], strides = [1, 1]} : vector<8x24xf32> to vector<8x8xf32>
    %188 = vector.extract_strided_slice %186 {offsets = [0, 8], sizes = [8, 8], strides = [1, 1]} : vector<8x24xf32> to vector<8x8xf32>
    %189 = vector.extract_strided_slice %186 {offsets = [0, 16], sizes = [8, 8], strides = [1, 1]} : vector<8x24xf32> to vector<8x8xf32>
    %190 = vector.extract_strided_slice %178 {offsets = [0, 24], sizes = [8, 8], strides = [1, 1]} : vector<8x32xf32> to vector<8x8xf32>
    %191 = math.tanh %190 : vector<8x8xf32>
    %192 = arith.mulf %188, %88 : vector<8x8xf32>
    %193 = arith.mulf %187, %191 : vector<8x8xf32>
    %194 = arith.addf %192, %193 : vector<8x8xf32>
    %195 = math.tanh %194 : vector<8x8xf32>
    %196 = arith.mulf %189, %195 : vector<8x8xf32>
    %197 = tpu.concatenate %196, %111 in 1 : vector<8x8xf32>, vector<8x8xf32> -> vector<8x16xf32>
    %cst_43 = arith.constant dense<0.000000e+00> : vector<8x32xf32>
    %198 = tpu.matmul %197, %13, %cst_43 {dimension_numbers = #tpu.dot_dimension_numbers<[1], [0], [0], [1], [0, 0, 1, 1], [], []>} : vector<8x16xf32>, vector<16x32xf32>, vector<8x32xf32> -> vector<8x32xf32>
    %199 = arith.addf %198, %23 : vector<8x32xf32>
    %200 = vector.extract_strided_slice %199 {offsets = [0, 0], sizes = [8, 24], strides = [1, 1]} : vector<8x32xf32> to vector<8x24xf32>
    %cst_44 = arith.constant 5.000000e-01 : f32
    %201 = vector.broadcast %cst_44 : f32 to vector<8x24xf32>
    %202 = arith.mulf %201, %200 : vector<8x24xf32>
    %203 = math.tanh %202 : vector<8x24xf32>
    %cst_45 = arith.constant 5.000000e-01 : f32
    %204 = vector.broadcast %cst_45 : f32 to vector<8x24xf32>
    %205 = arith.mulf %204, %203 : vector<8x24xf32>
    %cst_46 = arith.constant 5.000000e-01 : f32
    %206 = vector.broadcast %cst_46 : f32 to vector<8x24xf32>
    %207 = arith.addf %205, %206 : vector<8x24xf32>
    %208 = vector.extract_strided_slice %207 {offsets = [0, 0], sizes = [8, 8], strides = [1, 1]} : vector<8x24xf32> to vector<8x8xf32>
    %209 = vector.extract_strided_slice %207 {offsets = [0, 8], sizes = [8, 8], strides = [1, 1]} : vector<8x24xf32> to vector<8x8xf32>
    %210 = vector.extract_strided_slice %207 {offsets = [0, 16], sizes = [8, 8], strides = [1, 1]} : vector<8x24xf32> to vector<8x8xf32>
    %211 = vector.extract_strided_slice %199 {offsets = [0, 24], sizes = [8, 8], strides = [1, 1]} : vector<8x32xf32> to vector<8x8xf32>
    %212 = math.tanh %211 : vector<8x8xf32>
    %213 = arith.mulf %209, %109 : vector<8x8xf32>
    %214 = arith.mulf %208, %212 : vector<8x8xf32>
    %215 = arith.addf %213, %214 : vector<8x8xf32>
    %216 = math.tanh %215 : vector<8x8xf32>
    %217 = arith.mulf %210, %216 : vector<8x8xf32>
    %218 = tpu.concatenate %217, %132 in 1 : vector<8x8xf32>, vector<8x8xf32> -> vector<8x16xf32>
    %cst_47 = arith.constant dense<0.000000e+00> : vector<8x32xf32>
    %219 = tpu.matmul %218, %14, %cst_47 {dimension_numbers = #tpu.dot_dimension_numbers<[1], [0], [0], [1], [0, 0, 1, 1], [], []>} : vector<8x16xf32>, vector<16x32xf32>, vector<8x32xf32> -> vector<8x32xf32>
    %220 = arith.addf %219, %26 : vector<8x32xf32>
    %221 = vector.extract_strided_slice %220 {offsets = [0, 0], sizes = [8, 24], strides = [1, 1]} : vector<8x32xf32> to vector<8x24xf32>
    %cst_48 = arith.constant 5.000000e-01 : f32
    %222 = vector.broadcast %cst_48 : f32 to vector<8x24xf32>
    %223 = arith.mulf %222, %221 : vector<8x24xf32>
    %224 = math.tanh %223 : vector<8x24xf32>
    %cst_49 = arith.constant 5.000000e-01 : f32
    %225 = vector.broadcast %cst_49 : f32 to vector<8x24xf32>
    %226 = arith.mulf %225, %224 : vector<8x24xf32>
    %cst_50 = arith.constant 5.000000e-01 : f32
    %227 = vector.broadcast %cst_50 : f32 to vector<8x24xf32>
    %228 = arith.addf %226, %227 : vector<8x24xf32>
    %229 = vector.extract_strided_slice %228 {offsets = [0, 0], sizes = [8, 8], strides = [1, 1]} : vector<8x24xf32> to vector<8x8xf32>
    %230 = vector.extract_strided_slice %228 {offsets = [0, 8], sizes = [8, 8], strides = [1, 1]} : vector<8x24xf32> to vector<8x8xf32>
    %231 = vector.extract_strided_slice %228 {offsets = [0, 16], sizes = [8, 8], strides = [1, 1]} : vector<8x24xf32> to vector<8x8xf32>
    %232 = vector.extract_strided_slice %220 {offsets = [0, 24], sizes = [8, 8], strides = [1, 1]} : vector<8x32xf32> to vector<8x8xf32>
    %233 = math.tanh %232 : vector<8x8xf32>
    %234 = arith.mulf %230, %130 : vector<8x8xf32>
    %235 = arith.mulf %229, %233 : vector<8x8xf32>
    %236 = arith.addf %234, %235 : vector<8x8xf32>
    %237 = math.tanh %236 : vector<8x8xf32>
    %238 = arith.mulf %231, %237 : vector<8x8xf32>
    %c0_51 = arith.constant 0 : index
    %c8 = arith.constant 8 : index
    %239 = vector.load %arg4[%c0_51, %c8] : memref<8x64xf32, #tpu.memory_space<vmem>>, vector<8x8xf32>
    tpu.vector_store %arg4[%c0_51, %c8], %238 {strides = array<i32>} : memref<8x64xf32, #tpu.memory_space<vmem>>, vector<8x8xf32>,
    %240 = vector.extract_strided_slice %9 {offsets = [0, 64], sizes = [8, 32], strides = [1, 1]} : vector<8x256xf32> to vector<8x32xf32>
    %cst_52 = arith.constant dense<0.000000e+00> : vector<8x32xf32>
    %241 = tpu.matmul %154, %10, %cst_52 {dimension_numbers = #tpu.dot_dimension_numbers<[1], [0], [0], [1], [0, 0, 1, 1], [], []>} : vector<8x8xf32>, vector<8x32xf32>, vector<8x32xf32> -> vector<8x32xf32>
    %242 = arith.addf %240, %241 : vector<8x32xf32>
    %243 = vector.extract_strided_slice %242 {offsets = [0, 0], sizes = [8, 24], strides = [1, 1]} : vector<8x32xf32> to vector<8x24xf32>
    %cst_53 = arith.constant 5.000000e-01 : f32
    %244 = vector.broadcast %cst_53 : f32 to vector<8x24xf32>
    %245 = arith.mulf %244, %243 : vector<8x24xf32>
    %246 = math.tanh %245 : vector<8x24xf32>
    %cst_54 = arith.constant 5.000000e-01 : f32
    %247 = vector.broadcast %cst_54 : f32 to vector<8x24xf32>
    %248 = arith.mulf %247, %246 : vector<8x24xf32>
    %cst_55 = arith.constant 5.000000e-01 : f32
    %249 = vector.broadcast %cst_55 : f32 to vector<8x24xf32>
    %250 = arith.addf %248, %249 : vector<8x24xf32>
    %251 = vector.extract_strided_slice %250 {offsets = [0, 0], sizes = [8, 8], strides = [1, 1]} : vector<8x24xf32> to vector<8x8xf32>
    %252 = vector.extract_strided_slice %250 {offsets = [0, 8], sizes = [8, 8], strides = [1, 1]} : vector<8x24xf32> to vector<8x8xf32>
    %253 = vector.extract_strided_slice %250 {offsets = [0, 16], sizes = [8, 8], strides = [1, 1]} : vector<8x24xf32> to vector<8x8xf32>
    %254 = vector.extract_strided_slice %242 {offsets = [0, 24], sizes = [8, 8], strides = [1, 1]} : vector<8x32xf32> to vector<8x8xf32>
    %255 = math.tanh %254 : vector<8x8xf32>
    %256 = arith.mulf %252, %152 : vector<8x8xf32>
    %257 = arith.mulf %251, %255 : vector<8x8xf32>
    %258 = arith.addf %256, %257 : vector<8x8xf32>
    %259 = math.tanh %258 : vector<8x8xf32>
    %260 = arith.mulf %253, %259 : vector<8x8xf32>
    %261 = tpu.concatenate %260, %175 in 1 : vector<8x8xf32>, vector<8x8xf32> -> vector<8x16xf32>
    %cst_56 = arith.constant dense<0.000000e+00> : vector<8x32xf32>
    %262 = tpu.matmul %261, %11, %cst_56 {dimension_numbers = #tpu.dot_dimension_numbers<[1], [0], [0], [1], [0, 0, 1, 1], [], []>} : vector<8x16xf32>, vector<16x32xf32>, vector<8x32xf32> -> vector<8x32xf32>
    %263 = arith.addf %262, %17 : vector<8x32xf32>
    %264 = vector.extract_strided_slice %263 {offsets = [0, 0], sizes = [8, 24], strides = [1, 1]} : vector<8x32xf32> to vector<8x24xf32>
    %cst_57 = arith.constant 5.000000e-01 : f32
    %265 = vector.broadcast %cst_57 : f32 to vector<8x24xf32>
    %266 = arith.mulf %265, %264 : vector<8x24xf32>
    %267 = math.tanh %266 : vector<8x24xf32>
    %cst_58 = arith.constant 5.000000e-01 : f32
    %268 = vector.broadcast %cst_58 : f32 to vector<8x24xf32>
    %269 = arith.mulf %268, %267 : vector<8x24xf32>
    %cst_59 = arith.constant 5.000000e-01 : f32
    %270 = vector.broadcast %cst_59 : f32 to vector<8x24xf32>
    %271 = arith.addf %269, %270 : vector<8x24xf32>
    %272 = vector.extract_strided_slice %271 {offsets = [0, 0], sizes = [8, 8], strides = [1, 1]} : vector<8x24xf32> to vector<8x8xf32>
    %273 = vector.extract_strided_slice %271 {offsets = [0, 8], sizes = [8, 8], strides = [1, 1]} : vector<8x24xf32> to vector<8x8xf32>
    %274 = vector.extract_strided_slice %271 {offsets = [0, 16], sizes = [8, 8], strides = [1, 1]} : vector<8x24xf32> to vector<8x8xf32>
    %275 = vector.extract_strided_slice %263 {offsets = [0, 24], sizes = [8, 8], strides = [1, 1]} : vector<8x32xf32> to vector<8x8xf32>
    %276 = math.tanh %275 : vector<8x8xf32>
    %277 = arith.mulf %273, %173 : vector<8x8xf32>
    %278 = arith.mulf %272, %276 : vector<8x8xf32>
    %279 = arith.addf %277, %278 : vector<8x8xf32>
    %280 = math.tanh %279 : vector<8x8xf32>
    %281 = arith.mulf %274, %280 : vector<8x8xf32>
    %282 = tpu.concatenate %281, %196 in 1 : vector<8x8xf32>, vector<8x8xf32> -> vector<8x16xf32>
    %cst_60 = arith.constant dense<0.000000e+00> : vector<8x32xf32>
    %283 = tpu.matmul %282, %12, %cst_60 {dimension_numbers = #tpu.dot_dimension_numbers<[1], [0], [0], [1], [0, 0, 1, 1], [], []>} : vector<8x16xf32>, vector<16x32xf32>, vector<8x32xf32> -> vector<8x32xf32>
    %284 = arith.addf %283, %20 : vector<8x32xf32>
    %285 = vector.extract_strided_slice %284 {offsets = [0, 0], sizes = [8, 24], strides = [1, 1]} : vector<8x32xf32> to vector<8x24xf32>
    %cst_61 = arith.constant 5.000000e-01 : f32
    %286 = vector.broadcast %cst_61 : f32 to vector<8x24xf32>
    %287 = arith.mulf %286, %285 : vector<8x24xf32>
    %288 = math.tanh %287 : vector<8x24xf32>
    %cst_62 = arith.constant 5.000000e-01 : f32
    %289 = vector.broadcast %cst_62 : f32 to vector<8x24xf32>
    %290 = arith.mulf %289, %288 : vector<8x24xf32>
    %cst_63 = arith.constant 5.000000e-01 : f32
    %291 = vector.broadcast %cst_63 : f32 to vector<8x24xf32>
    %292 = arith.addf %290, %291 : vector<8x24xf32>
    %293 = vector.extract_strided_slice %292 {offsets = [0, 0], sizes = [8, 8], strides = [1, 1]} : vector<8x24xf32> to vector<8x8xf32>
    %294 = vector.extract_strided_slice %292 {offsets = [0, 8], sizes = [8, 8], strides = [1, 1]} : vector<8x24xf32> to vector<8x8xf32>
    %295 = vector.extract_strided_slice %292 {offsets = [0, 16], sizes = [8, 8], strides = [1, 1]} : vector<8x24xf32> to vector<8x8xf32>
    %296 = vector.extract_strided_slice %284 {offsets = [0, 24], sizes = [8, 8], strides = [1, 1]} : vector<8x32xf32> to vector<8x8xf32>
    %297 = math.tanh %296 : vector<8x8xf32>
    %298 = arith.mulf %294, %194 : vector<8x8xf32>
    %299 = arith.mulf %293, %297 : vector<8x8xf32>
    %300 = arith.addf %298, %299 : vector<8x8xf32>
    %301 = math.tanh %300 : vector<8x8xf32>
    %302 = arith.mulf %295, %301 : vector<8x8xf32>
    %303 = tpu.concatenate %302, %217 in 1 : vector<8x8xf32>, vector<8x8xf32> -> vector<8x16xf32>
    %cst_64 = arith.constant dense<0.000000e+00> : vector<8x32xf32>
    %304 = tpu.matmul %303, %13, %cst_64 {dimension_numbers = #tpu.dot_dimension_numbers<[1], [0], [0], [1], [0, 0, 1, 1], [], []>} : vector<8x16xf32>, vector<16x32xf32>, vector<8x32xf32> -> vector<8x32xf32>
    %305 = arith.addf %304, %23 : vector<8x32xf32>
    %306 = vector.extract_strided_slice %305 {offsets = [0, 0], sizes = [8, 24], strides = [1, 1]} : vector<8x32xf32> to vector<8x24xf32>
    %cst_65 = arith.constant 5.000000e-01 : f32
    %307 = vector.broadcast %cst_65 : f32 to vector<8x24xf32>
    %308 = arith.mulf %307, %306 : vector<8x24xf32>
    %309 = math.tanh %308 : vector<8x24xf32>
    %cst_66 = arith.constant 5.000000e-01 : f32
    %310 = vector.broadcast %cst_66 : f32 to vector<8x24xf32>
    %311 = arith.mulf %310, %309 : vector<8x24xf32>
    %cst_67 = arith.constant 5.000000e-01 : f32
    %312 = vector.broadcast %cst_67 : f32 to vector<8x24xf32>
    %313 = arith.addf %311, %312 : vector<8x24xf32>
    %314 = vector.extract_strided_slice %313 {offsets = [0, 0], sizes = [8, 8], strides = [1, 1]} : vector<8x24xf32> to vector<8x8xf32>
    %315 = vector.extract_strided_slice %313 {offsets = [0, 8], sizes = [8, 8], strides = [1, 1]} : vector<8x24xf32> to vector<8x8xf32>
    %316 = vector.extract_strided_slice %313 {offsets = [0, 16], sizes = [8, 8], strides = [1, 1]} : vector<8x24xf32> to vector<8x8xf32>
    %317 = vector.extract_strided_slice %305 {offsets = [0, 24], sizes = [8, 8], strides = [1, 1]} : vector<8x32xf32> to vector<8x8xf32>
    %318 = math.tanh %317 : vector<8x8xf32>
    %319 = arith.mulf %315, %215 : vector<8x8xf32>
    %320 = arith.mulf %314, %318 : vector<8x8xf32>
    %321 = arith.addf %319, %320 : vector<8x8xf32>
    %322 = math.tanh %321 : vector<8x8xf32>
    %323 = arith.mulf %316, %322 : vector<8x8xf32>
    %324 = tpu.concatenate %323, %238 in 1 : vector<8x8xf32>, vector<8x8xf32> -> vector<8x16xf32>
    %cst_68 = arith.constant dense<0.000000e+00> : vector<8x32xf32>
    %325 = tpu.matmul %324, %14, %cst_68 {dimension_numbers = #tpu.dot_dimension_numbers<[1], [0], [0], [1], [0, 0, 1, 1], [], []>} : vector<8x16xf32>, vector<16x32xf32>, vector<8x32xf32> -> vector<8x32xf32>
    %326 = arith.addf %325, %26 : vector<8x32xf32>
    %327 = vector.extract_strided_slice %326 {offsets = [0, 0], sizes = [8, 24], strides = [1, 1]} : vector<8x32xf32> to vector<8x24xf32>
    %cst_69 = arith.constant 5.000000e-01 : f32
    %328 = vector.broadcast %cst_69 : f32 to vector<8x24xf32>
    %329 = arith.mulf %328, %327 : vector<8x24xf32>
    %330 = math.tanh %329 : vector<8x24xf32>
    %cst_70 = arith.constant 5.000000e-01 : f32
    %331 = vector.broadcast %cst_70 : f32 to vector<8x24xf32>
    %332 = arith.mulf %331, %330 : vector<8x24xf32>
    %cst_71 = arith.constant 5.000000e-01 : f32
    %333 = vector.broadcast %cst_71 : f32 to vector<8x24xf32>
    %334 = arith.addf %332, %333 : vector<8x24xf32>
    %335 = vector.extract_strided_slice %334 {offsets = [0, 0], sizes = [8, 8], strides = [1, 1]} : vector<8x24xf32> to vector<8x8xf32>
    %336 = vector.extract_strided_slice %334 {offsets = [0, 8], sizes = [8, 8], strides = [1, 1]} : vector<8x24xf32> to vector<8x8xf32>
    %337 = vector.extract_strided_slice %334 {offsets = [0, 16], sizes = [8, 8], strides = [1, 1]} : vector<8x24xf32> to vector<8x8xf32>
    %338 = vector.extract_strided_slice %326 {offsets = [0, 24], sizes = [8, 8], strides = [1, 1]} : vector<8x32xf32> to vector<8x8xf32>
    %339 = math.tanh %338 : vector<8x8xf32>
    %340 = arith.mulf %336, %236 : vector<8x8xf32>
    %341 = arith.mulf %335, %339 : vector<8x8xf32>
    %342 = arith.addf %340, %341 : vector<8x8xf32>
    %343 = math.tanh %342 : vector<8x8xf32>
    %344 = arith.mulf %337, %343 : vector<8x8xf32>
    %c0_72 = arith.constant 0 : index
    %c16 = arith.constant 16 : index
    %345 = vector.load %arg4[%c0_72, %c16] : memref<8x64xf32, #tpu.memory_space<vmem>>, vector<8x8xf32>
    tpu.vector_store %arg4[%c0_72, %c16], %344 {strides = array<i32>} : memref<8x64xf32, #tpu.memory_space<vmem>>, vector<8x8xf32>,
    %346 = vector.extract_strided_slice %9 {offsets = [0, 96], sizes = [8, 32], strides = [1, 1]} : vector<8x256xf32> to vector<8x32xf32>
    %cst_73 = arith.constant dense<0.000000e+00> : vector<8x32xf32>
    %347 = tpu.matmul %260, %10, %cst_73 {dimension_numbers = #tpu.dot_dimension_numbers<[1], [0], [0], [1], [0, 0, 1, 1], [], []>} : vector<8x8xf32>, vector<8x32xf32>, vector<8x32xf32> -> vector<8x32xf32>
    %348 = arith.addf %346, %347 : vector<8x32xf32>
    %349 = vector.extract_strided_slice %348 {offsets = [0, 0], sizes = [8, 24], strides = [1, 1]} : vector<8x32xf32> to vector<8x24xf32>
    %cst_74 = arith.constant 5.000000e-01 : f32
    %350 = vector.broadcast %cst_74 : f32 to vector<8x24xf32>
    %351 = arith.mulf %350, %349 : vector<8x24xf32>
    %352 = math.tanh %351 : vector<8x24xf32>
    %cst_75 = arith.constant 5.000000e-01 : f32
    %353 = vector.broadcast %cst_75 : f32 to vector<8x24xf32>
    %354 = arith.mulf %353, %352 : vector<8x24xf32>
    %cst_76 = arith.constant 5.000000e-01 : f32
    %355 = vector.broadcast %cst_76 : f32 to vector<8x24xf32>
    %356 = arith.addf %354, %355 : vector<8x24xf32>
    %357 = vector.extract_strided_slice %356 {offsets = [0, 0], sizes = [8, 8], strides = [1, 1]} : vector<8x24xf32> to vector<8x8xf32>
    %358 = vector.extract_strided_slice %356 {offsets = [0, 8], sizes = [8, 8], strides = [1, 1]} : vector<8x24xf32> to vector<8x8xf32>
    %359 = vector.extract_strided_slice %356 {offsets = [0, 16], sizes = [8, 8], strides = [1, 1]} : vector<8x24xf32> to vector<8x8xf32>
    %360 = vector.extract_strided_slice %348 {offsets = [0, 24], sizes = [8, 8], strides = [1, 1]} : vector<8x32xf32> to vector<8x8xf32>
    %361 = math.tanh %360 : vector<8x8xf32>
    %362 = arith.mulf %358, %258 : vector<8x8xf32>
    %363 = arith.mulf %357, %361 : vector<8x8xf32>
    %364 = arith.addf %362, %363 : vector<8x8xf32>
    %365 = math.tanh %364 : vector<8x8xf32>
    %366 = arith.mulf %359, %365 : vector<8x8xf32>
    %367 = tpu.concatenate %366, %281 in 1 : vector<8x8xf32>, vector<8x8xf32> -> vector<8x16xf32>
    %cst_77 = arith.constant dense<0.000000e+00> : vector<8x32xf32>
    %368 = tpu.matmul %367, %11, %cst_77 {dimension_numbers = #tpu.dot_dimension_numbers<[1], [0], [0], [1], [0, 0, 1, 1], [], []>} : vector<8x16xf32>, vector<16x32xf32>, vector<8x32xf32> -> vector<8x32xf32>
    %369 = arith.addf %368, %17 : vector<8x32xf32>
    %370 = vector.extract_strided_slice %369 {offsets = [0, 0], sizes = [8, 24], strides = [1, 1]} : vector<8x32xf32> to vector<8x24xf32>
    %cst_78 = arith.constant 5.000000e-01 : f32
    %371 = vector.broadcast %cst_78 : f32 to vector<8x24xf32>
    %372 = arith.mulf %371, %370 : vector<8x24xf32>
    %373 = math.tanh %372 : vector<8x24xf32>
    %cst_79 = arith.constant 5.000000e-01 : f32
    %374 = vector.broadcast %cst_79 : f32 to vector<8x24xf32>
    %375 = arith.mulf %374, %373 : vector<8x24xf32>
    %cst_80 = arith.constant 5.000000e-01 : f32
    %376 = vector.broadcast %cst_80 : f32 to vector<8x24xf32>
    %377 = arith.addf %375, %376 : vector<8x24xf32>
    %378 = vector.extract_strided_slice %377 {offsets = [0, 0], sizes = [8, 8], strides = [1, 1]} : vector<8x24xf32> to vector<8x8xf32>
    %379 = vector.extract_strided_slice %377 {offsets = [0, 8], sizes = [8, 8], strides = [1, 1]} : vector<8x24xf32> to vector<8x8xf32>
    %380 = vector.extract_strided_slice %377 {offsets = [0, 16], sizes = [8, 8], strides = [1, 1]} : vector<8x24xf32> to vector<8x8xf32>
    %381 = vector.extract_strided_slice %369 {offsets = [0, 24], sizes = [8, 8], strides = [1, 1]} : vector<8x32xf32> to vector<8x8xf32>
    %382 = math.tanh %381 : vector<8x8xf32>
    %383 = arith.mulf %379, %279 : vector<8x8xf32>
    %384 = arith.mulf %378, %382 : vector<8x8xf32>
    %385 = arith.addf %383, %384 : vector<8x8xf32>
    %386 = math.tanh %385 : vector<8x8xf32>
    %387 = arith.mulf %380, %386 : vector<8x8xf32>
    %388 = tpu.concatenate %387, %302 in 1 : vector<8x8xf32>, vector<8x8xf32> -> vector<8x16xf32>
    %cst_81 = arith.constant dense<0.000000e+00> : vector<8x32xf32>
    %389 = tpu.matmul %388, %12, %cst_81 {dimension_numbers = #tpu.dot_dimension_numbers<[1], [0], [0], [1], [0, 0, 1, 1], [], []>} : vector<8x16xf32>, vector<16x32xf32>, vector<8x32xf32> -> vector<8x32xf32>
    %390 = arith.addf %389, %20 : vector<8x32xf32>
    %391 = vector.extract_strided_slice %390 {offsets = [0, 0], sizes = [8, 24], strides = [1, 1]} : vector<8x32xf32> to vector<8x24xf32>
    %cst_82 = arith.constant 5.000000e-01 : f32
    %392 = vector.broadcast %cst_82 : f32 to vector<8x24xf32>
    %393 = arith.mulf %392, %391 : vector<8x24xf32>
    %394 = math.tanh %393 : vector<8x24xf32>
    %cst_83 = arith.constant 5.000000e-01 : f32
    %395 = vector.broadcast %cst_83 : f32 to vector<8x24xf32>
    %396 = arith.mulf %395, %394 : vector<8x24xf32>
    %cst_84 = arith.constant 5.000000e-01 : f32
    %397 = vector.broadcast %cst_84 : f32 to vector<8x24xf32>
    %398 = arith.addf %396, %397 : vector<8x24xf32>
    %399 = vector.extract_strided_slice %398 {offsets = [0, 0], sizes = [8, 8], strides = [1, 1]} : vector<8x24xf32> to vector<8x8xf32>
    %400 = vector.extract_strided_slice %398 {offsets = [0, 8], sizes = [8, 8], strides = [1, 1]} : vector<8x24xf32> to vector<8x8xf32>
    %401 = vector.extract_strided_slice %398 {offsets = [0, 16], sizes = [8, 8], strides = [1, 1]} : vector<8x24xf32> to vector<8x8xf32>
    %402 = vector.extract_strided_slice %390 {offsets = [0, 24], sizes = [8, 8], strides = [1, 1]} : vector<8x32xf32> to vector<8x8xf32>
    %403 = math.tanh %402 : vector<8x8xf32>
    %404 = arith.mulf %400, %300 : vector<8x8xf32>
    %405 = arith.mulf %399, %403 : vector<8x8xf32>
    %406 = arith.addf %404, %405 : vector<8x8xf32>
    %407 = math.tanh %406 : vector<8x8xf32>
    %408 = arith.mulf %401, %407 : vector<8x8xf32>
    %409 = tpu.concatenate %408, %323 in 1 : vector<8x8xf32>, vector<8x8xf32> -> vector<8x16xf32>
    %cst_85 = arith.constant dense<0.000000e+00> : vector<8x32xf32>
    %410 = tpu.matmul %409, %13, %cst_85 {dimension_numbers = #tpu.dot_dimension_numbers<[1], [0], [0], [1], [0, 0, 1, 1], [], []>} : vector<8x16xf32>, vector<16x32xf32>, vector<8x32xf32> -> vector<8x32xf32>
    %411 = arith.addf %410, %23 : vector<8x32xf32>
    %412 = vector.extract_strided_slice %411 {offsets = [0, 0], sizes = [8, 24], strides = [1, 1]} : vector<8x32xf32> to vector<8x24xf32>
    %cst_86 = arith.constant 5.000000e-01 : f32
    %413 = vector.broadcast %cst_86 : f32 to vector<8x24xf32>
    %414 = arith.mulf %413, %412 : vector<8x24xf32>
    %415 = math.tanh %414 : vector<8x24xf32>
    %cst_87 = arith.constant 5.000000e-01 : f32
    %416 = vector.broadcast %cst_87 : f32 to vector<8x24xf32>
    %417 = arith.mulf %416, %415 : vector<8x24xf32>
    %cst_88 = arith.constant 5.000000e-01 : f32
    %418 = vector.broadcast %cst_88 : f32 to vector<8x24xf32>
    %419 = arith.addf %417, %418 : vector<8x24xf32>
    %420 = vector.extract_strided_slice %419 {offsets = [0, 0], sizes = [8, 8], strides = [1, 1]} : vector<8x24xf32> to vector<8x8xf32>
    %421 = vector.extract_strided_slice %419 {offsets = [0, 8], sizes = [8, 8], strides = [1, 1]} : vector<8x24xf32> to vector<8x8xf32>
    %422 = vector.extract_strided_slice %419 {offsets = [0, 16], sizes = [8, 8], strides = [1, 1]} : vector<8x24xf32> to vector<8x8xf32>
    %423 = vector.extract_strided_slice %411 {offsets = [0, 24], sizes = [8, 8], strides = [1, 1]} : vector<8x32xf32> to vector<8x8xf32>
    %424 = math.tanh %423 : vector<8x8xf32>
    %425 = arith.mulf %421, %321 : vector<8x8xf32>
    %426 = arith.mulf %420, %424 : vector<8x8xf32>
    %427 = arith.addf %425, %426 : vector<8x8xf32>
    %428 = math.tanh %427 : vector<8x8xf32>
    %429 = arith.mulf %422, %428 : vector<8x8xf32>
    %430 = tpu.concatenate %429, %344 in 1 : vector<8x8xf32>, vector<8x8xf32> -> vector<8x16xf32>
    %cst_89 = arith.constant dense<0.000000e+00> : vector<8x32xf32>
    %431 = tpu.matmul %430, %14, %cst_89 {dimension_numbers = #tpu.dot_dimension_numbers<[1], [0], [0], [1], [0, 0, 1, 1], [], []>} : vector<8x16xf32>, vector<16x32xf32>, vector<8x32xf32> -> vector<8x32xf32>
    %432 = arith.addf %431, %26 : vector<8x32xf32>
    %433 = vector.extract_strided_slice %432 {offsets = [0, 0], sizes = [8, 24], strides = [1, 1]} : vector<8x32xf32> to vector<8x24xf32>
    %cst_90 = arith.constant 5.000000e-01 : f32
    %434 = vector.broadcast %cst_90 : f32 to vector<8x24xf32>
    %435 = arith.mulf %434, %433 : vector<8x24xf32>
    %436 = math.tanh %435 : vector<8x24xf32>
    %cst_91 = arith.constant 5.000000e-01 : f32
    %437 = vector.broadcast %cst_91 : f32 to vector<8x24xf32>
    %438 = arith.mulf %437, %436 : vector<8x24xf32>
    %cst_92 = arith.constant 5.000000e-01 : f32
    %439 = vector.broadcast %cst_92 : f32 to vector<8x24xf32>
    %440 = arith.addf %438, %439 : vector<8x24xf32>
    %441 = vector.extract_strided_slice %440 {offsets = [0, 0], sizes = [8, 8], strides = [1, 1]} : vector<8x24xf32> to vector<8x8xf32>
    %442 = vector.extract_strided_slice %440 {offsets = [0, 8], sizes = [8, 8], strides = [1, 1]} : vector<8x24xf32> to vector<8x8xf32>
    %443 = vector.extract_strided_slice %440 {offsets = [0, 16], sizes = [8, 8], strides = [1, 1]} : vector<8x24xf32> to vector<8x8xf32>
    %444 = vector.extract_strided_slice %432 {offsets = [0, 24], sizes = [8, 8], strides = [1, 1]} : vector<8x32xf32> to vector<8x8xf32>
    %445 = math.tanh %444 : vector<8x8xf32>
    %446 = arith.mulf %442, %342 : vector<8x8xf32>
    %447 = arith.mulf %441, %445 : vector<8x8xf32>
    %448 = arith.addf %446, %447 : vector<8x8xf32>
    %449 = math.tanh %448 : vector<8x8xf32>
    %450 = arith.mulf %443, %449 : vector<8x8xf32>
    %c0_93 = arith.constant 0 : index
    %c24 = arith.constant 24 : index
    %451 = vector.load %arg4[%c0_93, %c24] : memref<8x64xf32, #tpu.memory_space<vmem>>, vector<8x8xf32>
    tpu.vector_store %arg4[%c0_93, %c24], %450 {strides = array<i32>} : memref<8x64xf32, #tpu.memory_space<vmem>>, vector<8x8xf32>,
    %452 = vector.extract_strided_slice %9 {offsets = [0, 128], sizes = [8, 32], strides = [1, 1]} : vector<8x256xf32> to vector<8x32xf32>
    %cst_94 = arith.constant dense<0.000000e+00> : vector<8x32xf32>
    %453 = tpu.matmul %366, %10, %cst_94 {dimension_numbers = #tpu.dot_dimension_numbers<[1], [0], [0], [1], [0, 0, 1, 1], [], []>} : vector<8x8xf32>, vector<8x32xf32>, vector<8x32xf32> -> vector<8x32xf32>
    %454 = arith.addf %452, %453 : vector<8x32xf32>
    %455 = vector.extract_strided_slice %454 {offsets = [0, 0], sizes = [8, 24], strides = [1, 1]} : vector<8x32xf32> to vector<8x24xf32>
    %cst_95 = arith.constant 5.000000e-01 : f32
    %456 = vector.broadcast %cst_95 : f32 to vector<8x24xf32>
    %457 = arith.mulf %456, %455 : vector<8x24xf32>
    %458 = math.tanh %457 : vector<8x24xf32>
    %cst_96 = arith.constant 5.000000e-01 : f32
    %459 = vector.broadcast %cst_96 : f32 to vector<8x24xf32>
    %460 = arith.mulf %459, %458 : vector<8x24xf32>
    %cst_97 = arith.constant 5.000000e-01 : f32
    %461 = vector.broadcast %cst_97 : f32 to vector<8x24xf32>
    %462 = arith.addf %460, %461 : vector<8x24xf32>
    %463 = vector.extract_strided_slice %462 {offsets = [0, 0], sizes = [8, 8], strides = [1, 1]} : vector<8x24xf32> to vector<8x8xf32>
    %464 = vector.extract_strided_slice %462 {offsets = [0, 8], sizes = [8, 8], strides = [1, 1]} : vector<8x24xf32> to vector<8x8xf32>
    %465 = vector.extract_strided_slice %462 {offsets = [0, 16], sizes = [8, 8], strides = [1, 1]} : vector<8x24xf32> to vector<8x8xf32>
    %466 = vector.extract_strided_slice %454 {offsets = [0, 24], sizes = [8, 8], strides = [1, 1]} : vector<8x32xf32> to vector<8x8xf32>
    %467 = math.tanh %466 : vector<8x8xf32>
    %468 = arith.mulf %464, %364 : vector<8x8xf32>
    %469 = arith.mulf %463, %467 : vector<8x8xf32>
    %470 = arith.addf %468, %469 : vector<8x8xf32>
    %471 = math.tanh %470 : vector<8x8xf32>
    %472 = arith.mulf %465, %471 : vector<8x8xf32>
    %473 = tpu.concatenate %472, %387 in 1 : vector<8x8xf32>, vector<8x8xf32> -> vector<8x16xf32>
    %cst_98 = arith.constant dense<0.000000e+00> : vector<8x32xf32>
    %474 = tpu.matmul %473, %11, %cst_98 {dimension_numbers = #tpu.dot_dimension_numbers<[1], [0], [0], [1], [0, 0, 1, 1], [], []>} : vector<8x16xf32>, vector<16x32xf32>, vector<8x32xf32> -> vector<8x32xf32>
    %475 = arith.addf %474, %17 : vector<8x32xf32>
    %476 = vector.extract_strided_slice %475 {offsets = [0, 0], sizes = [8, 24], strides = [1, 1]} : vector<8x32xf32> to vector<8x24xf32>
    %cst_99 = arith.constant 5.000000e-01 : f32
    %477 = vector.broadcast %cst_99 : f32 to vector<8x24xf32>
    %478 = arith.mulf %477, %476 : vector<8x24xf32>
    %479 = math.tanh %478 : vector<8x24xf32>
    %cst_100 = arith.constant 5.000000e-01 : f32
    %480 = vector.broadcast %cst_100 : f32 to vector<8x24xf32>
    %481 = arith.mulf %480, %479 : vector<8x24xf32>
    %cst_101 = arith.constant 5.000000e-01 : f32
    %482 = vector.broadcast %cst_101 : f32 to vector<8x24xf32>
    %483 = arith.addf %481, %482 : vector<8x24xf32>
    %484 = vector.extract_strided_slice %483 {offsets = [0, 0], sizes = [8, 8], strides = [1, 1]} : vector<8x24xf32> to vector<8x8xf32>
    %485 = vector.extract_strided_slice %483 {offsets = [0, 8], sizes = [8, 8], strides = [1, 1]} : vector<8x24xf32> to vector<8x8xf32>
    %486 = vector.extract_strided_slice %483 {offsets = [0, 16], sizes = [8, 8], strides = [1, 1]} : vector<8x24xf32> to vector<8x8xf32>
    %487 = vector.extract_strided_slice %475 {offsets = [0, 24], sizes = [8, 8], strides = [1, 1]} : vector<8x32xf32> to vector<8x8xf32>
    %488 = math.tanh %487 : vector<8x8xf32>
    %489 = arith.mulf %485, %385 : vector<8x8xf32>
    %490 = arith.mulf %484, %488 : vector<8x8xf32>
    %491 = arith.addf %489, %490 : vector<8x8xf32>
    %492 = math.tanh %491 : vector<8x8xf32>
    %493 = arith.mulf %486, %492 : vector<8x8xf32>
    %494 = tpu.concatenate %493, %408 in 1 : vector<8x8xf32>, vector<8x8xf32> -> vector<8x16xf32>
    %cst_102 = arith.constant dense<0.000000e+00> : vector<8x32xf32>
    %495 = tpu.matmul %494, %12, %cst_102 {dimension_numbers = #tpu.dot_dimension_numbers<[1], [0], [0], [1], [0, 0, 1, 1], [], []>} : vector<8x16xf32>, vector<16x32xf32>, vector<8x32xf32> -> vector<8x32xf32>
    %496 = arith.addf %495, %20 : vector<8x32xf32>
    %497 = vector.extract_strided_slice %496 {offsets = [0, 0], sizes = [8, 24], strides = [1, 1]} : vector<8x32xf32> to vector<8x24xf32>
    %cst_103 = arith.constant 5.000000e-01 : f32
    %498 = vector.broadcast %cst_103 : f32 to vector<8x24xf32>
    %499 = arith.mulf %498, %497 : vector<8x24xf32>
    %500 = math.tanh %499 : vector<8x24xf32>
    %cst_104 = arith.constant 5.000000e-01 : f32
    %501 = vector.broadcast %cst_104 : f32 to vector<8x24xf32>
    %502 = arith.mulf %501, %500 : vector<8x24xf32>
    %cst_105 = arith.constant 5.000000e-01 : f32
    %503 = vector.broadcast %cst_105 : f32 to vector<8x24xf32>
    %504 = arith.addf %502, %503 : vector<8x24xf32>
    %505 = vector.extract_strided_slice %504 {offsets = [0, 0], sizes = [8, 8], strides = [1, 1]} : vector<8x24xf32> to vector<8x8xf32>
    %506 = vector.extract_strided_slice %504 {offsets = [0, 8], sizes = [8, 8], strides = [1, 1]} : vector<8x24xf32> to vector<8x8xf32>
    %507 = vector.extract_strided_slice %504 {offsets = [0, 16], sizes = [8, 8], strides = [1, 1]} : vector<8x24xf32> to vector<8x8xf32>
    %508 = vector.extract_strided_slice %496 {offsets = [0, 24], sizes = [8, 8], strides = [1, 1]} : vector<8x32xf32> to vector<8x8xf32>
    %509 = math.tanh %508 : vector<8x8xf32>
    %510 = arith.mulf %506, %406 : vector<8x8xf32>
    %511 = arith.mulf %505, %509 : vector<8x8xf32>
    %512 = arith.addf %510, %511 : vector<8x8xf32>
    %513 = math.tanh %512 : vector<8x8xf32>
    %514 = arith.mulf %507, %513 : vector<8x8xf32>
    %515 = tpu.concatenate %514, %429 in 1 : vector<8x8xf32>, vector<8x8xf32> -> vector<8x16xf32>
    %cst_106 = arith.constant dense<0.000000e+00> : vector<8x32xf32>
    %516 = tpu.matmul %515, %13, %cst_106 {dimension_numbers = #tpu.dot_dimension_numbers<[1], [0], [0], [1], [0, 0, 1, 1], [], []>} : vector<8x16xf32>, vector<16x32xf32>, vector<8x32xf32> -> vector<8x32xf32>
    %517 = arith.addf %516, %23 : vector<8x32xf32>
    %518 = vector.extract_strided_slice %517 {offsets = [0, 0], sizes = [8, 24], strides = [1, 1]} : vector<8x32xf32> to vector<8x24xf32>
    %cst_107 = arith.constant 5.000000e-01 : f32
    %519 = vector.broadcast %cst_107 : f32 to vector<8x24xf32>
    %520 = arith.mulf %519, %518 : vector<8x24xf32>
    %521 = math.tanh %520 : vector<8x24xf32>
    %cst_108 = arith.constant 5.000000e-01 : f32
    %522 = vector.broadcast %cst_108 : f32 to vector<8x24xf32>
    %523 = arith.mulf %522, %521 : vector<8x24xf32>
    %cst_109 = arith.constant 5.000000e-01 : f32
    %524 = vector.broadcast %cst_109 : f32 to vector<8x24xf32>
    %525 = arith.addf %523, %524 : vector<8x24xf32>
    %526 = vector.extract_strided_slice %525 {offsets = [0, 0], sizes = [8, 8], strides = [1, 1]} : vector<8x24xf32> to vector<8x8xf32>
    %527 = vector.extract_strided_slice %525 {offsets = [0, 8], sizes = [8, 8], strides = [1, 1]} : vector<8x24xf32> to vector<8x8xf32>
    %528 = vector.extract_strided_slice %525 {offsets = [0, 16], sizes = [8, 8], strides = [1, 1]} : vector<8x24xf32> to vector<8x8xf32>
    %529 = vector.extract_strided_slice %517 {offsets = [0, 24], sizes = [8, 8], strides = [1, 1]} : vector<8x32xf32> to vector<8x8xf32>
    %530 = math.tanh %529 : vector<8x8xf32>
    %531 = arith.mulf %527, %427 : vector<8x8xf32>
    %532 = arith.mulf %526, %530 : vector<8x8xf32>
    %533 = arith.addf %531, %532 : vector<8x8xf32>
    %534 = math.tanh %533 : vector<8x8xf32>
    %535 = arith.mulf %528, %534 : vector<8x8xf32>
    %536 = tpu.concatenate %535, %450 in 1 : vector<8x8xf32>, vector<8x8xf32> -> vector<8x16xf32>
    %cst_110 = arith.constant dense<0.000000e+00> : vector<8x32xf32>
    %537 = tpu.matmul %536, %14, %cst_110 {dimension_numbers = #tpu.dot_dimension_numbers<[1], [0], [0], [1], [0, 0, 1, 1], [], []>} : vector<8x16xf32>, vector<16x32xf32>, vector<8x32xf32> -> vector<8x32xf32>
    %538 = arith.addf %537, %26 : vector<8x32xf32>
    %539 = vector.extract_strided_slice %538 {offsets = [0, 0], sizes = [8, 24], strides = [1, 1]} : vector<8x32xf32> to vector<8x24xf32>
    %cst_111 = arith.constant 5.000000e-01 : f32
    %540 = vector.broadcast %cst_111 : f32 to vector<8x24xf32>
    %541 = arith.mulf %540, %539 : vector<8x24xf32>
    %542 = math.tanh %541 : vector<8x24xf32>
    %cst_112 = arith.constant 5.000000e-01 : f32
    %543 = vector.broadcast %cst_112 : f32 to vector<8x24xf32>
    %544 = arith.mulf %543, %542 : vector<8x24xf32>
    %cst_113 = arith.constant 5.000000e-01 : f32
    %545 = vector.broadcast %cst_113 : f32 to vector<8x24xf32>
    %546 = arith.addf %544, %545 : vector<8x24xf32>
    %547 = vector.extract_strided_slice %546 {offsets = [0, 0], sizes = [8, 8], strides = [1, 1]} : vector<8x24xf32> to vector<8x8xf32>
    %548 = vector.extract_strided_slice %546 {offsets = [0, 8], sizes = [8, 8], strides = [1, 1]} : vector<8x24xf32> to vector<8x8xf32>
    %549 = vector.extract_strided_slice %546 {offsets = [0, 16], sizes = [8, 8], strides = [1, 1]} : vector<8x24xf32> to vector<8x8xf32>
    %550 = vector.extract_strided_slice %538 {offsets = [0, 24], sizes = [8, 8], strides = [1, 1]} : vector<8x32xf32> to vector<8x8xf32>
    %551 = math.tanh %550 : vector<8x8xf32>
    %552 = arith.mulf %548, %448 : vector<8x8xf32>
    %553 = arith.mulf %547, %551 : vector<8x8xf32>
    %554 = arith.addf %552, %553 : vector<8x8xf32>
    %555 = math.tanh %554 : vector<8x8xf32>
    %556 = arith.mulf %549, %555 : vector<8x8xf32>
    %c0_114 = arith.constant 0 : index
    %c32 = arith.constant 32 : index
    %557 = vector.load %arg4[%c0_114, %c32] : memref<8x64xf32, #tpu.memory_space<vmem>>, vector<8x8xf32>
    tpu.vector_store %arg4[%c0_114, %c32], %556 {strides = array<i32>} : memref<8x64xf32, #tpu.memory_space<vmem>>, vector<8x8xf32>,
    %558 = vector.extract_strided_slice %9 {offsets = [0, 160], sizes = [8, 32], strides = [1, 1]} : vector<8x256xf32> to vector<8x32xf32>
    %cst_115 = arith.constant dense<0.000000e+00> : vector<8x32xf32>
    %559 = tpu.matmul %472, %10, %cst_115 {dimension_numbers = #tpu.dot_dimension_numbers<[1], [0], [0], [1], [0, 0, 1, 1], [], []>} : vector<8x8xf32>, vector<8x32xf32>, vector<8x32xf32> -> vector<8x32xf32>
    %560 = arith.addf %558, %559 : vector<8x32xf32>
    %561 = vector.extract_strided_slice %560 {offsets = [0, 0], sizes = [8, 24], strides = [1, 1]} : vector<8x32xf32> to vector<8x24xf32>
    %cst_116 = arith.constant 5.000000e-01 : f32
    %562 = vector.broadcast %cst_116 : f32 to vector<8x24xf32>
    %563 = arith.mulf %562, %561 : vector<8x24xf32>
    %564 = math.tanh %563 : vector<8x24xf32>
    %cst_117 = arith.constant 5.000000e-01 : f32
    %565 = vector.broadcast %cst_117 : f32 to vector<8x24xf32>
    %566 = arith.mulf %565, %564 : vector<8x24xf32>
    %cst_118 = arith.constant 5.000000e-01 : f32
    %567 = vector.broadcast %cst_118 : f32 to vector<8x24xf32>
    %568 = arith.addf %566, %567 : vector<8x24xf32>
    %569 = vector.extract_strided_slice %568 {offsets = [0, 0], sizes = [8, 8], strides = [1, 1]} : vector<8x24xf32> to vector<8x8xf32>
    %570 = vector.extract_strided_slice %568 {offsets = [0, 8], sizes = [8, 8], strides = [1, 1]} : vector<8x24xf32> to vector<8x8xf32>
    %571 = vector.extract_strided_slice %568 {offsets = [0, 16], sizes = [8, 8], strides = [1, 1]} : vector<8x24xf32> to vector<8x8xf32>
    %572 = vector.extract_strided_slice %560 {offsets = [0, 24], sizes = [8, 8], strides = [1, 1]} : vector<8x32xf32> to vector<8x8xf32>
    %573 = math.tanh %572 : vector<8x8xf32>
    %574 = arith.mulf %570, %470 : vector<8x8xf32>
    %575 = arith.mulf %569, %573 : vector<8x8xf32>
    %576 = arith.addf %574, %575 : vector<8x8xf32>
    %577 = math.tanh %576 : vector<8x8xf32>
    %578 = arith.mulf %571, %577 : vector<8x8xf32>
    %579 = tpu.concatenate %578, %493 in 1 : vector<8x8xf32>, vector<8x8xf32> -> vector<8x16xf32>
    %cst_119 = arith.constant dense<0.000000e+00> : vector<8x32xf32>
    %580 = tpu.matmul %579, %11, %cst_119 {dimension_numbers = #tpu.dot_dimension_numbers<[1], [0], [0], [1], [0, 0, 1, 1], [], []>} : vector<8x16xf32>, vector<16x32xf32>, vector<8x32xf32> -> vector<8x32xf32>
    %581 = arith.addf %580, %17 : vector<8x32xf32>
    %582 = vector.extract_strided_slice %581 {offsets = [0, 0], sizes = [8, 24], strides = [1, 1]} : vector<8x32xf32> to vector<8x24xf32>
    %cst_120 = arith.constant 5.000000e-01 : f32
    %583 = vector.broadcast %cst_120 : f32 to vector<8x24xf32>
    %584 = arith.mulf %583, %582 : vector<8x24xf32>
    %585 = math.tanh %584 : vector<8x24xf32>
    %cst_121 = arith.constant 5.000000e-01 : f32
    %586 = vector.broadcast %cst_121 : f32 to vector<8x24xf32>
    %587 = arith.mulf %586, %585 : vector<8x24xf32>
    %cst_122 = arith.constant 5.000000e-01 : f32
    %588 = vector.broadcast %cst_122 : f32 to vector<8x24xf32>
    %589 = arith.addf %587, %588 : vector<8x24xf32>
    %590 = vector.extract_strided_slice %589 {offsets = [0, 0], sizes = [8, 8], strides = [1, 1]} : vector<8x24xf32> to vector<8x8xf32>
    %591 = vector.extract_strided_slice %589 {offsets = [0, 8], sizes = [8, 8], strides = [1, 1]} : vector<8x24xf32> to vector<8x8xf32>
    %592 = vector.extract_strided_slice %589 {offsets = [0, 16], sizes = [8, 8], strides = [1, 1]} : vector<8x24xf32> to vector<8x8xf32>
    %593 = vector.extract_strided_slice %581 {offsets = [0, 24], sizes = [8, 8], strides = [1, 1]} : vector<8x32xf32> to vector<8x8xf32>
    %594 = math.tanh %593 : vector<8x8xf32>
    %595 = arith.mulf %591, %491 : vector<8x8xf32>
    %596 = arith.mulf %590, %594 : vector<8x8xf32>
    %597 = arith.addf %595, %596 : vector<8x8xf32>
    %598 = math.tanh %597 : vector<8x8xf32>
    %599 = arith.mulf %592, %598 : vector<8x8xf32>
    %600 = tpu.concatenate %599, %514 in 1 : vector<8x8xf32>, vector<8x8xf32> -> vector<8x16xf32>
    %cst_123 = arith.constant dense<0.000000e+00> : vector<8x32xf32>
    %601 = tpu.matmul %600, %12, %cst_123 {dimension_numbers = #tpu.dot_dimension_numbers<[1], [0], [0], [1], [0, 0, 1, 1], [], []>} : vector<8x16xf32>, vector<16x32xf32>, vector<8x32xf32> -> vector<8x32xf32>
    %602 = arith.addf %601, %20 : vector<8x32xf32>
    %603 = vector.extract_strided_slice %602 {offsets = [0, 0], sizes = [8, 24], strides = [1, 1]} : vector<8x32xf32> to vector<8x24xf32>
    %cst_124 = arith.constant 5.000000e-01 : f32
    %604 = vector.broadcast %cst_124 : f32 to vector<8x24xf32>
    %605 = arith.mulf %604, %603 : vector<8x24xf32>
    %606 = math.tanh %605 : vector<8x24xf32>
    %cst_125 = arith.constant 5.000000e-01 : f32
    %607 = vector.broadcast %cst_125 : f32 to vector<8x24xf32>
    %608 = arith.mulf %607, %606 : vector<8x24xf32>
    %cst_126 = arith.constant 5.000000e-01 : f32
    %609 = vector.broadcast %cst_126 : f32 to vector<8x24xf32>
    %610 = arith.addf %608, %609 : vector<8x24xf32>
    %611 = vector.extract_strided_slice %610 {offsets = [0, 0], sizes = [8, 8], strides = [1, 1]} : vector<8x24xf32> to vector<8x8xf32>
    %612 = vector.extract_strided_slice %610 {offsets = [0, 8], sizes = [8, 8], strides = [1, 1]} : vector<8x24xf32> to vector<8x8xf32>
    %613 = vector.extract_strided_slice %610 {offsets = [0, 16], sizes = [8, 8], strides = [1, 1]} : vector<8x24xf32> to vector<8x8xf32>
    %614 = vector.extract_strided_slice %602 {offsets = [0, 24], sizes = [8, 8], strides = [1, 1]} : vector<8x32xf32> to vector<8x8xf32>
    %615 = math.tanh %614 : vector<8x8xf32>
    %616 = arith.mulf %612, %512 : vector<8x8xf32>
    %617 = arith.mulf %611, %615 : vector<8x8xf32>
    %618 = arith.addf %616, %617 : vector<8x8xf32>
    %619 = math.tanh %618 : vector<8x8xf32>
    %620 = arith.mulf %613, %619 : vector<8x8xf32>
    %621 = tpu.concatenate %620, %535 in 1 : vector<8x8xf32>, vector<8x8xf32> -> vector<8x16xf32>
    %cst_127 = arith.constant dense<0.000000e+00> : vector<8x32xf32>
    %622 = tpu.matmul %621, %13, %cst_127 {dimension_numbers = #tpu.dot_dimension_numbers<[1], [0], [0], [1], [0, 0, 1, 1], [], []>} : vector<8x16xf32>, vector<16x32xf32>, vector<8x32xf32> -> vector<8x32xf32>
    %623 = arith.addf %622, %23 : vector<8x32xf32>
    %624 = vector.extract_strided_slice %623 {offsets = [0, 0], sizes = [8, 24], strides = [1, 1]} : vector<8x32xf32> to vector<8x24xf32>
    %cst_128 = arith.constant 5.000000e-01 : f32
    %625 = vector.broadcast %cst_128 : f32 to vector<8x24xf32>
    %626 = arith.mulf %625, %624 : vector<8x24xf32>
    %627 = math.tanh %626 : vector<8x24xf32>
    %cst_129 = arith.constant 5.000000e-01 : f32
    %628 = vector.broadcast %cst_129 : f32 to vector<8x24xf32>
    %629 = arith.mulf %628, %627 : vector<8x24xf32>
    %cst_130 = arith.constant 5.000000e-01 : f32
    %630 = vector.broadcast %cst_130 : f32 to vector<8x24xf32>
    %631 = arith.addf %629, %630 : vector<8x24xf32>
    %632 = vector.extract_strided_slice %631 {offsets = [0, 0], sizes = [8, 8], strides = [1, 1]} : vector<8x24xf32> to vector<8x8xf32>
    %633 = vector.extract_strided_slice %631 {offsets = [0, 8], sizes = [8, 8], strides = [1, 1]} : vector<8x24xf32> to vector<8x8xf32>
    %634 = vector.extract_strided_slice %631 {offsets = [0, 16], sizes = [8, 8], strides = [1, 1]} : vector<8x24xf32> to vector<8x8xf32>
    %635 = vector.extract_strided_slice %623 {offsets = [0, 24], sizes = [8, 8], strides = [1, 1]} : vector<8x32xf32> to vector<8x8xf32>
    %636 = math.tanh %635 : vector<8x8xf32>
    %637 = arith.mulf %633, %533 : vector<8x8xf32>
    %638 = arith.mulf %632, %636 : vector<8x8xf32>
    %639 = arith.addf %637, %638 : vector<8x8xf32>
    %640 = math.tanh %639 : vector<8x8xf32>
    %641 = arith.mulf %634, %640 : vector<8x8xf32>
    %642 = tpu.concatenate %641, %556 in 1 : vector<8x8xf32>, vector<8x8xf32> -> vector<8x16xf32>
    %cst_131 = arith.constant dense<0.000000e+00> : vector<8x32xf32>
    %643 = tpu.matmul %642, %14, %cst_131 {dimension_numbers = #tpu.dot_dimension_numbers<[1], [0], [0], [1], [0, 0, 1, 1], [], []>} : vector<8x16xf32>, vector<16x32xf32>, vector<8x32xf32> -> vector<8x32xf32>
    %644 = arith.addf %643, %26 : vector<8x32xf32>
    %645 = vector.extract_strided_slice %644 {offsets = [0, 0], sizes = [8, 24], strides = [1, 1]} : vector<8x32xf32> to vector<8x24xf32>
    %cst_132 = arith.constant 5.000000e-01 : f32
    %646 = vector.broadcast %cst_132 : f32 to vector<8x24xf32>
    %647 = arith.mulf %646, %645 : vector<8x24xf32>
    %648 = math.tanh %647 : vector<8x24xf32>
    %cst_133 = arith.constant 5.000000e-01 : f32
    %649 = vector.broadcast %cst_133 : f32 to vector<8x24xf32>
    %650 = arith.mulf %649, %648 : vector<8x24xf32>
    %cst_134 = arith.constant 5.000000e-01 : f32
    %651 = vector.broadcast %cst_134 : f32 to vector<8x24xf32>
    %652 = arith.addf %650, %651 : vector<8x24xf32>
    %653 = vector.extract_strided_slice %652 {offsets = [0, 0], sizes = [8, 8], strides = [1, 1]} : vector<8x24xf32> to vector<8x8xf32>
    %654 = vector.extract_strided_slice %652 {offsets = [0, 8], sizes = [8, 8], strides = [1, 1]} : vector<8x24xf32> to vector<8x8xf32>
    %655 = vector.extract_strided_slice %652 {offsets = [0, 16], sizes = [8, 8], strides = [1, 1]} : vector<8x24xf32> to vector<8x8xf32>
    %656 = vector.extract_strided_slice %644 {offsets = [0, 24], sizes = [8, 8], strides = [1, 1]} : vector<8x32xf32> to vector<8x8xf32>
    %657 = math.tanh %656 : vector<8x8xf32>
    %658 = arith.mulf %654, %554 : vector<8x8xf32>
    %659 = arith.mulf %653, %657 : vector<8x8xf32>
    %660 = arith.addf %658, %659 : vector<8x8xf32>
    %661 = math.tanh %660 : vector<8x8xf32>
    %662 = arith.mulf %655, %661 : vector<8x8xf32>
    %c0_135 = arith.constant 0 : index
    %c40 = arith.constant 40 : index
    %663 = vector.load %arg4[%c0_135, %c40] : memref<8x64xf32, #tpu.memory_space<vmem>>, vector<8x8xf32>
    tpu.vector_store %arg4[%c0_135, %c40], %662 {strides = array<i32>} : memref<8x64xf32, #tpu.memory_space<vmem>>, vector<8x8xf32>,
    %664 = vector.extract_strided_slice %9 {offsets = [0, 192], sizes = [8, 32], strides = [1, 1]} : vector<8x256xf32> to vector<8x32xf32>
    %cst_136 = arith.constant dense<0.000000e+00> : vector<8x32xf32>
    %665 = tpu.matmul %578, %10, %cst_136 {dimension_numbers = #tpu.dot_dimension_numbers<[1], [0], [0], [1], [0, 0, 1, 1], [], []>} : vector<8x8xf32>, vector<8x32xf32>, vector<8x32xf32> -> vector<8x32xf32>
    %666 = arith.addf %664, %665 : vector<8x32xf32>
    %667 = vector.extract_strided_slice %666 {offsets = [0, 0], sizes = [8, 24], strides = [1, 1]} : vector<8x32xf32> to vector<8x24xf32>
    %cst_137 = arith.constant 5.000000e-01 : f32
    %668 = vector.broadcast %cst_137 : f32 to vector<8x24xf32>
    %669 = arith.mulf %668, %667 : vector<8x24xf32>
    %670 = math.tanh %669 : vector<8x24xf32>
    %cst_138 = arith.constant 5.000000e-01 : f32
    %671 = vector.broadcast %cst_138 : f32 to vector<8x24xf32>
    %672 = arith.mulf %671, %670 : vector<8x24xf32>
    %cst_139 = arith.constant 5.000000e-01 : f32
    %673 = vector.broadcast %cst_139 : f32 to vector<8x24xf32>
    %674 = arith.addf %672, %673 : vector<8x24xf32>
    %675 = vector.extract_strided_slice %674 {offsets = [0, 0], sizes = [8, 8], strides = [1, 1]} : vector<8x24xf32> to vector<8x8xf32>
    %676 = vector.extract_strided_slice %674 {offsets = [0, 8], sizes = [8, 8], strides = [1, 1]} : vector<8x24xf32> to vector<8x8xf32>
    %677 = vector.extract_strided_slice %674 {offsets = [0, 16], sizes = [8, 8], strides = [1, 1]} : vector<8x24xf32> to vector<8x8xf32>
    %678 = vector.extract_strided_slice %666 {offsets = [0, 24], sizes = [8, 8], strides = [1, 1]} : vector<8x32xf32> to vector<8x8xf32>
    %679 = math.tanh %678 : vector<8x8xf32>
    %680 = arith.mulf %676, %576 : vector<8x8xf32>
    %681 = arith.mulf %675, %679 : vector<8x8xf32>
    %682 = arith.addf %680, %681 : vector<8x8xf32>
    %683 = math.tanh %682 : vector<8x8xf32>
    %684 = arith.mulf %677, %683 : vector<8x8xf32>
    %685 = tpu.concatenate %684, %599 in 1 : vector<8x8xf32>, vector<8x8xf32> -> vector<8x16xf32>
    %cst_140 = arith.constant dense<0.000000e+00> : vector<8x32xf32>
    %686 = tpu.matmul %685, %11, %cst_140 {dimension_numbers = #tpu.dot_dimension_numbers<[1], [0], [0], [1], [0, 0, 1, 1], [], []>} : vector<8x16xf32>, vector<16x32xf32>, vector<8x32xf32> -> vector<8x32xf32>
    %687 = arith.addf %686, %17 : vector<8x32xf32>
    %688 = vector.extract_strided_slice %687 {offsets = [0, 0], sizes = [8, 24], strides = [1, 1]} : vector<8x32xf32> to vector<8x24xf32>
    %cst_141 = arith.constant 5.000000e-01 : f32
    %689 = vector.broadcast %cst_141 : f32 to vector<8x24xf32>
    %690 = arith.mulf %689, %688 : vector<8x24xf32>
    %691 = math.tanh %690 : vector<8x24xf32>
    %cst_142 = arith.constant 5.000000e-01 : f32
    %692 = vector.broadcast %cst_142 : f32 to vector<8x24xf32>
    %693 = arith.mulf %692, %691 : vector<8x24xf32>
    %cst_143 = arith.constant 5.000000e-01 : f32
    %694 = vector.broadcast %cst_143 : f32 to vector<8x24xf32>
    %695 = arith.addf %693, %694 : vector<8x24xf32>
    %696 = vector.extract_strided_slice %695 {offsets = [0, 0], sizes = [8, 8], strides = [1, 1]} : vector<8x24xf32> to vector<8x8xf32>
    %697 = vector.extract_strided_slice %695 {offsets = [0, 8], sizes = [8, 8], strides = [1, 1]} : vector<8x24xf32> to vector<8x8xf32>
    %698 = vector.extract_strided_slice %695 {offsets = [0, 16], sizes = [8, 8], strides = [1, 1]} : vector<8x24xf32> to vector<8x8xf32>
    %699 = vector.extract_strided_slice %687 {offsets = [0, 24], sizes = [8, 8], strides = [1, 1]} : vector<8x32xf32> to vector<8x8xf32>
    %700 = math.tanh %699 : vector<8x8xf32>
    %701 = arith.mulf %697, %597 : vector<8x8xf32>
    %702 = arith.mulf %696, %700 : vector<8x8xf32>
    %703 = arith.addf %701, %702 : vector<8x8xf32>
    %704 = math.tanh %703 : vector<8x8xf32>
    %705 = arith.mulf %698, %704 : vector<8x8xf32>
    %706 = tpu.concatenate %705, %620 in 1 : vector<8x8xf32>, vector<8x8xf32> -> vector<8x16xf32>
    %cst_144 = arith.constant dense<0.000000e+00> : vector<8x32xf32>
    %707 = tpu.matmul %706, %12, %cst_144 {dimension_numbers = #tpu.dot_dimension_numbers<[1], [0], [0], [1], [0, 0, 1, 1], [], []>} : vector<8x16xf32>, vector<16x32xf32>, vector<8x32xf32> -> vector<8x32xf32>
    %708 = arith.addf %707, %20 : vector<8x32xf32>
    %709 = vector.extract_strided_slice %708 {offsets = [0, 0], sizes = [8, 24], strides = [1, 1]} : vector<8x32xf32> to vector<8x24xf32>
    %cst_145 = arith.constant 5.000000e-01 : f32
    %710 = vector.broadcast %cst_145 : f32 to vector<8x24xf32>
    %711 = arith.mulf %710, %709 : vector<8x24xf32>
    %712 = math.tanh %711 : vector<8x24xf32>
    %cst_146 = arith.constant 5.000000e-01 : f32
    %713 = vector.broadcast %cst_146 : f32 to vector<8x24xf32>
    %714 = arith.mulf %713, %712 : vector<8x24xf32>
    %cst_147 = arith.constant 5.000000e-01 : f32
    %715 = vector.broadcast %cst_147 : f32 to vector<8x24xf32>
    %716 = arith.addf %714, %715 : vector<8x24xf32>
    %717 = vector.extract_strided_slice %716 {offsets = [0, 0], sizes = [8, 8], strides = [1, 1]} : vector<8x24xf32> to vector<8x8xf32>
    %718 = vector.extract_strided_slice %716 {offsets = [0, 8], sizes = [8, 8], strides = [1, 1]} : vector<8x24xf32> to vector<8x8xf32>
    %719 = vector.extract_strided_slice %716 {offsets = [0, 16], sizes = [8, 8], strides = [1, 1]} : vector<8x24xf32> to vector<8x8xf32>
    %720 = vector.extract_strided_slice %708 {offsets = [0, 24], sizes = [8, 8], strides = [1, 1]} : vector<8x32xf32> to vector<8x8xf32>
    %721 = math.tanh %720 : vector<8x8xf32>
    %722 = arith.mulf %718, %618 : vector<8x8xf32>
    %723 = arith.mulf %717, %721 : vector<8x8xf32>
    %724 = arith.addf %722, %723 : vector<8x8xf32>
    %725 = math.tanh %724 : vector<8x8xf32>
    %726 = arith.mulf %719, %725 : vector<8x8xf32>
    %727 = tpu.concatenate %726, %641 in 1 : vector<8x8xf32>, vector<8x8xf32> -> vector<8x16xf32>
    %cst_148 = arith.constant dense<0.000000e+00> : vector<8x32xf32>
    %728 = tpu.matmul %727, %13, %cst_148 {dimension_numbers = #tpu.dot_dimension_numbers<[1], [0], [0], [1], [0, 0, 1, 1], [], []>} : vector<8x16xf32>, vector<16x32xf32>, vector<8x32xf32> -> vector<8x32xf32>
    %729 = arith.addf %728, %23 : vector<8x32xf32>
    %730 = vector.extract_strided_slice %729 {offsets = [0, 0], sizes = [8, 24], strides = [1, 1]} : vector<8x32xf32> to vector<8x24xf32>
    %cst_149 = arith.constant 5.000000e-01 : f32
    %731 = vector.broadcast %cst_149 : f32 to vector<8x24xf32>
    %732 = arith.mulf %731, %730 : vector<8x24xf32>
    %733 = math.tanh %732 : vector<8x24xf32>
    %cst_150 = arith.constant 5.000000e-01 : f32
    %734 = vector.broadcast %cst_150 : f32 to vector<8x24xf32>
    %735 = arith.mulf %734, %733 : vector<8x24xf32>
    %cst_151 = arith.constant 5.000000e-01 : f32
    %736 = vector.broadcast %cst_151 : f32 to vector<8x24xf32>
    %737 = arith.addf %735, %736 : vector<8x24xf32>
    %738 = vector.extract_strided_slice %737 {offsets = [0, 0], sizes = [8, 8], strides = [1, 1]} : vector<8x24xf32> to vector<8x8xf32>
    %739 = vector.extract_strided_slice %737 {offsets = [0, 8], sizes = [8, 8], strides = [1, 1]} : vector<8x24xf32> to vector<8x8xf32>
    %740 = vector.extract_strided_slice %737 {offsets = [0, 16], sizes = [8, 8], strides = [1, 1]} : vector<8x24xf32> to vector<8x8xf32>
    %741 = vector.extract_strided_slice %729 {offsets = [0, 24], sizes = [8, 8], strides = [1, 1]} : vector<8x32xf32> to vector<8x8xf32>
    %742 = math.tanh %741 : vector<8x8xf32>
    %743 = arith.mulf %739, %639 : vector<8x8xf32>
    %744 = arith.mulf %738, %742 : vector<8x8xf32>
    %745 = arith.addf %743, %744 : vector<8x8xf32>
    %746 = math.tanh %745 : vector<8x8xf32>
    %747 = arith.mulf %740, %746 : vector<8x8xf32>
    %748 = tpu.concatenate %747, %662 in 1 : vector<8x8xf32>, vector<8x8xf32> -> vector<8x16xf32>
    %cst_152 = arith.constant dense<0.000000e+00> : vector<8x32xf32>
    %749 = tpu.matmul %748, %14, %cst_152 {dimension_numbers = #tpu.dot_dimension_numbers<[1], [0], [0], [1], [0, 0, 1, 1], [], []>} : vector<8x16xf32>, vector<16x32xf32>, vector<8x32xf32> -> vector<8x32xf32>
    %750 = arith.addf %749, %26 : vector<8x32xf32>
    %751 = vector.extract_strided_slice %750 {offsets = [0, 0], sizes = [8, 24], strides = [1, 1]} : vector<8x32xf32> to vector<8x24xf32>
    %cst_153 = arith.constant 5.000000e-01 : f32
    %752 = vector.broadcast %cst_153 : f32 to vector<8x24xf32>
    %753 = arith.mulf %752, %751 : vector<8x24xf32>
    %754 = math.tanh %753 : vector<8x24xf32>
    %cst_154 = arith.constant 5.000000e-01 : f32
    %755 = vector.broadcast %cst_154 : f32 to vector<8x24xf32>
    %756 = arith.mulf %755, %754 : vector<8x24xf32>
    %cst_155 = arith.constant 5.000000e-01 : f32
    %757 = vector.broadcast %cst_155 : f32 to vector<8x24xf32>
    %758 = arith.addf %756, %757 : vector<8x24xf32>
    %759 = vector.extract_strided_slice %758 {offsets = [0, 0], sizes = [8, 8], strides = [1, 1]} : vector<8x24xf32> to vector<8x8xf32>
    %760 = vector.extract_strided_slice %758 {offsets = [0, 8], sizes = [8, 8], strides = [1, 1]} : vector<8x24xf32> to vector<8x8xf32>
    %761 = vector.extract_strided_slice %758 {offsets = [0, 16], sizes = [8, 8], strides = [1, 1]} : vector<8x24xf32> to vector<8x8xf32>
    %762 = vector.extract_strided_slice %750 {offsets = [0, 24], sizes = [8, 8], strides = [1, 1]} : vector<8x32xf32> to vector<8x8xf32>
    %763 = math.tanh %762 : vector<8x8xf32>
    %764 = arith.mulf %760, %660 : vector<8x8xf32>
    %765 = arith.mulf %759, %763 : vector<8x8xf32>
    %766 = arith.addf %764, %765 : vector<8x8xf32>
    %767 = math.tanh %766 : vector<8x8xf32>
    %768 = arith.mulf %761, %767 : vector<8x8xf32>
    %c0_156 = arith.constant 0 : index
    %c48 = arith.constant 48 : index
    %769 = vector.load %arg4[%c0_156, %c48] : memref<8x64xf32, #tpu.memory_space<vmem>>, vector<8x8xf32>
    tpu.vector_store %arg4[%c0_156, %c48], %768 {strides = array<i32>} : memref<8x64xf32, #tpu.memory_space<vmem>>, vector<8x8xf32>,
    %770 = vector.extract_strided_slice %9 {offsets = [0, 224], sizes = [8, 32], strides = [1, 1]} : vector<8x256xf32> to vector<8x32xf32>
    %cst_157 = arith.constant dense<0.000000e+00> : vector<8x32xf32>
    %771 = tpu.matmul %684, %10, %cst_157 {dimension_numbers = #tpu.dot_dimension_numbers<[1], [0], [0], [1], [0, 0, 1, 1], [], []>} : vector<8x8xf32>, vector<8x32xf32>, vector<8x32xf32> -> vector<8x32xf32>
    %772 = arith.addf %770, %771 : vector<8x32xf32>
    %773 = vector.extract_strided_slice %772 {offsets = [0, 0], sizes = [8, 24], strides = [1, 1]} : vector<8x32xf32> to vector<8x24xf32>
    %cst_158 = arith.constant 5.000000e-01 : f32
    %774 = vector.broadcast %cst_158 : f32 to vector<8x24xf32>
    %775 = arith.mulf %774, %773 : vector<8x24xf32>
    %776 = math.tanh %775 : vector<8x24xf32>
    %cst_159 = arith.constant 5.000000e-01 : f32
    %777 = vector.broadcast %cst_159 : f32 to vector<8x24xf32>
    %778 = arith.mulf %777, %776 : vector<8x24xf32>
    %cst_160 = arith.constant 5.000000e-01 : f32
    %779 = vector.broadcast %cst_160 : f32 to vector<8x24xf32>
    %780 = arith.addf %778, %779 : vector<8x24xf32>
    %781 = vector.extract_strided_slice %780 {offsets = [0, 0], sizes = [8, 8], strides = [1, 1]} : vector<8x24xf32> to vector<8x8xf32>
    %782 = vector.extract_strided_slice %780 {offsets = [0, 8], sizes = [8, 8], strides = [1, 1]} : vector<8x24xf32> to vector<8x8xf32>
    %783 = vector.extract_strided_slice %780 {offsets = [0, 16], sizes = [8, 8], strides = [1, 1]} : vector<8x24xf32> to vector<8x8xf32>
    %784 = vector.extract_strided_slice %772 {offsets = [0, 24], sizes = [8, 8], strides = [1, 1]} : vector<8x32xf32> to vector<8x8xf32>
    %785 = math.tanh %784 : vector<8x8xf32>
    %786 = arith.mulf %782, %682 : vector<8x8xf32>
    %787 = arith.mulf %781, %785 : vector<8x8xf32>
    %788 = arith.addf %786, %787 : vector<8x8xf32>
    %789 = math.tanh %788 : vector<8x8xf32>
    %790 = arith.mulf %783, %789 : vector<8x8xf32>
    %791 = tpu.concatenate %790, %705 in 1 : vector<8x8xf32>, vector<8x8xf32> -> vector<8x16xf32>
    %cst_161 = arith.constant dense<0.000000e+00> : vector<8x32xf32>
    %792 = tpu.matmul %791, %11, %cst_161 {dimension_numbers = #tpu.dot_dimension_numbers<[1], [0], [0], [1], [0, 0, 1, 1], [], []>} : vector<8x16xf32>, vector<16x32xf32>, vector<8x32xf32> -> vector<8x32xf32>
    %793 = arith.addf %792, %17 : vector<8x32xf32>
    %794 = vector.extract_strided_slice %793 {offsets = [0, 0], sizes = [8, 24], strides = [1, 1]} : vector<8x32xf32> to vector<8x24xf32>
    %cst_162 = arith.constant 5.000000e-01 : f32
    %795 = vector.broadcast %cst_162 : f32 to vector<8x24xf32>
    %796 = arith.mulf %795, %794 : vector<8x24xf32>
    %797 = math.tanh %796 : vector<8x24xf32>
    %cst_163 = arith.constant 5.000000e-01 : f32
    %798 = vector.broadcast %cst_163 : f32 to vector<8x24xf32>
    %799 = arith.mulf %798, %797 : vector<8x24xf32>
    %cst_164 = arith.constant 5.000000e-01 : f32
    %800 = vector.broadcast %cst_164 : f32 to vector<8x24xf32>
    %801 = arith.addf %799, %800 : vector<8x24xf32>
    %802 = vector.extract_strided_slice %801 {offsets = [0, 0], sizes = [8, 8], strides = [1, 1]} : vector<8x24xf32> to vector<8x8xf32>
    %803 = vector.extract_strided_slice %801 {offsets = [0, 8], sizes = [8, 8], strides = [1, 1]} : vector<8x24xf32> to vector<8x8xf32>
    %804 = vector.extract_strided_slice %801 {offsets = [0, 16], sizes = [8, 8], strides = [1, 1]} : vector<8x24xf32> to vector<8x8xf32>
    %805 = vector.extract_strided_slice %793 {offsets = [0, 24], sizes = [8, 8], strides = [1, 1]} : vector<8x32xf32> to vector<8x8xf32>
    %806 = math.tanh %805 : vector<8x8xf32>
    %807 = arith.mulf %803, %703 : vector<8x8xf32>
    %808 = arith.mulf %802, %806 : vector<8x8xf32>
    %809 = arith.addf %807, %808 : vector<8x8xf32>
    %810 = math.tanh %809 : vector<8x8xf32>
    %811 = arith.mulf %804, %810 : vector<8x8xf32>
    %812 = tpu.concatenate %811, %726 in 1 : vector<8x8xf32>, vector<8x8xf32> -> vector<8x16xf32>
    %cst_165 = arith.constant dense<0.000000e+00> : vector<8x32xf32>
    %813 = tpu.matmul %812, %12, %cst_165 {dimension_numbers = #tpu.dot_dimension_numbers<[1], [0], [0], [1], [0, 0, 1, 1], [], []>} : vector<8x16xf32>, vector<16x32xf32>, vector<8x32xf32> -> vector<8x32xf32>
    %814 = arith.addf %813, %20 : vector<8x32xf32>
    %815 = vector.extract_strided_slice %814 {offsets = [0, 0], sizes = [8, 24], strides = [1, 1]} : vector<8x32xf32> to vector<8x24xf32>
    %cst_166 = arith.constant 5.000000e-01 : f32
    %816 = vector.broadcast %cst_166 : f32 to vector<8x24xf32>
    %817 = arith.mulf %816, %815 : vector<8x24xf32>
    %818 = math.tanh %817 : vector<8x24xf32>
    %cst_167 = arith.constant 5.000000e-01 : f32
    %819 = vector.broadcast %cst_167 : f32 to vector<8x24xf32>
    %820 = arith.mulf %819, %818 : vector<8x24xf32>
    %cst_168 = arith.constant 5.000000e-01 : f32
    %821 = vector.broadcast %cst_168 : f32 to vector<8x24xf32>
    %822 = arith.addf %820, %821 : vector<8x24xf32>
    %823 = vector.extract_strided_slice %822 {offsets = [0, 0], sizes = [8, 8], strides = [1, 1]} : vector<8x24xf32> to vector<8x8xf32>
    %824 = vector.extract_strided_slice %822 {offsets = [0, 8], sizes = [8, 8], strides = [1, 1]} : vector<8x24xf32> to vector<8x8xf32>
    %825 = vector.extract_strided_slice %822 {offsets = [0, 16], sizes = [8, 8], strides = [1, 1]} : vector<8x24xf32> to vector<8x8xf32>
    %826 = vector.extract_strided_slice %814 {offsets = [0, 24], sizes = [8, 8], strides = [1, 1]} : vector<8x32xf32> to vector<8x8xf32>
    %827 = math.tanh %826 : vector<8x8xf32>
    %828 = arith.mulf %824, %724 : vector<8x8xf32>
    %829 = arith.mulf %823, %827 : vector<8x8xf32>
    %830 = arith.addf %828, %829 : vector<8x8xf32>
    %831 = math.tanh %830 : vector<8x8xf32>
    %832 = arith.mulf %825, %831 : vector<8x8xf32>
    %833 = tpu.concatenate %832, %747 in 1 : vector<8x8xf32>, vector<8x8xf32> -> vector<8x16xf32>
    %cst_169 = arith.constant dense<0.000000e+00> : vector<8x32xf32>
    %834 = tpu.matmul %833, %13, %cst_169 {dimension_numbers = #tpu.dot_dimension_numbers<[1], [0], [0], [1], [0, 0, 1, 1], [], []>} : vector<8x16xf32>, vector<16x32xf32>, vector<8x32xf32> -> vector<8x32xf32>
    %835 = arith.addf %834, %23 : vector<8x32xf32>
    %836 = vector.extract_strided_slice %835 {offsets = [0, 0], sizes = [8, 24], strides = [1, 1]} : vector<8x32xf32> to vector<8x24xf32>
    %cst_170 = arith.constant 5.000000e-01 : f32
    %837 = vector.broadcast %cst_170 : f32 to vector<8x24xf32>
    %838 = arith.mulf %837, %836 : vector<8x24xf32>
    %839 = math.tanh %838 : vector<8x24xf32>
    %cst_171 = arith.constant 5.000000e-01 : f32
    %840 = vector.broadcast %cst_171 : f32 to vector<8x24xf32>
    %841 = arith.mulf %840, %839 : vector<8x24xf32>
    %cst_172 = arith.constant 5.000000e-01 : f32
    %842 = vector.broadcast %cst_172 : f32 to vector<8x24xf32>
    %843 = arith.addf %841, %842 : vector<8x24xf32>
    %844 = vector.extract_strided_slice %843 {offsets = [0, 0], sizes = [8, 8], strides = [1, 1]} : vector<8x24xf32> to vector<8x8xf32>
    %845 = vector.extract_strided_slice %843 {offsets = [0, 8], sizes = [8, 8], strides = [1, 1]} : vector<8x24xf32> to vector<8x8xf32>
    %846 = vector.extract_strided_slice %843 {offsets = [0, 16], sizes = [8, 8], strides = [1, 1]} : vector<8x24xf32> to vector<8x8xf32>
    %847 = vector.extract_strided_slice %835 {offsets = [0, 24], sizes = [8, 8], strides = [1, 1]} : vector<8x32xf32> to vector<8x8xf32>
    %848 = math.tanh %847 : vector<8x8xf32>
    %849 = arith.mulf %845, %745 : vector<8x8xf32>
    %850 = arith.mulf %844, %848 : vector<8x8xf32>
    %851 = arith.addf %849, %850 : vector<8x8xf32>
    %852 = math.tanh %851 : vector<8x8xf32>
    %853 = arith.mulf %846, %852 : vector<8x8xf32>
    %854 = tpu.concatenate %853, %768 in 1 : vector<8x8xf32>, vector<8x8xf32> -> vector<8x16xf32>
    %cst_173 = arith.constant dense<0.000000e+00> : vector<8x32xf32>
    %855 = tpu.matmul %854, %14, %cst_173 {dimension_numbers = #tpu.dot_dimension_numbers<[1], [0], [0], [1], [0, 0, 1, 1], [], []>} : vector<8x16xf32>, vector<16x32xf32>, vector<8x32xf32> -> vector<8x32xf32>
    %856 = arith.addf %855, %26 : vector<8x32xf32>
    %857 = vector.extract_strided_slice %856 {offsets = [0, 0], sizes = [8, 24], strides = [1, 1]} : vector<8x32xf32> to vector<8x24xf32>
    %cst_174 = arith.constant 5.000000e-01 : f32
    %858 = vector.broadcast %cst_174 : f32 to vector<8x24xf32>
    %859 = arith.mulf %858, %857 : vector<8x24xf32>
    %860 = math.tanh %859 : vector<8x24xf32>
    %cst_175 = arith.constant 5.000000e-01 : f32
    %861 = vector.broadcast %cst_175 : f32 to vector<8x24xf32>
    %862 = arith.mulf %861, %860 : vector<8x24xf32>
    %cst_176 = arith.constant 5.000000e-01 : f32
    %863 = vector.broadcast %cst_176 : f32 to vector<8x24xf32>
    %864 = arith.addf %862, %863 : vector<8x24xf32>
    %865 = vector.extract_strided_slice %864 {offsets = [0, 0], sizes = [8, 8], strides = [1, 1]} : vector<8x24xf32> to vector<8x8xf32>
    %866 = vector.extract_strided_slice %864 {offsets = [0, 8], sizes = [8, 8], strides = [1, 1]} : vector<8x24xf32> to vector<8x8xf32>
    %867 = vector.extract_strided_slice %864 {offsets = [0, 16], sizes = [8, 8], strides = [1, 1]} : vector<8x24xf32> to vector<8x8xf32>
    %868 = vector.extract_strided_slice %856 {offsets = [0, 24], sizes = [8, 8], strides = [1, 1]} : vector<8x32xf32> to vector<8x8xf32>
    %869 = math.tanh %868 : vector<8x8xf32>
    %870 = arith.mulf %866, %766 : vector<8x8xf32>
    %871 = arith.mulf %865, %869 : vector<8x8xf32>
    %872 = arith.addf %870, %871 : vector<8x8xf32>
    %873 = math.tanh %872 : vector<8x8xf32>
    %874 = arith.mulf %867, %873 : vector<8x8xf32>
    %c0_177 = arith.constant 0 : index
    %c56 = arith.constant 56 : index
    %875 = vector.load %arg4[%c0_177, %c56] : memref<8x64xf32, #tpu.memory_space<vmem>>, vector<8x8xf32>
    tpu.vector_store %arg4[%c0_177, %c56], %874 {strides = array<i32>} : memref<8x64xf32, #tpu.memory_space<vmem>>, vector<8x8xf32>,
    return
  }
}

</mosaic_0001>

<bundles_post_ra>
// kernel: gcn_lstm_forward.1
= control target key start
LH: loop header
LB: loop body
LE: loop exit
PB: predicated region body
PF: predicated region fallthrough
CT: control target
= control target key end

     0   :  { %vm42_vm0 = vcmask 64512   ;;  %v2559_v9 = vmov 0.0   ;;  %vm68_vm1 = vcmask 261120   ;;  %s2560_s11 = smov 104   ;;  %s2561_s12 = smov 8   ;;  %vm167_vm2 = vcmask 130048   ;;  %s3306_s1 = inlined_call_operand.vmem [shape: f32[8,32], index: 1, kind: input, shape index: {}]   ;;  %s3307_s0 = inlined_call_operand.vmem [shape: f32[8,8], index: 0, kind: input, shape index: {}]   ;;  %s3308_s2 = inlined_call_operand.vmem [shape: f32[40,256], index: 2, kind: input, shape index: {}]   ;;  %s3309_s3 = inlined_call_operand.vmem [shape: f32[104,32], index: 3, kind: input, shape index: {}]   ;;  %s3310_s4 = inlined_call_operand.vmem [shape: f32[8,64], index: 4, kind: output, shape index: {}]  }
   0x1   :  { %v18_v0 = vld [vmem:[%s3306_s1] sm:$0xff]  ;;  %v25_v2 = vld [vmem:[%s3308_s2 + $0x30] sm:$0xff]  ;;  %v26_v3 = vld [vmem:[%s3308_s2 + $0x38] sm:$0xff]  ;;  %s2562_s17 = smov 112   ;;  %s2563_s20 = smov 32   ;;  %vm637_vm3 = vcmask 130112  }
   0x2   :  { %v17_v1 = vld [vmem:[%s3307_s0] sm:$0xff]  ;;  %61 = vmatpush.msra.mxu0 %v18_v0  ;;  %84 = vmatpush.msra.mxu1 %v25_v2  ;;  %v24_v5 = vld [vmem:[%s3308_s2 + $0x28] sm:$0xff]  ;;  %v21_v7 = vld [vmem:[%s3308_s2 + $0x10] sm:$0xff]  ;;  %s2564_s21 = smov 120   ;;  %s2565_s1 = smov 80   ;;  %vm901_vm4 = vcmask 195712  }
   0x3   :  { %v23_v4 = vld [vmem:[%s3308_s2 + $0x20] sm:$0xff]  ;;  %2259 = vmatmul.msk.f32.vlgmr.msra.gmra.mxu0 %vm42_vm0, %v17_v1  ;;  %104 = vmatpush.msra.mxu2 %v26_v3  ;;  %v22_v8 = vld [vmem:[%s3308_s2 + $0x18] sm:$0xff]  ;;  %v20_v11 = vld [vmem:[%s3308_s2 + $0x8] sm:$0xff]  ;;  %s2566_s27 = smov 64   ;;  %s2567_s8 = smov 48   ;;  %vm1173_vm5 = vcmask 261312  }
   0x4   :  { %v2619_v6 = vld [vmem:[%s3309_s3] sm:$0xff]  ;;  %85 = vmatpush.msra.mxu1 %v23_v4  ;;  %v2646_v30 = vld [vmem:[%s3309_s3 + $0x10] sm:$0xff]  ;;  %v2651_v31 = vld [vmem:[%s3309_s3 + $0x8] sm:$0xff]  ;;  %s2568_s9 = smov 96   ;;  %s2569_s16 = smov 16   ;;  %vm1440_vm6 = vcmask 326912  }
   0x5   :  { %134 = vmatpush.msra.mxu3 %v2619_v6  ;;  %105 = vmatpush.msra.mxu2 %v24_v5  ;;  %v19_v10 = vld [vmem:[%s3308_s2] sm:$0xff]  ;;  %v38_v36 = vld [vmem:[%s3309_s3 + $0x48] sm:$0xff]  ;;  %v2692_v5 = vld [vmem:[%s3309_s3 + $0x18] sm:$0xff]  ;;  %s2571_s10 = smov 40   ;;  %vm1711_vm7 = vcmask 392512   ;;  %vm1982_vm8 = vcmask 458112  }
   0x6   :  { %135 = vmatmul.f32.vlgmr.msra.gmra.mxu3 %v2559_v9  ;;  %86 = vmatpush.msra.mxu1 %v21_v7  ;;  %v27_v13 = vld [vmem:[%s3308_s2 + $0x40] sm:$0xff]  ;;  %v2663_v38 = vperm.slane %v38_v36, 0  ;;  %vm2253_vm9 = vcmask 523712  }
   0x7   :  { %106 = vmatpush.msra.mxu2 %v22_v8  ;;  %v66_v14 = vperm.slane %v27_v13, 0  ;;  %185 = vmatpush.msrb.mxu0 %v2646_v30  ;;  %v2686_v4 = vld [vmem:[%s3309_s3 + $0x20] sm:$0xff] }
   0x8   :  { %87 = vmatpush.msra.mxu1 %v19_v10  ;;  %235 = vmatpush.msrb.mxu3 %v2686_v4 }
   0x9   :  { %107 = vmatpush.msra.mxu2 %v20_v11  ;;  %186 = vmatpush.msrb.mxu0 %v2651_v31 }
   0xa   :  { %236 = vmatpush.msrb.mxu3 %v2692_v5 }
   0xb   :  { %385 = vmatpush.msra.mxu0 %v2619_v6 }
   0xc   :  { %446 = vmatpush.msra.mxu3 %v2646_v30 }
   0xe   :  { %447 = vmatpush.msra.mxu3 %v2651_v31 }
  0x80   :  { %v63_v12 = vpop.f32.mrf.mxu0 }
  0x81   :  { %2260 = vmatmul.msk.f32.vlgmr.msra.gmra.mxu1 %vm68_vm1, %v63_v12  ;;  %2261 = vmatmul.msk.f32.vlgmr.msra.gmra.mxu2 %vm68_vm1, %v63_v12 }
  0x89   :  { %v136_v16 = vpop.f32.mrf.mxu3 }
  0xfe   :  { %v89_v15 = vpop.f32.mrf.mxu1 }
  0xff   :  { %v2637_v17 = vadd.f32 %v89_v15, %v66_v14  ;;  %v39_v14 = vld [vmem:[%s3309_s3 + $0x50] sm:$0xff] }
 0x100   :  { %v2707_v15 = vperm.slane %v39_v14, 0 }
 0x101   :  { %v139_v18 = vadd.f32 %v136_v16, %v2637_v17 }
 0x103   :  { %2314 = vtanh.f32 %v139_v18  ;;  %v140_v20 = vmul.f32 0.5, %v139_v18 }
 0x105   :  { %2316 = vtanh.f32 %v140_v20 }
 0x109   :  { %v2315_v19 = vpop.eup %2314 }
 0x10a   :  { %147 = vrot.lane.b32.xlu0 %v2315_v19, %s2560_s11 }
 0x10b   :  { %v2317_v21 = vpop.eup %2316 }
 0x10c   :  { %v142_v22 = vmul.f32 0.5, %v2317_v21 }
 0x10e   :  { %v143_v23 = vadd.f32 0.5, %v142_v22 }
 0x110   :  { %v145_v26 = vmul.f32 0.0, %v143_v23 }
 0x17c   :  { %v148_v24 = vpop.permute.xlu0 %147 }
 0x17d   :  { %v150_v25 = vmul.f32 %v148_v24, %v143_v23 }
 0x17f   :  { %152 = vrot.lane.b32.xlu0 %v150_v25, %s2561_s12 }
 0x1f1   :  { %v153_v27 = vpop.permute.xlu0 %152 }
 0x1f2   :  { %v155_v28 = vadd.f32 %v153_v27, %v145_v26 }
 0x1f4   :  { %2318 = vtanh.f32 %v155_v28 }
 0x1fa   :  { %v2319_v29 = vpop.eup %2318 }
 0x1fb   :  { %158 = vrot.lane.b32.xlu1 %v2319_v29, %s2561_s12 }
 0x26d   :  { %v159_v32 = vpop.permute.xlu1 %158 }
 0x26e   :  { %v161_v33 = vmul.f32 %v159_v32, %v143_v23 }
 0x270   :  { %163 = vrot.lane.b32.xlu1 %v161_v33, %s2562_s17 }
 0x2e2   :  { %v164_v34 = vpop.permute.xlu1 %163 }
 0x2e3   :  { %v166_v35 = vsel %vm42_vm0, %v164_v34, 0.0 }
 0x2e4   :  { %2262 = vmatmul.msk.f32.vlgmr.msrb.gmra.mxu0 %vm167_vm2, %v166_v35 }
 0x2ec   :  { %2266 = vmatmul.msk.f32.vlgmr.msra.gmra.mxu0 %vm42_vm0, %v164_v34 }
 0x361   :  { %v188_v37 = vpop.f32.mrf.mxu0 }
 0x362   :  { %v189_v39 = vadd.f32 %v188_v37, %v2663_v38 }
 0x364   :  { %2320 = vtanh.f32 %v189_v39  ;;  %v191_v42 = vmul.f32 0.5, %v189_v39 }
 0x366   :  { %2322 = vtanh.f32 %v191_v42 }
 0x369   :  { %v387_v40 = vpop.f32.mrf.mxu0 }
 0x36a   :  { %391 = vrot.lane.b32.xlu2 %v387_v40, %s2563_s20  ;;  %v2321_v41 = vpop.eup %2320 }
 0x36c   :  { %v2323_v43 = vpop.eup %2322 }
 0x36d   :  { %v193_v46 = vmul.f32 0.5, %v2323_v43 }
 0x36f   :  { %v194_v47 = vadd.f32 0.5, %v193_v46 }
 0x371   :  { %v196_v56 = vmul.f32 0.0, %v194_v47 }
 0x372   :  { %198 = vrot.lane.b32.xlu2 %v2321_v41, %s2560_s11 }
 0x37a   :  { %401 = vrot.lane.b32.xlu2 %v155_v28, %s2563_s20 }
 0x3c4   :  { %v392_v44 = vpop.permute.xlu2 %391 }
 0x3c5   :  { %v394_v45 = vadd.f32 %v392_v44, %v2637_v17 }
 0x3c7   :  { %2324 = vtanh.f32 %v394_v45  ;;  %v395_v51 = vmul.f32 0.5, %v394_v45 }
 0x3c9   :  { %2326 = vtanh.f32 %v395_v51 }
 0x3cc   :  { %v199_v48 = vpop.permute.xlu2 %198 }
 0x3cd   :  { %v2325_v49 = vpop.eup %2324  ;;  %v201_v50 = vmul.f32 %v199_v48, %v194_v47 }
 0x3ce   :  { %406 = vrot.lane.b32.xlu0 %v2325_v49, %s2560_s11 }
 0x3cf   :  { %203 = vrot.lane.b32.xlu1 %v201_v50, %s2561_s12  ;;  %v2327_v52 = vpop.eup %2326 }
 0x3d0   :  { %v397_v53 = vmul.f32 0.5, %v2327_v52 }
 0x3d2   :  { %v398_v54 = vadd.f32 0.5, %v397_v53 }
 0x3d4   :  { %v402_v61 = vpop.permute.xlu2 %401 }
 0x3d5   :  { %v404_v62 = vmul.f32 %v402_v61, %v398_v54 }
 0x440   :  { %v407_v55 = vpop.permute.xlu0 %406 }
 0x441   :  { %v409_v57 = vmul.f32 %v407_v55, %v398_v54  ;;  %v204_v58 = vpop.permute.xlu1 %203 }
 0x442   :  { %v2672_v59 = vadd.f32 %v204_v58, %v196_v56  ;;  %v2734_v58 = vld [vmem:[%s3309_s3 + $0x30] sm:$0xff] }
 0x443   :  { %411 = vrot.lane.b32.xlu0 %v409_v57, %s2561_s12  ;;  %285 = vmatpush.msrb.mxu1 %v2734_v58 }
 0x444   :  { %2328 = vtanh.f32 %v2672_v59 }
 0x44a   :  { %v2329_v60 = vpop.eup %2328 }
 0x44b   :  { %209 = vrot.lane.b32.xlu1 %v2329_v60, %s2561_s12  ;;  %v2740_v60 = vld [vmem:[%s3309_s3 + $0x28] sm:$0xff] }
 0x44c   :  { %286 = vmatpush.msrb.mxu1 %v2740_v60 }
 0x44e   :  { %499 = vmatpush.msra.mxu1 %v2686_v4 }
 0x450   :  { %500 = vmatpush.msra.mxu1 %v2692_v5 }
 0x4b5   :  { %v412_v63 = vpop.permute.xlu0 %411 }
 0x4b6   :  { %v2677_v0 = vadd.f32 %v412_v63, %v404_v62 }
 0x4b8   :  { %2330 = vtanh.f32 %v2677_v0 }
 0x4bd   :  { %v210_v1 = vpop.permute.xlu1 %209 }
 0x4be   :  { %v2331_v2 = vpop.eup %2330  ;;  %v212_v3 = vmul.f32 %v210_v1, %v194_v47 }
 0x4bf   :  { %417 = vrot.lane.b32.xlu2 %v2331_v2, %s2561_s12 }
 0x4c0   :  { %214 = vrot.lane.b32.xlu0 %v212_v3, %s2562_s17 }
 0x4c7   :  { %425 = vrot.lane.b32.xlu2 %v212_v3, %s2564_s21 }
 0x519   :  { %v418_v7 = vpop.permute.xlu2 %417 }
 0x51a   :  { %v420_v8 = vmul.f32 %v418_v7, %v398_v54 }
 0x51c   :  { %422 = vrot.lane.b32.xlu1 %v420_v8, %s2565_s1  ;;  %v40_v8 = vld [vmem:[%s3309_s3 + $0x58] sm:$0xff] }
 0x521   :  { %v426_v11 = vpop.permute.xlu2 %425 }
 0x532   :  { %v215_v9 = vpop.permute.xlu0 %214 }
 0x533   :  { %v217_v10 = vsel %vm42_vm0, %v215_v9, 0.0  ;;  %v2756_v9 = vperm.slane %v40_v8, 0 }
 0x534   :  { %2263 = vmatmul.msk.f32.vlgmr.msrb.gmra.mxu3 %vm167_vm2, %v217_v10 }
 0x535   :  { %656 = vmatpush.msrb.mxu3 %v2619_v6 }
 0x58e   :  { %v423_v12 = vpop.permute.xlu1 %422 }
 0x58f   :  { %v428_v13 = vsel %vm42_vm0, %v423_v12, %v426_v11 }
 0x590   :  { %2267 = vmatmul.msk.f32.vlgmr.msra.gmra.mxu3 %vm167_vm2, %v428_v13 }
 0x598   :  { %2271 = vmatmul.msk.f32.vlgmr.msrb.gmra.mxu3 %vm42_vm0, %v423_v12 }
 0x5b7   :  { %v238_v16 = vpop.f32.mrf.mxu3 }
 0x5b8   :  { %v239_v18 = vadd.f32 %v238_v16, %v2707_v15 }
 0x5ba   :  { %2332 = vtanh.f32 %v239_v18  ;;  %v241_v24 = vmul.f32 0.5, %v239_v18 }
 0x5c0   :  { %v2333_v19 = vpop.eup %2332 }
 0x5c1   :  { %248 = vrot.lane.b32.xlu1 %v2333_v19, %s2560_s11 }
 0x613   :  { %v449_v20 = vpop.f32.mrf.mxu3 }
 0x614   :  { %v450_v21 = vadd.f32 %v449_v20, %v2663_v38 }
 0x616   :  { %2334 = vtanh.f32 %v450_v21  ;;  %v452_v32 = vmul.f32 0.5, %v450_v21 }
 0x617   :  { %2336 = vtanh.f32 %v241_v24 }
 0x618   :  { %2338 = vtanh.f32 %v452_v32 }
 0x61b   :  { %v658_v22 = vpop.f32.mrf.mxu3 }
 0x61c   :  { %v2335_v23 = vpop.eup %2334  ;;  %662 = vrot.lane.b32.xlu0 %v658_v22, %s2566_s27 }
 0x61d   :  { %459 = vrot.lane.b32.xlu2 %v2335_v23, %s2560_s11  ;;  %v2337_v25 = vpop.eup %2336 }
 0x61e   :  { %v243_v26 = vmul.f32 0.5, %v2337_v25  ;;  %v2339_v33 = vpop.eup %2338 }
 0x61f   :  { %v454_v34 = vmul.f32 0.5, %v2339_v33 }
 0x620   :  { %v244_v27 = vadd.f32 0.5, %v243_v26 }
 0x621   :  { %v455_v35 = vadd.f32 0.5, %v454_v34 }
 0x622   :  { %v246_v42 = vmul.f32 0.0, %v244_v27 }
 0x623   :  { %v457_v46 = vmul.f32 %v455_v35, %v2672_v59 }
 0x633   :  { %v249_v28 = vpop.permute.xlu1 %248 }
 0x634   :  { %v251_v29 = vmul.f32 %v249_v28, %v244_v27 }
 0x636   :  { %253 = vrot.lane.b32.xlu1 %v251_v29, %s2561_s12 }
 0x677   :  { %v460_v36 = vpop.permute.xlu2 %459 }
 0x678   :  { %v462_v37 = vmul.f32 %v460_v36, %v455_v35 }
 0x67a   :  { %464 = vrot.lane.b32.xlu2 %v462_v37, %s2561_s12 }
 0x68e   :  { %v663_v39 = vpop.permute.xlu0 %662 }
 0x68f   :  { %v665_v40 = vadd.f32 %v663_v39, %v2637_v17 }
 0x691   :  { %2340 = vtanh.f32 %v665_v40  ;;  %v666_v50 = vmul.f32 0.5, %v665_v40 }
 0x697   :  { %v2341_v41 = vpop.eup %2340 }
 0x698   :  { %677 = vrot.lane.b32.xlu0 %v2341_v41, %s2560_s11 }
 0x6a0   :  { %672 = vrot.lane.b32.xlu0 %v2677_v0, %s2563_s20 }
 0x6a8   :  { %v254_v43 = vpop.permute.xlu1 %253 }
 0x6a9   :  { %v2720_v44 = vadd.f32 %v254_v43, %v246_v42 }
 0x6ab   :  { %2342 = vtanh.f32 %v2720_v44 }
 0x6b1   :  { %v2343_v45 = vpop.eup %2342 }
 0x6b2   :  { %259 = vrot.lane.b32.xlu2 %v2343_v45, %s2561_s12 }
 0x6d4   :  { %v465_v47 = vpop.permute.xlu2 %464 }
 0x6d5   :  { %v2725_v48 = vadd.f32 %v465_v47, %v457_v46 }
 0x6d7   :  { %2344 = vtanh.f32 %v2725_v48 }
 0x6d8   :  { %2346 = vtanh.f32 %v666_v50 }
 0x6dd   :  { %v2345_v49 = vpop.eup %2344 }
 0x6de   :  { %470 = vrot.lane.b32.xlu0 %v2345_v49, %s2561_s12  ;;  %v2347_v51 = vpop.eup %2346 }
 0x6df   :  { %v668_v52 = vmul.f32 0.5, %v2347_v51 }
 0x6e1   :  { %v669_v53 = vadd.f32 0.5, %v668_v52 }
 0x70a   :  { %v678_v54 = vpop.permute.xlu0 %677 }
 0x70b   :  { %v680_v55 = vmul.f32 %v678_v54, %v669_v53 }
 0x70c   :  { %v260_v56 = vpop.permute.xlu2 %259 }
 0x70d   :  { %v262_v57 = vmul.f32 %v260_v56, %v244_v27  ;;  %682 = vrot.lane.b32.xlu1 %v680_v55, %s2561_s12 }
 0x70f   :  { %264 = vrot.lane.b32.xlu2 %v262_v57, %s2562_s17 }
 0x712   :  { %v673_v59 = vpop.permute.xlu0 %672 }
 0x713   :  { %v675_v1 = vmul.f32 %v673_v59, %v669_v53 }
 0x750   :  { %v471_v61 = vpop.permute.xlu0 %470 }
 0x751   :  { %v473_v62 = vmul.f32 %v471_v61, %v455_v35 }
 0x753   :  { %475 = vrot.lane.b32.xlu0 %v473_v62, %s2562_s17 }
 0x75b   :  { %696 = vrot.lane.b32.xlu0 %v473_v62, %s2564_s21 }
 0x769   :  { %v265_v63 = vpop.permute.xlu2 %264 }
 0x76a   :  { %v267_v0 = vsel %vm42_vm0, %v265_v63, 0.0 }
 0x76b   :  { %2264 = vmatmul.msk.f32.vlgmr.msrb.gmra.mxu1 %vm167_vm2, %v267_v0 }
 0x76c   :  { %717 = vmatpush.msrb.mxu1 %v2646_v30 }
 0x76e   :  { %718 = vmatpush.msrb.mxu1 %v2651_v31 }
 0x77f   :  { %v683_v2 = vpop.permute.xlu1 %682 }
 0x780   :  { %v685_v3 = vadd.f32 %v683_v2, %v675_v1 }
 0x782   :  { %2348 = vtanh.f32 %v685_v3 }
 0x788   :  { %v2349_v7 = vpop.eup %2348 }
 0x789   :  { %688 = vrot.lane.b32.xlu1 %v2349_v7, %s2561_s12 }
 0x791   :  { %478 = vrot.lane.b32.xlu1 %v262_v57, %s2564_s21 }
 0x7c5   :  { %v476_v14 = vpop.permute.xlu0 %475 }
 0x7cd   :  { %v697_v20 = vpop.permute.xlu0 %696 }
 0x7e8   :  { %v288_v10 = vpop.f32.mrf.mxu1 }
 0x7e9   :  { %v289_v11 = vadd.f32 %v288_v10, %v2756_v9 }
 0x7eb   :  { %2350 = vtanh.f32 %v289_v11  ;;  %v291_v23 = vmul.f32 0.5, %v289_v11 }
 0x7ed   :  { %2352 = vtanh.f32 %v291_v23 }
 0x7f1   :  { %v2351_v19 = vpop.eup %2350 }
 0x7f3   :  { %v2353_v26 = vpop.eup %2352 }
 0x7f4   :  { %v293_v28 = vmul.f32 0.5, %v2353_v26 }
 0x7f6   :  { %v294_v32 = vadd.f32 0.5, %v293_v28 }
 0x7f8   :  { %v296_v54 = vmul.f32 0.0, %v294_v32 }
 0x7fb   :  { %v689_v12 = vpop.permute.xlu1 %688 }
 0x7fc   :  { %v691_v13 = vmul.f32 %v689_v12, %v669_v53 }
 0x7fe   :  { %693 = vrot.lane.b32.xlu2 %v691_v13, %s2567_s8 }
 0x803   :  { %v479_v16 = vpop.permute.xlu1 %478 }
 0x804   :  { %v481_v18 = vsel %vm42_vm0, %v476_v14, %v479_v16 }
 0x805   :  { %2268 = vmatmul.msk.f32.vlgmr.msra.gmra.mxu1 %vm167_vm2, %v481_v18 }
 0x806   :  { %298 = vrot.lane.b32.xlu2 %v2351_v19, %s2560_s11  ;;  %920 = vmatpush.msra.mxu1 %v2619_v6 }
 0x858   :  { %v694_v21 = vpop.permute.xlu2 %693 }
 0x859   :  { %v699_v22 = vsel %vm42_vm0, %v694_v21, %v697_v20 }
 0x85a   :  { %2272 = vmatmul.msk.f32.vlgmr.msrb.gmra.mxu1 %vm167_vm2, %v699_v22 }
 0x860   :  { %v299_v29 = vpop.permute.xlu2 %298 }
 0x861   :  { %v301_v33 = vmul.f32 %v299_v29, %v294_v32 }
 0x862   :  { %2276 = vmatmul.msk.f32.vlgmr.msra.gmra.mxu1 %vm42_vm0, %v694_v21  ;;  %v2808_v21 = vld [vmem:[%s3309_s3 + $0x38] sm:$0xff] }
 0x882   :  { %v502_v24 = vpop.f32.mrf.mxu1 }
 0x883   :  { %v503_v25 = vadd.f32 %v502_v24, %v2707_v15 }
 0x885   :  { %2354 = vtanh.f32 %v503_v25  ;;  %v505_v39 = vmul.f32 0.5, %v503_v25 }
 0x88b   :  { %v2355_v27 = vpop.eup %2354 }
 0x88c   :  { %512 = vrot.lane.b32.xlu0 %v2355_v27, %s2560_s11 }
 0x894   :  { %303 = vrot.lane.b32.xlu0 %v301_v33, %s2561_s12 }
 0x89c   :  { %936 = vrot.lane.b32.xlu0 %v685_v3, %s2563_s20 }
 0x8d7   :  { %v720_v34 = vpop.f32.mrf.mxu1 }
 0x8d8   :  { %v721_v35 = vadd.f32 %v720_v34, %v2663_v38 }
 0x8da   :  { %2356 = vtanh.f32 %v721_v35  ;;  %v723_v46 = vmul.f32 0.5, %v721_v35 }
 0x8db   :  { %2358 = vtanh.f32 %v505_v39 }
 0x8dc   :  { %2360 = vtanh.f32 %v723_v46 }
 0x8df   :  { %v922_v36 = vpop.f32.mrf.mxu1 }
 0x8e0   :  { %926 = vrot.lane.b32.xlu1 %v922_v36, %s2568_s9  ;;  %v2357_v37 = vpop.eup %2356 }
 0x8e1   :  { %v2359_v40 = vpop.eup %2358 }
 0x8e2   :  { %v507_v41 = vmul.f32 0.5, %v2359_v40  ;;  %v2361_v50 = vpop.eup %2360 }
 0x8e3   :  { %v725_v52 = vmul.f32 0.5, %v2361_v50 }
 0x8e4   :  { %v508_v42 = vadd.f32 0.5, %v507_v41  ;;  %v109_v41 = vpop.f32.mrf.mxu2 }
 0x8e5   :  { %v726_v56 = vadd.f32 0.5, %v725_v52 }
 0x8e7   :  { %v728_v11 = vmul.f32 %v726_v56, %v2725_v48  ;;  %v2799_v48 = vld [vmem:[%s3309_s3 + $0x40] sm:$0xff] }
 0x8e8   :  { %730 = vrot.lane.b32.xlu1 %v2357_v37, %s2560_s11  ;;  %335 = vmatpush.msrb.mxu2 %v2799_v48 }
 0x8e9   :  { %605 = vmatpush.msrb.mxu0 %v2799_v48  ;;  %873 = vmatpush.msra.mxu3 %v2799_v48 }
 0x8ea   :  { %1141 = vmatpush.msrb.mxu1 %v2799_v48  ;;  %336 = vmatpush.msrb.mxu2 %v2808_v21 }
 0x8eb   :  { %606 = vmatpush.msrb.mxu0 %v2808_v21  ;;  %874 = vmatpush.msra.mxu3 %v2808_v21 }
 0x8ec   :  { %552 = vmatpush.msra.mxu2 %v2734_v58  ;;  %1142 = vmatpush.msrb.mxu1 %v2808_v21 }
 0x8ed   :  { %823 = vmatpush.msra.mxu0 %v2734_v58  ;;  %1087 = vmatpush.msrb.mxu3 %v2734_v58 }
 0x8ee   :  { %553 = vmatpush.msra.mxu2 %v2740_v60  ;;  %1355 = vmatpush.msra.mxu1 %v2734_v58 }
 0x8ef   :  { %824 = vmatpush.msra.mxu0 %v2740_v60  ;;  %1088 = vmatpush.msrb.mxu3 %v2740_v60 }
 0x8f0   :  { %1356 = vmatpush.msra.mxu1 %v2740_v60 }
 0x8fe   :  { %v513_v43 = vpop.permute.xlu0 %512 }
 0x8ff   :  { %v515_v45 = vmul.f32 %v513_v43, %v508_v42 }
 0x901   :  { %517 = vrot.lane.b32.xlu1 %v515_v45, %s2561_s12 }
 0x906   :  { %v304_v53 = vpop.permute.xlu0 %303 }
 0x907   :  { %v2777_v57 = vadd.f32 %v304_v53, %v296_v54 }
 0x90e   :  { %v937_v18 = vpop.permute.xlu0 %936 }
 0x952   :  { %v927_v47 = vpop.permute.xlu1 %926 }
 0x953   :  { %v929_v49 = vadd.f32 %v927_v47, %v2637_v17  ;;  %v510_v17 = vmul.f32 %v508_v42, %v2720_v44 }
 0x955   :  { %2362 = vtanh.f32 %v929_v49  ;;  %v930_v1 = vmul.f32 0.5, %v929_v49 }
 0x956   :  { %2364 = vtanh.f32 %v2777_v57 }
 0x95a   :  { %v731_v55 = vpop.permute.xlu1 %730 }
 0x95b   :  { %v2363_v51 = vpop.eup %2362  ;;  %v733_v59 = vmul.f32 %v731_v55, %v726_v56 }
 0x95c   :  { %941 = vrot.lane.b32.xlu2 %v2363_v51, %s2560_s11  ;;  %v2365_v61 = vpop.eup %2364 }
 0x964   :  { %735 = vrot.lane.b32.xlu2 %v733_v59, %s2561_s12 }
 0x96c   :  { %309 = vrot.lane.b32.xlu2 %v2365_v61, %s2561_s12 }
 0x973   :  { %v518_v62 = vpop.permute.xlu1 %517 }
 0x974   :  { %v2783_v63 = vadd.f32 %v518_v62, %v510_v17 }
 0x976   :  { %2366 = vtanh.f32 %v2783_v63 }
 0x977   :  { %2368 = vtanh.f32 %v930_v1 }
 0x97c   :  { %v2367_v0 = vpop.eup %2366 }
 0x97d   :  { %523 = vrot.lane.b32.xlu0 %v2367_v0, %s2561_s12  ;;  %v2369_v2 = vpop.eup %2368 }
 0x97e   :  { %v932_v3 = vmul.f32 0.5, %v2369_v2 }
 0x980   :  { %v933_v7 = vadd.f32 0.5, %v932_v3 }
 0x982   :  { %v939_v22 = vmul.f32 %v937_v18, %v933_v7 }
 0x9b6   :  { %v942_v8 = vpop.permute.xlu2 %941 }
 0x9b7   :  { %v944_v10 = vmul.f32 %v942_v8, %v933_v7 }
 0x9b9   :  { %946 = vrot.lane.b32.xlu1 %v944_v10, %s2561_s12 }
 0x9be   :  { %v736_v44 = vpop.permute.xlu2 %735 }
 0x9bf   :  { %v2789_v12 = vadd.f32 %v736_v44, %v728_v11 }
 0x9c1   :  { %2370 = vtanh.f32 %v2789_v12 }
 0x9c6   :  { %v310_v13 = vpop.permute.xlu2 %309 }
 0x9c7   :  { %v2371_v14 = vpop.eup %2370  ;;  %v312_v16 = vmul.f32 %v310_v13, %v294_v32 }
 0x9c8   :  { %741 = vrot.lane.b32.xlu1 %v2371_v14, %s2561_s12 }
 0x9c9   :  { %314 = vrot.lane.b32.xlu0 %v312_v16, %s2562_s17 }
 0x9ef   :  { %v524_v19 = vpop.permute.xlu0 %523 }
 0x9f0   :  { %v526_v20 = vmul.f32 %v524_v19, %v508_v42  ;;  %v41_v42 = vld [vmem:[%s3309_s3 + $0x60] sm:$0xff] }
 0x9f1   :  { %v2844_v43 = vperm.slane %v41_v42, 0 }
 0x9f2   :  { %528 = vrot.lane.b32.xlu1 %v526_v20, %s2562_s17 }
 0x9fa   :  { %749 = vrot.lane.b32.xlu1 %v526_v20, %s2564_s21 }
 0xa2b   :  { %v947_v23 = vpop.permute.xlu1 %946 }
 0xa2c   :  { %v2822_v24 = vadd.f32 %v947_v23, %v939_v22 }
 0xa2e   :  { %2372 = vtanh.f32 %v2822_v24 }
 0xa34   :  { %v2373_v25 = vpop.eup %2372 }
 0xa35   :  { %952 = vrot.lane.b32.xlu2 %v2373_v25, %s2561_s12 }
 0xa3a   :  { %v742_v26 = vpop.permute.xlu1 %741 }
 0xa3b   :  { %v744_v27 = vmul.f32 %v742_v26, %v726_v56  ;;  %v315_v28 = vpop.permute.xlu0 %314 }
 0xa3c   :  { %v317_v29 = vsel %vm42_vm0, %v315_v28, 0.0 }
 0xa3d   :  { %531 = vrot.lane.b32.xlu2 %v312_v16, %s2564_s21  ;;  %746 = vrot.lane.b32.xlu0 %v744_v27, %s2562_s17 }
 0xa3e   :  { %2265 = vmatmul.msk.f32.vlgmr.msrb.gmra.mxu2 %vm167_vm2, %v317_v29 }
 0xa3f   :  { %770 = vmatpush.msrb.mxu2 %v2686_v4 }
 0xa41   :  { %771 = vmatpush.msrb.mxu2 %v2692_v5 }
 0xa45   :  { %960 = vrot.lane.b32.xlu0 %v744_v27, %s2564_s21 }
 0xa64   :  { %v529_v34 = vpop.permute.xlu1 %528 }
 0xa6c   :  { %v750_v37 = vpop.permute.xlu1 %749 }
 0xa8f   :  { %v953_v32 = vpop.permute.xlu2 %952 }
 0xa90   :  { %v955_v33 = vmul.f32 %v953_v32, %v933_v7  ;;  %v28_v7 = vld [vmem:[%s3308_s2 + $0x48] sm:$0xff] }
 0xa91   :  { %v67_v11 = vperm.slane %v28_v7, 0 }
 0xa92   :  { %957 = vrot.lane.b32.xlu2 %v955_v33, %s2569_s16 }
 0xa93   :  { %v2867_v13 = vadd.f32 %v109_v41, %v67_v11 }
 0xa97   :  { %v532_v35 = vpop.permute.xlu2 %531 }
 0xa98   :  { %v534_v36 = vsel %vm42_vm0, %v529_v34, %v532_v35 }
 0xa99   :  { %2269 = vmatmul.msk.f32.vlgmr.msra.gmra.mxu2 %vm167_vm2, %v534_v36 }
 0xa9a   :  { %981 = vmatpush.msra.mxu2 %v2646_v30 }
 0xa9c   :  { %982 = vmatpush.msra.mxu2 %v2651_v31 }
 0xaaf   :  { %v747_v39 = vpop.permute.xlu0 %746 }
 0xab0   :  { %v752_v40 = vsel %vm42_vm0, %v747_v39, %v750_v37 }
 0xab1   :  { %2273 = vmatmul.msk.f32.vlgmr.msrb.gmra.mxu2 %vm167_vm2, %v752_v40 }
 0xab2   :  { %1192 = vmatpush.msrb.mxu2 %v2619_v6 }
 0xab7   :  { %v961_v49 = vpop.permute.xlu0 %960 }
 0xac1   :  { %v338_v45 = vpop.f32.mrf.mxu2 }
 0xac2   :  { %v339_v46 = vadd.f32 %v338_v45, %v2844_v43 }
 0xac4   :  { %2374 = vtanh.f32 %v339_v46  ;;  %v341_v55 = vmul.f32 0.5, %v339_v46 }
 0xaca   :  { %v2375_v47 = vpop.eup %2374 }
 0xacb   :  { %348 = vrot.lane.b32.xlu1 %v2375_v47, %s2560_s11 }
 0xaec   :  { %v958_v50 = vpop.permute.xlu2 %957 }
 0xaed   :  { %v963_v51 = vsel %vm42_vm0, %v958_v50, %v961_v49 }
 0xaee   :  { %2277 = vmatmul.msk.f32.vlgmr.msra.gmra.mxu2 %vm167_vm2, %v963_v51 }
 0xaef   :  { %1408 = vmatpush.msra.mxu2 %v2799_v48 }
 0xaf1   :  { %1409 = vmatpush.msra.mxu2 %v2808_v21 }
 0xaf6   :  { %2281 = vmatmul.msk.f32.vlgmr.msrb.gmra.mxu2 %vm42_vm0, %v958_v50 }
 0xaf7   :  { %1626 = vmatpush.msrb.mxu2 %v2734_v58 }
 0xaf9   :  { %1627 = vmatpush.msrb.mxu2 %v2740_v60 }
 0xb1c   :  { %v555_v52 = vpop.f32.mrf.mxu2 }
 0xb1d   :  { %v556_v53 = vadd.f32 %v555_v52, %v2756_v9 }
 0xb1f   :  { %2376 = vtanh.f32 %v556_v53  ;;  %v558_v3 = vmul.f32 0.5, %v556_v53 }
 0xb20   :  { %2378 = vtanh.f32 %v341_v55 }
 0xb25   :  { %v2377_v54 = vpop.eup %2376 }
 0xb26   :  { %565 = vrot.lane.b32.xlu2 %v2377_v54, %s2560_s11  ;;  %v2379_v61 = vpop.eup %2378 }
 0xb27   :  { %v343_v62 = vmul.f32 0.5, %v2379_v61 }
 0xb29   :  { %v2859_v1 = vadd.f32 0.5, %v343_v62 }
 0xb2b   :  { %v346_v46 = vmul.f32 0.0, %v2859_v1 }
 0xb34   :  { %v773_v56 = vpop.f32.mrf.mxu2 }
 0xb35   :  { %v774_v59 = vadd.f32 %v773_v56, %v2707_v15 }
 0xb37   :  { %2380 = vtanh.f32 %v774_v59  ;;  %v776_v26 = vmul.f32 0.5, %v774_v59 }
 0xb38   :  { %2382 = vtanh.f32 %v558_v3 }
 0xb3d   :  { %v2381_v17 = vpop.eup %2380  ;;  %v349_v0 = vpop.permute.xlu1 %348 }
 0xb3e   :  { %783 = vrot.lane.b32.xlu0 %v2381_v17, %s2560_s11  ;;  %v351_v2 = vmul.f32 %v349_v0, %v2859_v1  ;;  %v2383_v44 = vpop.eup %2382 }
 0xb3f   :  { %v560_v19 = vmul.f32 0.5, %v2383_v44 }
 0xb41   :  { %v2871_v20 = vadd.f32 0.5, %v560_v19 }
 0xb43   :  { %v563_v52 = vmul.f32 %v2871_v20, %v2777_v57 }
 0xb46   :  { %353 = vrot.lane.b32.xlu0 %v351_v2, %s2561_s12 }
 0xb71   :  { %v984_v8 = vpop.f32.mrf.mxu2 }
 0xb72   :  { %v985_v10 = vadd.f32 %v984_v8, %v2663_v38 }
 0xb74   :  { %2384 = vtanh.f32 %v985_v10  ;;  %v987_v37 = vmul.f32 0.5, %v985_v10 }
 0xb79   :  { %v1194_v14 = vpop.f32.mrf.mxu2 }
 0xb7a   :  { %v2385_v16 = vpop.eup %2384  ;;  %v1197_v18 = vadd.f32 %v1194_v14, %v2867_v13 }
 0xb7b   :  { %994 = vrot.lane.b32.xlu1 %v2385_v16, %s2560_s11 }
 0xb7c   :  { %2386 = vtanh.f32 %v1197_v18  ;;  %v1198_v34 = vmul.f32 0.5, %v1197_v18 }
 0xb7d   :  { %2388 = vtanh.f32 %v776_v26 }
 0xb7e   :  { %2390 = vtanh.f32 %v1198_v34 }
 0xb7f   :  { %2392 = vtanh.f32 %v987_v37 }
 0xb80   :  { %v566_v22 = vpop.permute.xlu2 %565 }
 0xb81   :  { %v568_v23 = vmul.f32 %v566_v22, %v2871_v20 }
 0xb82   :  { %v2387_v25 = vpop.eup %2386 }
 0xb83   :  { %1209 = vrot.lane.b32.xlu2 %v2387_v25, %s2560_s11  ;;  %570 = vrot.lane.b32.xlu1 %v568_v23, %s2561_s12  ;;  %v2389_v27 = vpop.eup %2388 }
 0xb84   :  { %v778_v28 = vmul.f32 0.5, %v2389_v27  ;;  %v2391_v35 = vpop.eup %2390 }
 0xb85   :  { %v1200_v36 = vmul.f32 0.5, %v2391_v35 }
 0xb86   :  { %v779_v29 = vadd.f32 0.5, %v778_v28 }
 0xb87   :  { %v1201_v39 = vadd.f32 0.5, %v1200_v36 }
 0xb88   :  { %v781_v59 = vmul.f32 %v779_v29, %v2783_v63 }
 0xb8b   :  { %1204 = vrot.lane.b32.xlu1 %v2822_v24, %s2563_s20  ;;  %v2393_v24 = vpop.eup %2392 }
 0xb8c   :  { %v989_v42 = vmul.f32 0.5, %v2393_v24 }
 0xb8e   :  { %v990_v47 = vadd.f32 0.5, %v989_v42 }
 0xb90   :  { %v992_v63 = vmul.f32 %v990_v47, %v2789_v12 }
 0xbb0   :  { %v784_v32 = vpop.permute.xlu0 %783 }
 0xbb1   :  { %v786_v33 = vmul.f32 %v784_v32, %v779_v29 }
 0xbb3   :  { %788 = vrot.lane.b32.xlu2 %v786_v33, %s2561_s12 }
 0xbb8   :  { %v354_v45 = vpop.permute.xlu0 %353 }
 0xbb9   :  { %v2881_v49 = vadd.f32 %v354_v45, %v346_v46 }
 0xbbb   :  { %2394 = vtanh.f32 %v2881_v49 }
 0xbc1   :  { %v2395_v55 = vpop.eup %2394 }
 0xbdd   :  { %v1210_v40 = vpop.permute.xlu2 %1209 }
 0xbde   :  { %v1212_v41 = vmul.f32 %v1210_v40, %v1201_v39 }
 0xbe0   :  { %1214 = vrot.lane.b32.xlu2 %v1212_v41, %s2561_s12 }
 0xbed   :  { %v995_v50 = vpop.permute.xlu1 %994 }
 0xbee   :  { %v997_v51 = vmul.f32 %v995_v50, %v990_v47 }
 0xbf0   :  { %999 = vrot.lane.b32.xlu0 %v997_v51, %s2561_s12 }
 0xbf5   :  { %v571_v53 = vpop.permute.xlu1 %570 }
 0xbf6   :  { %v2887_v54 = vadd.f32 %v571_v53, %v563_v52 }
 0xbf8   :  { %2396 = vtanh.f32 %v2887_v54  ;;  %359 = vrot.lane.b32.xlu0 %v2395_v55, %s2561_s12 }
 0xbfd   :  { %v1205_v57 = vpop.permute.xlu1 %1204 }
 0xbfe   :  { %v2397_v56 = vpop.eup %2396  ;;  %v1207_v0 = vmul.f32 %v1205_v57, %v1201_v39 }
 0xbff   :  { %576 = vrot.lane.b32.xlu1 %v2397_v56, %s2561_s12 }
 0xc0d   :  { %v789_v61 = vpop.permute.xlu2 %788 }
 0xc0e   :  { %v2893_v17 = vadd.f32 %v789_v61, %v781_v59 }
 0xc10   :  { %2398 = vtanh.f32 %v2893_v17 }
 0xc16   :  { %v2399_v62 = vpop.eup %2398 }
 0xc17   :  { %794 = vrot.lane.b32.xlu2 %v2399_v62, %s2561_s12 }
 0xc3a   :  { %v1215_v2 = vpop.permute.xlu2 %1214 }
 0xc3b   :  { %v2897_v3 = vadd.f32 %v1215_v2, %v1207_v0 }
 0xc3d   :  { %2400 = vtanh.f32 %v2897_v3 }
 0xc43   :  { %v2401_v7 = vpop.eup %2400 }
 0xc44   :  { %1220 = vrot.lane.b32.xlu1 %v2401_v7, %s2561_s12 }
 0xc62   :  { %v1000_v8 = vpop.permute.xlu0 %999 }
 0xc63   :  { %v2902_v10 = vadd.f32 %v1000_v8, %v992_v63 }
 0xc65   :  { %2402 = vtanh.f32 %v2902_v10 }
 0xc6a   :  { %v360_v44 = vpop.permute.xlu0 %359 }
 0xc6b   :  { %v2403_v11 = vpop.eup %2402  ;;  %v2908_v22 = vmul.f32 %v360_v44, %v2859_v1 }
 0xc6c   :  { %1005 = vrot.lane.b32.xlu0 %v2403_v11, %s2561_s12 }
 0xc71   :  { %v577_v14 = vpop.permute.xlu1 %576  ;;  %v795_v16 = vpop.permute.xlu2 %794 }
 0xc72   :  { %v579_v18 = vmul.f32 %v577_v14, %v2871_v20  ;;  %v797_v19 = vmul.f32 %v795_v16, %v779_v29 }
 0xc74   :  { %581 = vrot.lane.b32.xlu2 %v579_v18, %s2562_s17  ;;  %799 = vrot.lane.b32.xlu1 %v797_v19, %s2562_s17 }
 0xc75   :  { %584 = vrot.lane.b32.xlu0 %v2908_v22, %s2564_s21 }
 0xc7c   :  { %802 = vrot.lane.b32.xlu2 %v579_v18, %s2564_s21  ;;  %1013 = vrot.lane.b32.xlu1 %v797_v19, %s2564_s21 }
 0xcb6   :  { %v1221_v12 = vpop.permute.xlu1 %1220 }
 0xcb7   :  { %v1223_v23 = vmul.f32 %v1221_v12, %v1201_v39 }
 0xcb9   :  { %1225 = vrot.lane.b32.xlu2 %v1223_v23, %s2562_s17 }
 0xcce   :  { %v582_v1 = vpop.permute.xlu2 %581 }
 0xcd6   :  { %v803_v29 = vpop.permute.xlu2 %802 }
 0xcde   :  { %v1006_v20 = vpop.permute.xlu0 %1005 }
 0xcdf   :  { %v1008_v25 = vmul.f32 %v1006_v20, %v990_v47 }
 0xce1   :  { %1010 = vrot.lane.b32.xlu0 %v1008_v25, %s2562_s17 }
 0xce6   :  { %v800_v28 = vpop.permute.xlu1 %799 }
 0xce7   :  { %v585_v26 = vpop.permute.xlu0 %584  ;;  %v805_v32 = vsel %vm42_vm0, %v800_v28, %v803_v29 }
 0xce8   :  { %v587_v27 = vsel %vm42_vm0, %v582_v1, %v585_v26 }
 0xce9   :  { %2270 = vmatmul.msk.f32.vlgmr.msrb.gmra.mxu0 %vm167_vm2, %v587_v27  ;;  %1228 = vrot.lane.b32.xlu0 %v1008_v25, %s2564_s21 }
 0xcea   :  { %1034 = vmatpush.msrb.mxu0 %v2686_v4 }
 0xcec   :  { %1035 = vmatpush.msrb.mxu0 %v2692_v5 }
 0xcee   :  { %v1014_v33 = vpop.permute.xlu1 %1013 }
 0xcf1   :  { %2274 = vmatmul.msk.f32.vlgmr.msra.gmra.mxu0 %vm167_vm2, %v805_v32 }
 0xcf2   :  { %1249 = vmatpush.msra.mxu0 %v2646_v30 }
 0xcf4   :  { %1250 = vmatpush.msra.mxu0 %v2651_v31 }
 0xd13   :  { %v1226_v4 = vpop.permute.xlu2 %1225 }
 0xd53   :  { %v1011_v34 = vpop.permute.xlu0 %1010 }
 0xd54   :  { %v1016_v35 = vsel %vm42_vm0, %v1011_v34, %v1014_v33 }
 0xd55   :  { %2278 = vmatmul.msk.f32.vlgmr.msrb.gmra.mxu0 %vm167_vm2, %v1016_v35 }
 0xd56   :  { %1459 = vmatpush.msrb.mxu0 %v2619_v6 }
 0xd5b   :  { %v1229_v5 = vpop.permute.xlu0 %1228 }
 0xd5c   :  { %v1231_v36 = vsel %vm42_vm0, %v1226_v4, %v1229_v5 }
 0xd5d   :  { %2282 = vmatmul.msk.f32.vlgmr.msra.gmra.mxu0 %vm167_vm2, %v1231_v36 }
 0xd5e   :  { %1679 = vmatpush.msra.mxu0 %v2799_v48 }
 0xd60   :  { %1680 = vmatpush.msra.mxu0 %v2808_v21 }
 0xd65   :  { %2286 = vmatmul.msk.f32.vlgmr.msrb.gmra.mxu0 %vm42_vm0, %v1226_v4 }
 0xd66   :  { %v608_v30 = vpop.f32.mrf.mxu0  ;;  %1897 = vmatpush.msrb.mxu0 %v2734_v58 }
 0xd67   :  { %v609_v31 = vadd.f32 %v608_v30, %v2844_v43 }
 0xd68   :  { %1898 = vmatpush.msrb.mxu0 %v2740_v60 }
 0xd69   :  { %2404 = vtanh.f32 %v609_v31  ;;  %v611_v46 = vmul.f32 0.5, %v609_v31 }
 0xd6e   :  { %v826_v6 = vpop.f32.mrf.mxu0 }
 0xd6f   :  { %v2405_v37 = vpop.eup %2404  ;;  %v827_v39 = vadd.f32 %v826_v6, %v2756_v9 }
 0xd70   :  { %618 = vrot.lane.b32.xlu2 %v2405_v37, %s2560_s11 }
 0xd71   :  { %2406 = vtanh.f32 %v827_v39  ;;  %v829_v24 = vmul.f32 0.5, %v827_v39 }
 0xd73   :  { %2408 = vtanh.f32 %v829_v24 }
 0xd77   :  { %v2407_v40 = vpop.eup %2406 }
 0xd78   :  { %836 = vrot.lane.b32.xlu0 %v2407_v40, %s2560_s11 }
 0xd79   :  { %v2409_v50 = vpop.eup %2408 }
 0xd7a   :  { %v831_v53 = vmul.f32 0.5, %v2409_v50 }
 0xd7c   :  { %v832_v56 = vadd.f32 0.5, %v831_v53 }
 0xd7e   :  { %v834_v18 = vmul.f32 %v832_v56, %v2887_v54 }
 0xdca   :  { %v619_v0 = vpop.permute.xlu2 %618 }
 0xdd2   :  { %v1037_v41 = vpop.f32.mrf.mxu0 }
 0xdd3   :  { %v1038_v47 = vadd.f32 %v1037_v41, %v2707_v15 }
 0xdda   :  { %v1252_v42 = vpop.f32.mrf.mxu0 }
 0xddb   :  { %v1253_v45 = vadd.f32 %v1252_v42, %v2663_v38 }
 0xddd   :  { %2410 = vtanh.f32 %v1253_v45  ;;  %v1255_v63 = vmul.f32 0.5, %v1253_v45 }
 0xdde   :  { %2412 = vtanh.f32 %v611_v46 }
 0xddf   :  { %2414 = vtanh.f32 %v1038_v47 }
 0xde0   :  { %2416 = vtanh.f32 %v1255_v63  ;;  %v3000_v63 = vld [vmem:[%s3309_s3 + $0x18] sm:$0xff] }
 0xde2   :  { %v1461_v51 = vpop.f32.mrf.mxu0 }
 0xde3   :  { %v2411_v52 = vpop.eup %2410  ;;  %1465 = vrot.lane.b32.xlu1 %v1461_v51, %s2563_s20 }
 0xde4   :  { %1262 = vrot.lane.b32.xlu2 %v2411_v52, %s2560_s11  ;;  %v2413_v55 = vpop.eup %2412 }
 0xde5   :  { %v2415_v59 = vpop.eup %2414  ;;  %v613_v62 = vmul.f32 0.5, %v2413_v55 }
 0xde6   :  { %v2417_v8 = vpop.eup %2416 }
 0xde7   :  { %v614_v2 = vadd.f32 0.5, %v613_v62  ;;  %v1257_v11 = vmul.f32 0.5, %v2417_v8 }
 0xde9   :  { %v621_v7 = vmul.f32 %v619_v0, %v614_v2  ;;  %v1258_v44 = vadd.f32 0.5, %v1257_v11  ;;  %v616_v29 = vmul.f32 %v614_v2, %v2881_v49 }
 0xdea   :  { %v837_v61 = vpop.permute.xlu0 %836 }
 0xdeb   :  { %v839_v57 = vmul.f32 %v837_v61, %v832_v56  ;;  %1047 = vrot.lane.b32.xlu1 %v2415_v59, %s2560_s11  ;;  %v1260_v4 = vmul.f32 %v1258_v44, %v2902_v10 }
 0xded   :  { %841 = vrot.lane.b32.xlu2 %v839_v57, %s2561_s12 }
 0xdf3   :  { %623 = vrot.lane.b32.xlu1 %v621_v7, %s2561_s12  ;;  %v2994_v7 = vld [vmem:[%s3309_s3 + $0x20] sm:$0xff] }
 0xdf5   :  { %1475 = vrot.lane.b32.xlu2 %v2897_v3, %s2563_s20  ;;  %v1040_v3 = vmul.f32 0.5, %v1038_v47 }
 0xe3e   :  { %v1263_v14 = vpop.permute.xlu2 %1262 }
 0xe3f   :  { %v1265_v16 = vmul.f32 %v1263_v14, %v1258_v44 }
 0xe41   :  { %1267 = vrot.lane.b32.xlu1 %v1265_v16, %s2561_s12 }
 0xe47   :  { %v842_v19 = vpop.permute.xlu2 %841 }
 0xe48   :  { %v2952_v12 = vadd.f32 %v842_v19, %v834_v18  ;;  %v3009_v18 = vld [vmem:[%s3309_s3 + $0x10] sm:$0xff]  ;;  %v3015_v19 = vld [vmem:[%s3309_s3 + $0x8] sm:$0xff] }
 0xe4a   :  { %2418 = vtanh.f32 %v2952_v12 }
 0xe4b   :  { %2420 = vtanh.f32 %v1040_v3 }
 0xe4f   :  { %v1476_v30 = vpop.permute.xlu2 %1475 }
 0xe50   :  { %v2419_v23 = vpop.eup %2418 }
 0xe51   :  { %847 = vrot.lane.b32.xlu2 %v2419_v23, %s2561_s12  ;;  %v2421_v1 = vpop.eup %2420 }
 0xe52   :  { %v1042_v28 = vmul.f32 0.5, %v2421_v1 }
 0xe54   :  { %v1043_v54 = vadd.f32 0.5, %v1042_v28 }
 0xe55   :  { %v1466_v20 = vpop.permute.xlu1 %1465 }
 0xe56   :  { %v1468_v25 = vadd.f32 %v1466_v20, %v2867_v13  ;;  %v1045_v42 = vmul.f32 %v1043_v54, %v2893_v17 }
 0xe58   :  { %2422 = vtanh.f32 %v1468_v25  ;;  %v1469_v31 = vmul.f32 0.5, %v1468_v25  ;;  %v3023_v25 = vld [vmem:[%s3309_s3] sm:$0xff]  ;;  %s2570_s3 = smov 24  }
 0xe5d   :  { %v1048_v26 = vpop.permute.xlu1 %1047 }
 0xe5e   :  { %v2423_v27 = vpop.eup %2422  ;;  %v1050_v32 = vmul.f32 %v1048_v26, %v1043_v54 }
 0xe5f   :  { %1480 = vrot.lane.b32.xlu0 %v2423_v27, %s2560_s11 }
 0xe65   :  { %v624_v33 = vpop.permute.xlu1 %623 }
 0xe66   :  { %v2959_v34 = vadd.f32 %v624_v33, %v616_v29 }
 0xe67   :  { %1052 = vrot.lane.b32.xlu0 %v1050_v32, %s2561_s12 }
 0xe68   :  { %2424 = vtanh.f32 %v2959_v34 }
 0xe6e   :  { %v2425_v35 = vpop.eup %2424 }
 0xe6f   :  { %629 = vrot.lane.b32.xlu1 %v2425_v35, %s2561_s12 }
 0xeab   :  { %v848_v6 = vpop.permute.xlu2 %847 }
 0xeac   :  { %v850_v37 = vmul.f32 %v848_v6, %v832_v56 }
 0xeb3   :  { %v1268_v5 = vpop.permute.xlu1 %1267 }
 0xeb4   :  { %v2965_v36 = vadd.f32 %v1268_v5, %v1260_v4 }
 0xeb6   :  { %2426 = vtanh.f32 %v2965_v36 }
 0xeb7   :  { %2428 = vtanh.f32 %v1469_v31 }
 0xebc   :  { %v2427_v49 = vpop.eup %2426 }
 0xebd   :  { %1273 = vrot.lane.b32.xlu1 %v2427_v49, %s2561_s12  ;;  %v2429_v39 = vpop.eup %2428 }
 0xebe   :  { %v1471_v40 = vmul.f32 0.5, %v2429_v39 }
 0xec0   :  { %v1472_v41 = vadd.f32 0.5, %v1471_v40 }
 0xec2   :  { %v1478_v17 = vmul.f32 %v1476_v30, %v1472_v41 }
 0xec5   :  { %852 = vrot.lane.b32.xlu1 %v850_v37, %s2562_s17 }
 0xed1   :  { %v1481_v24 = vpop.permute.xlu0 %1480 }
 0xed2   :  { %v1483_v10 = vmul.f32 %v1481_v24, %v1472_v41 }
 0xed4   :  { %1485 = vrot.lane.b32.xlu0 %v1483_v10, %s2561_s12 }
 0xed9   :  { %v1053_v45 = vpop.permute.xlu0 %1052 }
 0xeda   :  { %v2972_v46 = vadd.f32 %v1053_v45, %v1045_v42 }
 0xedc   :  { %2430 = vtanh.f32 %v2972_v46 }
 0xee1   :  { %v630_v50 = vpop.permute.xlu1 %629 }
 0xee2   :  { %v2431_v47 = vpop.eup %2430  ;;  %v632_v51 = vmul.f32 %v630_v50, %v614_v2 }
 0xee3   :  { %1058 = vrot.lane.b32.xlu0 %v2431_v47, %s2561_s12 }
 0xeeb   :  { %634 = vrot.lane.b32.xlu0 %v632_v51, %s2564_s21 }
 0xef3   :  { %1066 = vrot.lane.b32.xlu0 %v850_v37, %s2564_s21 }
 0xf2f   :  { %v1274_v52 = vpop.permute.xlu1 %1273 }
 0xf30   :  { %v1276_v53 = vmul.f32 %v1274_v52, %v1258_v44 }
 0xf32   :  { %1278 = vrot.lane.b32.xlu1 %v1276_v53, %s2562_s17 }
 0xf37   :  { %v853_v57 = vpop.permute.xlu1 %852 }
 0xf3a   :  { %1499 = vrot.lane.b32.xlu1 %v1276_v53, %s2564_s21 }
 0xf46   :  { %v1486_v55 = vpop.permute.xlu0 %1485 }
 0xf47   :  { %v2980_v56 = vadd.f32 %v1486_v55, %v1478_v17 }
 0xf49   :  { %2432 = vtanh.f32 %v2980_v56 }
 0xf4f   :  { %v2433_v59 = vpop.eup %2432 }
 0xf50   :  { %1491 = vrot.lane.b32.xlu2 %v2433_v59, %s2561_s12 }
 0xf55   :  { %v1059_v61 = vpop.permute.xlu0 %1058 }
 0xf56   :  { %v1061_v62 = vmul.f32 %v1059_v61, %v1043_v54 }
 0xf58   :  { %1063 = vrot.lane.b32.xlu2 %v1061_v62, %s2562_s17 }
 0xf5d   :  { %v2985_v0 = vpop.permute.xlu0 %634 }
 0xf5e   :  { %v855_v2 = vsel %vm42_vm0, %v853_v57, %v2985_v0 }
 0xf5f   :  { %2275 = vmatmul.msk.f32.vlgmr.msra.gmra.mxu3 %vm167_vm2, %v855_v2 }
 0xf60   :  { %1281 = vrot.lane.b32.xlu2 %v1061_v62, %s2564_s21  ;;  %1302 = vmatpush.msra.mxu3 %v2994_v7 }
 0xf62   :  { %1303 = vmatpush.msra.mxu3 %v3000_v63 }
 0xf65   :  { %v1067_v44 = vpop.permute.xlu0 %1066 }
 0xfa4   :  { %v1279_v23 = vpop.permute.xlu1 %1278 }
 0xfaa   :  { %v1492_v8 = vpop.permute.xlu2 %1491 }
 0xfab   :  { %v1494_v11 = vmul.f32 %v1492_v8, %v1472_v41 }
 0xfac   :  { %v1500_v28 = vpop.permute.xlu1 %1499 }
 0xfad   :  { %1496 = vrot.lane.b32.xlu0 %v1494_v11, %s2565_s1 }
 0xfb2   :  { %v1064_v14 = vpop.permute.xlu2 %1063 }
 0xfb3   :  { %v1069_v16 = vsel %vm42_vm0, %v1064_v14, %v1067_v44 }
 0xfb4   :  { %2279 = vmatmul.msk.f32.vlgmr.msrb.gmra.mxu3 %vm167_vm2, %v1069_v16 }
 0xfb5   :  { %1520 = vmatpush.msrb.mxu3 %v3009_v18 }
 0xfb7   :  { %1521 = vmatpush.msrb.mxu3 %v3015_v19 }
 0xfba   :  { %v1282_v3 = vpop.permute.xlu2 %1281 }
 0xfbb   :  { %v1284_v20 = vsel %vm42_vm0, %v1279_v23, %v1282_v3 }
 0xfbc   :  { %2283 = vmatmul.msk.f32.vlgmr.msra.gmra.mxu3 %vm167_vm2, %v1284_v20 }
 0xfbd   :  { %1730 = vmatpush.msra.mxu3 %v3023_v25 }
 0xfe2   :  { %v876_v1 = vpop.f32.mrf.mxu3 }
 0xfe3   :  { %v877_v26 = vadd.f32 %v876_v1, %v2844_v43 }
 0xfe5   :  { %2434 = vtanh.f32 %v877_v26  ;;  %v879_v31 = vmul.f32 0.5, %v877_v26 }
 0xfeb   :  { %v2435_v27 = vpop.eup %2434 }
 0xfec   :  { %886 = vrot.lane.b32.xlu0 %v2435_v27, %s2560_s11 }
0x101f   :  { %v1497_v54 = vpop.permute.xlu0 %1496 }
0x1020   :  { %v1502_v29 = vsel %vm42_vm0, %v1497_v54, %v1500_v28 }
0x1021   :  { %2287 = vmatmul.msk.f32.vlgmr.msrb.gmra.mxu3 %vm167_vm2, %v1502_v29 }
0x1022   :  { %1950 = vmatpush.msrb.mxu3 %v2799_v48 }
0x1024   :  { %1951 = vmatpush.msrb.mxu3 %v2808_v21 }
0x1029   :  { %2291 = vmatmul.msk.f32.vlgmr.msra.gmra.mxu3 %vm42_vm0, %v1497_v54 }
0x102a   :  { %2168 = vmatpush.msra.mxu3 %v2734_v58 }
0x102c   :  { %2169 = vmatpush.msra.mxu3 %v2740_v60 }
0x1037   :  { %v1090_v32 = vpop.f32.mrf.mxu3 }
0x1038   :  { %v1091_v33 = vadd.f32 %v1090_v32, %v2756_v9 }
0x103a   :  { %2436 = vtanh.f32 %v1091_v33  ;;  %v1093_v5 = vmul.f32 0.5, %v1091_v33 }
0x103c   :  { %2438 = vtanh.f32 %v1093_v5 }
0x103f   :  { %v1305_v4 = vpop.f32.mrf.mxu3 }
0x1040   :  { %v2437_v35 = vpop.eup %2436  ;;  %v1306_v6 = vadd.f32 %v1305_v4, %v2707_v15 }
0x1041   :  { %1100 = vrot.lane.b32.xlu1 %v2437_v35, %s2560_s11 }
0x1042   :  { %v2439_v58 = vpop.eup %2438  ;;  %v1308_v52 = vmul.f32 0.5, %v1306_v6 }
0x1043   :  { %v1095_v39 = vmul.f32 0.5, %v2439_v58 }
0x1045   :  { %v3041_v41 = vadd.f32 0.5, %v1095_v39 }
0x1047   :  { %v1098_v1 = vmul.f32 %v3041_v41, %v2952_v12 }
0x105e   :  { %v887_v47 = vpop.permute.xlu0 %886 }
0x10a4   :  { %v1523_v30 = vpop.f32.mrf.mxu3 }
0x10a5   :  { %v1524_v49 = vadd.f32 %v1523_v30, %v2663_v38 }
0x10a7   :  { %2440 = vtanh.f32 %v1524_v49  ;;  %v1526_v59 = vmul.f32 0.5, %v1524_v49 }
0x10a8   :  { %2442 = vtanh.f32 %v879_v31 }
0x10a9   :  { %2444 = vtanh.f32 %v1306_v6 }
0x10aa   :  { %2446 = vtanh.f32 %v1308_v52 }
0x10ac   :  { %v1732_v60 = vpop.f32.mrf.mxu3 }
0x10ad   :  { %v2441_v37 = vpop.eup %2440  ;;  %1736 = vrot.lane.b32.xlu2 %v1732_v60, %s2566_s27 }
0x10ae   :  { %1533 = vrot.lane.b32.xlu0 %v2441_v37, %s2560_s11  ;;  %v2443_v40 = vpop.eup %2442 }
0x10af   :  { %v2445_v10 = vpop.eup %2444  ;;  %v881_v45 = vmul.f32 0.5, %v2443_v40 }
0x10b0   :  { %v2447_v55 = vpop.eup %2446 }
0x10b1   :  { %v882_v50 = vadd.f32 0.5, %v881_v45  ;;  %v1310_v62 = vmul.f32 0.5, %v2447_v55 }
0x10b3   :  { %v1101_v24 = vpop.permute.xlu1 %1100  ;;  %v889_v51 = vmul.f32 %v887_v47, %v882_v50  ;;  %v1311_v2 = vadd.f32 0.5, %v1310_v62  ;;  %v884_v14 = vmul.f32 %v882_v50, %v2959_v34 }
0x10b4   :  { %v1103_v42 = vmul.f32 %v1101_v24, %v3041_v41 }
0x10b5   :  { %1315 = vrot.lane.b32.xlu2 %v2445_v10, %s2560_s11  ;;  %v1313_v6 = vmul.f32 %v1311_v2, %v2972_v46 }
0x10b6   :  { %1105 = vrot.lane.b32.xlu0 %v1103_v42, %s2561_s12 }
0x10bd   :  { %891 = vrot.lane.b32.xlu2 %v889_v51, %s2561_s12 }
0x10be   :  { %1746 = vrot.lane.b32.xlu0 %v2980_v56, %s2563_s20 }
0x1107   :  { %v1737_v53 = vpop.permute.xlu2 %1736 }
0x1108   :  { %v1739_v17 = vadd.f32 %v1737_v53, %v2867_v13 }
0x110a   :  { %2448 = vtanh.f32 %v1739_v17  ;;  %v1740_v54 = vmul.f32 0.5, %v1739_v17 }
0x110b   :  { %2450 = vtanh.f32 %v1526_v59 }
0x110f   :  { %v1316_v57 = vpop.permute.xlu2 %1315 }
0x1110   :  { %v2449_v61 = vpop.eup %2448  ;;  %v1318_v8 = vmul.f32 %v1316_v57, %v1311_v2 }
0x1111   :  { %1751 = vrot.lane.b32.xlu1 %v2449_v61, %s2560_s11  ;;  %v2451_v11 = vpop.eup %2450 }
0x1112   :  { %v1528_v56 = vmul.f32 0.5, %v2451_v11 }
0x1114   :  { %v1529_v16 = vadd.f32 0.5, %v1528_v56 }
0x1116   :  { %v1531_v32 = vmul.f32 %v1529_v16, %v2965_v36 }
0x1117   :  { %v892_v44 = vpop.permute.xlu2 %891 }
0x1118   :  { %v3053_v23 = vadd.f32 %v892_v44, %v884_v14 }
0x1119   :  { %1320 = vrot.lane.b32.xlu1 %v1318_v8, %s2561_s12 }
0x111a   :  { %2452 = vtanh.f32 %v3053_v23 }
0x1120   :  { %v1534_v3 = vpop.permute.xlu0 %1533  ;;  %v2453_v28 = vpop.eup %2452 }
0x1121   :  { %v1536_v20 = vmul.f32 %v1534_v3, %v1529_v16 }
0x1123   :  { %1538 = vrot.lane.b32.xlu2 %v1536_v20, %s2561_s12 }
0x1128   :  { %v1106_v26 = vpop.permute.xlu0 %1105 }
0x1129   :  { %v3059_v27 = vadd.f32 %v1106_v26, %v1098_v1 }
0x112b   :  { %2454 = vtanh.f32 %v3059_v27  ;;  %897 = vrot.lane.b32.xlu2 %v2453_v28, %s2561_s12 }
0x112c   :  { %2456 = vtanh.f32 %v1740_v54 }
0x1130   :  { %v1747_v39 = vpop.permute.xlu0 %1746 }
0x1131   :  { %v2455_v34 = vpop.eup %2454 }
0x1132   :  { %1111 = vrot.lane.b32.xlu0 %v2455_v34, %s2561_s12  ;;  %v2457_v29 = vpop.eup %2456 }
0x1133   :  { %v1742_v35 = vmul.f32 0.5, %v2457_v29 }
0x1135   :  { %v1743_v12 = vadd.f32 0.5, %v1742_v35 }
0x1137   :  { %v1749_v42 = vmul.f32 %v1747_v39, %v1743_v12 }
0x117d   :  { %v1539_v33 = vpop.permute.xlu2 %1538 }
0x117e   :  { %v3065_v4 = vadd.f32 %v1539_v33, %v1531_v32 }
0x1180   :  { %2458 = vtanh.f32 %v3065_v4 }
0x1183   :  { %v1752_v5 = vpop.permute.xlu1 %1751 }
0x1184   :  { %v1754_v30 = vmul.f32 %v1752_v5, %v1743_v12 }
0x1185   :  { %v898_v31 = vpop.permute.xlu2 %897 }
0x1186   :  { %v2459_v49 = vpop.eup %2458  ;;  %1756 = vrot.lane.b32.xlu1 %v1754_v30, %s2561_s12  ;;  %v3073_v36 = vmul.f32 %v898_v31, %v882_v50 }
0x1187   :  { %1544 = vrot.lane.b32.xlu2 %v2459_v49, %s2561_s12 }
0x118b   :  { %v1321_v58 = vpop.permute.xlu1 %1320 }
0x118c   :  { %v3071_v60 = vadd.f32 %v1321_v58, %v1313_v6 }
0x118e   :  { %2460 = vtanh.f32 %v3071_v60 }
0x118f   :  { %1120 = vrot.lane.b32.xlu2 %v3073_v36, %s2564_s21 }
0x1194   :  { %v2461_v37 = vpop.eup %2460 }
0x1195   :  { %1326 = vrot.lane.b32.xlu1 %v2461_v37, %s2561_s12 }
0x11a4   :  { %v1112_v40 = vpop.permute.xlu0 %1111 }
0x11a5   :  { %v1114_v24 = vmul.f32 %v1112_v40, %v3041_v41 }
0x11a7   :  { %1116 = vrot.lane.b32.xlu1 %v1114_v24, %s2562_s17 }
0x11af   :  { %1334 = vrot.lane.b32.xlu1 %v1114_v24, %s2564_s21 }
0x11e1   :  { %v1545_v46 = vpop.permute.xlu2 %1544 }
0x11e2   :  { %v1547_v10 = vmul.f32 %v1545_v46, %v1529_v16 }
0x11e4   :  { %1549 = vrot.lane.b32.xlu2 %v1547_v10, %s2562_s17 }
0x11e9   :  { %v1121_v52 = vpop.permute.xlu2 %1120 }
0x11ec   :  { %1770 = vrot.lane.b32.xlu2 %v1547_v10, %s2564_s21 }
0x11f8   :  { %v1757_v45 = vpop.permute.xlu1 %1756 }
0x11f9   :  { %v3084_v47 = vadd.f32 %v1757_v45, %v1749_v42 }
0x11fb   :  { %2462 = vtanh.f32 %v3084_v47 }
0x1201   :  { %v2463_v50 = vpop.eup %2462 }
0x1202   :  { %1762 = vrot.lane.b32.xlu0 %v2463_v50, %s2561_s12 }
0x1207   :  { %v1327_v41 = vpop.permute.xlu1 %1326 }
0x1208   :  { %v1329_v51 = vmul.f32 %v1327_v41, %v1311_v2 }
0x120a   :  { %1331 = vrot.lane.b32.xlu0 %v1329_v51, %s2562_s17 }
0x1212   :  { %1552 = vrot.lane.b32.xlu0 %v1329_v51, %s2564_s21 }
0x1219   :  { %v1117_v53 = vpop.permute.xlu1 %1116 }
0x121a   :  { %v1123_v17 = vsel %vm42_vm0, %v1117_v53, %v1121_v52 }
0x121b   :  { %2280 = vmatmul.msk.f32.vlgmr.msrb.gmra.mxu1 %vm167_vm2, %v1123_v17 }
0x121c   :  { %1573 = vmatpush.msrb.mxu1 %v2994_v7 }
0x121e   :  { %1574 = vmatpush.msrb.mxu1 %v3000_v63 }
0x1221   :  { %v1335_v61 = vpop.permute.xlu1 %1334 }
0x123e   :  { %v1550_v2 = vpop.permute.xlu2 %1549 }
0x1246   :  { %v1771_v16 = vpop.permute.xlu2 %1770 }
0x1274   :  { %v1763_v55 = vpop.permute.xlu0 %1762 }
0x1275   :  { %v1765_v59 = vmul.f32 %v1763_v55, %v1743_v12 }
0x1277   :  { %1767 = vrot.lane.b32.xlu1 %v1765_v59, %s2567_s8 }
0x127c   :  { %v1332_v62 = vpop.permute.xlu0 %1331 }
0x127d   :  { %v1337_v57 = vsel %vm42_vm0, %v1332_v62, %v1335_v61 }
0x127e   :  { %2284 = vmatmul.msk.f32.vlgmr.msra.gmra.mxu1 %vm167_vm2, %v1337_v57 }
0x127f   :  { %1791 = vmatpush.msra.mxu1 %v3009_v18 }
0x1281   :  { %1792 = vmatpush.msra.mxu1 %v3015_v19 }
0x1284   :  { %v1553_v8 = vpop.permute.xlu0 %1552 }
0x1285   :  { %v1555_v11 = vsel %vm42_vm0, %v1550_v2, %v1553_v8 }
0x1286   :  { %2288 = vmatmul.msk.f32.vlgmr.msrb.gmra.mxu1 %vm167_vm2, %v1555_v11 }
0x1287   :  { %2001 = vmatpush.msrb.mxu1 %v3023_v25 }
0x1298   :  { %v1144_v56 = vpop.f32.mrf.mxu1 }
0x1299   :  { %v1145_v44 = vadd.f32 %v1144_v56, %v2844_v43 }
0x129b   :  { %2464 = vtanh.f32 %v1145_v44  ;;  %v1147_v32 = vmul.f32 0.5, %v1145_v44 }
0x12a1   :  { %v2465_v14 = vpop.eup %2464 }
0x12a2   :  { %1154 = vrot.lane.b32.xlu1 %v2465_v14, %s2560_s11 }
0x12e9   :  { %v1768_v3 = vpop.permute.xlu1 %1767 }
0x12ea   :  { %v1773_v20 = vsel %vm42_vm0, %v1768_v3, %v1771_v16 }
0x12eb   :  { %2292 = vmatmul.msk.f32.vlgmr.msra.gmra.mxu1 %vm167_vm2, %v1773_v20 }
0x12ec   :  { %2221 = vmatpush.msra.mxu1 %v2799_v48 }
0x12ee   :  { %2222 = vmatpush.msra.mxu1 %v2808_v21 }
0x12f3   :  { %2296 = vmatmul.msk.f32.vlgmr.msrb.gmra.mxu1 %vm42_vm0, %v1768_v3 }
0x12fb   :  { %v1358_v25 = vpop.f32.mrf.mxu1 }
0x12fc   :  { %v1359_v1 = vadd.f32 %v1358_v25, %v2756_v9 }
0x12fe   :  { %2466 = vtanh.f32 %v1359_v1  ;;  %v1361_v34 = vmul.f32 0.5, %v1359_v1 }
0x1300   :  { %2468 = vtanh.f32 %v1361_v34 }
0x1303   :  { %v1576_v28 = vpop.f32.mrf.mxu1 }
0x1304   :  { %v2467_v26 = vpop.eup %2466  ;;  %v1577_v48 = vadd.f32 %v1576_v28, %v2707_v15 }
0x1305   :  { %1368 = vrot.lane.b32.xlu2 %v2467_v26, %s2560_s11 }
0x1306   :  { %v2469_v21 = vpop.eup %2468  ;;  %v1579_v42 = vmul.f32 0.5, %v1577_v48 }
0x1307   :  { %v1363_v12 = vmul.f32 0.5, %v2469_v21 }
0x1309   :  { %v3115_v49 = vadd.f32 0.5, %v1363_v12 }
0x1314   :  { %v1155_v37 = vpop.permute.xlu1 %1154 }
0x135f   :  { %v1369_v5 = vpop.permute.xlu2 %1368 }
0x1360   :  { %v1371_v6 = vmul.f32 %v1369_v5, %v3115_v49 }
0x1368   :  { %v1794_v54 = vpop.f32.mrf.mxu1 }
0x1369   :  { %v1795_v29 = vadd.f32 %v1794_v54, %v2663_v38 }
0x136b   :  { %2470 = vtanh.f32 %v1795_v29  ;;  %v1797_v24 = vmul.f32 0.5, %v1795_v29 }
0x136c   :  { %2472 = vtanh.f32 %v1147_v32 }
0x136d   :  { %2474 = vtanh.f32 %v1577_v48 }
0x136e   :  { %2476 = vtanh.f32 %v1797_v24 }
0x136f   :  { %2478 = vtanh.f32 %v1579_v42 }
0x1370   :  { %v2003_v33 = vpop.f32.mrf.mxu1 }
0x1371   :  { %v2471_v35 = vpop.eup %2470  ;;  %2007 = vrot.lane.b32.xlu0 %v2003_v33, %s2568_s9 }
0x1372   :  { %1804 = vrot.lane.b32.xlu1 %v2471_v35, %s2560_s11  ;;  %v2473_v30 = vpop.eup %2472 }
0x1373   :  { %v2475_v31 = vpop.eup %2474  ;;  %v1149_v58 = vmul.f32 0.5, %v2473_v30 }
0x1374   :  { %v2477_v46 = vpop.eup %2476 }
0x1375   :  { %v1150_v39 = vadd.f32 0.5, %v1149_v58  ;;  %v1799_v10 = vmul.f32 0.5, %v2477_v46  ;;  %v2479_v53 = vpop.eup %2478 }
0x1376   :  { %v1581_v61 = vmul.f32 0.5, %v2479_v53 }
0x1377   :  { %v1157_v40 = vmul.f32 %v1155_v37, %v1150_v39  ;;  %v3123_v50 = vadd.f32 0.5, %v1799_v10  ;;  %v1152_v57 = vmul.f32 %v1150_v39, %v3053_v23 }
0x1379   :  { %1586 = vrot.lane.b32.xlu0 %v2475_v31, %s2560_s11  ;;  %v1802_v34 = vmul.f32 %v3123_v50, %v3065_v4 }
0x137a   :  { %1373 = vrot.lane.b32.xlu1 %v1371_v6, %s2561_s12 }
0x1381   :  { %1159 = vrot.lane.b32.xlu0 %v1157_v40, %s2561_s12 }
0x1382   :  { %2017 = vrot.lane.b32.xlu1 %v3084_v47, %s2563_s20  ;;  %v1366_v47 = vmul.f32 %v3115_v49, %v3059_v27 }
0x13e3   :  { %v2008_v45 = vpop.permute.xlu0 %2007 }
0x13e4   :  { %v2010_v41 = vadd.f32 %v2008_v45, %v2867_v13  ;;  %v1805_v51 = vpop.permute.xlu1 %1804  ;;  %v1582_v13 = vadd.f32 0.5, %v1581_v61 }
0x13e5   :  { %v1807_v52 = vmul.f32 %v1805_v51, %v3123_v50 }
0x13e6   :  { %2480 = vtanh.f32 %v2010_v41  ;;  %v2011_v44 = vmul.f32 0.5, %v2010_v41  ;;  %v1584_v25 = vmul.f32 %v1582_v13, %v3071_v60 }
0x13e7   :  { %1809 = vrot.lane.b32.xlu0 %v1807_v52, %s2561_s12 }
0x13eb   :  { %v1587_v17 = vpop.permute.xlu0 %1586 }
0x13ec   :  { %v2481_v55 = vpop.eup %2480  ;;  %v1374_v59 = vpop.permute.xlu1 %1373  ;;  %v1589_v2 = vmul.f32 %v1587_v17, %v1582_v13 }
0x13ed   :  { %v3130_v62 = vadd.f32 %v1374_v59, %v1366_v47  ;;  %2022 = vrot.lane.b32.xlu2 %v2481_v55, %s2560_s11 }
0x13ef   :  { %2482 = vtanh.f32 %v3130_v62 }
0x13f3   :  { %v1160_v8 = vpop.permute.xlu0 %1159 }
0x13f4   :  { %v3135_v11 = vadd.f32 %v1160_v8, %v1152_v57  ;;  %v2018_v32 = vpop.permute.xlu1 %2017 }
0x13f5   :  { %v2483_v56 = vpop.eup %2482  ;;  %1591 = vrot.lane.b32.xlu2 %v1589_v2, %s2561_s12 }
0x13f6   :  { %2484 = vtanh.f32 %v3135_v11  ;;  %1379 = vrot.lane.b32.xlu1 %v2483_v56, %s2561_s12 }
0x13f7   :  { %2486 = vtanh.f32 %v2011_v44 }
0x13fc   :  { %v2485_v27 = vpop.eup %2484 }
0x13fd   :  { %1165 = vrot.lane.b32.xlu0 %v2485_v27, %s2561_s12  ;;  %v2487_v14 = vpop.eup %2486 }
0x13fe   :  { %v2013_v16 = vmul.f32 0.5, %v2487_v14 }
0x1400   :  { %v2014_v3 = vadd.f32 0.5, %v2013_v16 }
0x1402   :  { %v2020_v4 = vmul.f32 %v2018_v32, %v2014_v3 }
0x1447   :  { %v2023_v23 = vpop.permute.xlu2 %2022 }
0x1448   :  { %v2025_v20 = vmul.f32 %v2023_v23, %v2014_v3 }
0x144a   :  { %2027 = vrot.lane.b32.xlu2 %v2025_v20, %s2561_s12 }
0x144f   :  { %v1592_v1 = vpop.permute.xlu2 %1591 }
0x1450   :  { %v3143_v26 = vadd.f32 %v1592_v1, %v1584_v25 }
0x1452   :  { %2488 = vtanh.f32 %v3143_v26 }
0x1458   :  { %v2489_v28 = vpop.eup %2488 }
0x1459   :  { %v1810_v54 = vpop.permute.xlu0 %1809  ;;  %1597 = vrot.lane.b32.xlu2 %v2489_v28, %s2561_s12 }
0x145a   :  { %v3149_v29 = vadd.f32 %v1810_v54, %v1802_v34 }
0x145c   :  { %2490 = vtanh.f32 %v3149_v29 }
0x1462   :  { %v2491_v48 = vpop.eup %2490 }
0x1463   :  { %1815 = vrot.lane.b32.xlu0 %v2491_v48, %s2561_s12 }
0x1468   :  { %v1380_v60 = vpop.permute.xlu1 %1379 }
0x1469   :  { %v1382_v21 = vmul.f32 %v1380_v60, %v3115_v49 }
0x146b   :  { %1384 = vrot.lane.b32.xlu2 %v1382_v21, %s2562_s17 }
0x146f   :  { %v1166_v33 = vpop.permute.xlu0 %1165 }
0x1470   :  { %v3155_v35 = vmul.f32 %v1166_v33, %v1150_v39 }
0x1472   :  { %1387 = vrot.lane.b32.xlu0 %v3155_v35, %s2564_s21 }
0x1473   :  { %1605 = vrot.lane.b32.xlu2 %v1382_v21, %s2564_s21 }
0x14a4   :  { %v2028_v12 = vpop.permute.xlu2 %2027 }
0x14a5   :  { %v2030_v5 = vadd.f32 %v2028_v12, %v2020_v4 }
0x14a7   :  { %2492 = vtanh.f32 %v2030_v5 }
0x14ad   :  { %v2493_v30 = vpop.eup %2492 }
0x14ae   :  { %2033 = vrot.lane.b32.xlu1 %v2493_v30, %s2561_s12 }
0x14b3   :  { %v1598_v31 = vpop.permute.xlu2 %1597 }
0x14b4   :  { %v1600_v6 = vmul.f32 %v1598_v31, %v1582_v13 }
0x14b6   :  { %1602 = vrot.lane.b32.xlu1 %v1600_v6, %s2562_s17 }
0x14be   :  { %1823 = vrot.lane.b32.xlu1 %v1600_v6, %s2564_s21 }
0x14c5   :  { %v1385_v37 = vpop.permute.xlu2 %1384 }
0x14cd   :  { %v1606_v10 = vpop.permute.xlu2 %1605 }
0x14d5   :  { %v1816_v49 = vpop.permute.xlu0 %1815 }
0x14d6   :  { %v1818_v58 = vmul.f32 %v1816_v49, %v3123_v50 }
0x14d8   :  { %1820 = vrot.lane.b32.xlu0 %v1818_v58, %s2562_s17 }
0x14e0   :  { %2041 = vrot.lane.b32.xlu0 %v1818_v58, %s2564_s21 }
0x14e4   :  { %v1388_v39 = vpop.permute.xlu0 %1387 }
0x14e5   :  { %v1390_v40 = vsel %vm42_vm0, %v1385_v37, %v1388_v39 }
0x14e6   :  { %2285 = vmatmul.msk.f32.vlgmr.msra.gmra.mxu2 %vm167_vm2, %v1390_v40 }
0x14e7   :  { %1844 = vmatpush.msra.mxu2 %v2994_v7 }
0x14e9   :  { %1845 = vmatpush.msra.mxu2 %v3000_v63 }
0x1520   :  { %v2034_v24 = vpop.permute.xlu1 %2033 }
0x1521   :  { %v2036_v46 = vmul.f32 %v2034_v24, %v2014_v3 }
0x1523   :  { %2038 = vrot.lane.b32.xlu2 %v2036_v46, %s2569_s16 }
0x1528   :  { %v1603_v42 = vpop.permute.xlu1 %1602 }
0x1529   :  { %v1608_v45 = vsel %vm42_vm0, %v1603_v42, %v1606_v10 }
0x152a   :  { %2289 = vmatmul.msk.f32.vlgmr.msrb.gmra.mxu2 %vm167_vm2, %v1608_v45 }
0x152b   :  { %2062 = vmatpush.msrb.mxu2 %v3009_v18 }
0x152d   :  { %2063 = vmatpush.msrb.mxu2 %v3015_v19 }
0x1530   :  { %v1824_v50 = vpop.permute.xlu1 %1823 }
0x154a   :  { %v1821_v41 = vpop.permute.xlu0 %1820 }
0x154b   :  { %v1826_v51 = vsel %vm42_vm0, %v1821_v41, %v1824_v50 }
0x154c   :  { %2293 = vmatmul.msk.f32.vlgmr.msra.gmra.mxu2 %vm167_vm2, %v1826_v51 }
0x1552   :  { %v2042_v47 = vpop.permute.xlu0 %2041 }
0x1569   :  { %v1411_v52 = vpop.f32.mrf.mxu2 }
0x156a   :  { %v1412_v53 = vadd.f32 %v1411_v52, %v2844_v43 }
0x156c   :  { %2494 = vtanh.f32 %v1412_v53  ;;  %v1414_v2 = vmul.f32 0.5, %v1412_v53 }
0x1572   :  { %v2495_v17 = vpop.eup %2494 }
0x1573   :  { %1421 = vrot.lane.b32.xlu1 %v2495_v17, %s2560_s11 }
0x157d   :  { %v2039_v55 = vpop.permute.xlu2 %2038 }
0x157e   :  { %v2044_v59 = vsel %vm42_vm0, %v2039_v55, %v2042_v47 }
0x157f   :  { %2297 = vmatmul.msk.f32.vlgmr.msrb.gmra.mxu2 %vm167_vm2, %v2044_v59 }
0x15ad   :  { %v1629_v18 = vpop.f32.mrf.mxu2 }
0x15ae   :  { %v1630_v19 = vadd.f32 %v1629_v18, %v2756_v9 }
0x15b0   :  { %2496 = vtanh.f32 %v1630_v19  ;;  %v1632_v3 = vmul.f32 0.5, %v1630_v19 }
0x15b6   :  { %v2497_v61 = vpop.eup %2496 }
0x15b7   :  { %1639 = vrot.lane.b32.xlu2 %v2497_v61, %s2560_s11 }
0x15cf   :  { %v1847_v13 = vpop.f32.mrf.mxu2 }
0x15d0   :  { %v1848_v57 = vadd.f32 %v1847_v13, %v2707_v15 }
0x15d2   :  { %2498 = vtanh.f32 %v1848_v57  ;;  %v1850_v48 = vmul.f32 0.5, %v1848_v57 }
0x15d3   :  { %2500 = vtanh.f32 %v1414_v2 }
0x15d4   :  { %2502 = vtanh.f32 %v1632_v3 }
0x15d8   :  { %v2499_v8 = vpop.eup %2498 }
0x15d9   :  { %1857 = vrot.lane.b32.xlu0 %v2499_v8, %s2560_s11  ;;  %v2501_v56 = vpop.eup %2500 }
0x15da   :  { %v1416_v27 = vmul.f32 0.5, %v2501_v56  ;;  %v2503_v25 = vpop.eup %2502 }
0x15db   :  { %v1634_v28 = vmul.f32 0.5, %v2503_v25 }
0x15dc   :  { %v1417_v44 = vadd.f32 0.5, %v1416_v27 }
0x15dd   :  { %v1635_v34 = vadd.f32 0.5, %v1634_v28 }
0x15de   :  { %v1419_v60 = vmul.f32 %v1417_v44, %v3135_v11 }
0x15df   :  { %v1637_v40 = vmul.f32 %v1635_v34, %v3130_v62 }
0x15e5   :  { %v1422_v14 = vpop.permute.xlu1 %1421 }
0x15e6   :  { %v1424_v16 = vmul.f32 %v1422_v14, %v1417_v44 }
0x15e8   :  { %1426 = vrot.lane.b32.xlu2 %v1424_v16, %s2561_s12 }
0x1602   :  { %v2065_v23 = vpop.f32.mrf.mxu2 }
0x1603   :  { %v2066_v20 = vadd.f32 %v2065_v23, %v2663_v38 }
0x1605   :  { %2504 = vtanh.f32 %v2066_v20  ;;  %v2068_v6 = vmul.f32 0.5, %v2066_v20 }
0x1606   :  { %2506 = vtanh.f32 %v1850_v48 }
0x160b   :  { %v2505_v1 = vpop.eup %2504 }
0x160c   :  { %2075 = vrot.lane.b32.xlu1 %v2505_v1, %s2560_s11  ;;  %v2507_v33 = vpop.eup %2506 }
0x160d   :  { %v1852_v38 = vmul.f32 0.5, %v2507_v33 }
0x160f   :  { %v1853_v12 = vadd.f32 0.5, %v1852_v38 }
0x1611   :  { %v1640_v54 = vpop.permute.xlu2 %1639  ;;  %v1855_v42 = vmul.f32 %v1853_v12, %v3143_v26 }
0x1612   :  { %v1642_v32 = vmul.f32 %v1640_v54, %v1635_v34 }
0x1614   :  { %1644 = vrot.lane.b32.xlu0 %v1642_v32, %s2561_s12 }
0x1642   :  { %v1427_v21 = vpop.permute.xlu2 %1426 }
0x1643   :  { %v3190_v4 = vadd.f32 %v1427_v21, %v1419_v60 }
0x1645   :  { %2508 = vtanh.f32 %v3190_v4 }
0x1646   :  { %2510 = vtanh.f32 %v2068_v6 }
0x164b   :  { %v2509_v5 = vpop.eup %2508  ;;  %v1858_v30 = vpop.permute.xlu0 %1857 }
0x164c   :  { %v1860_v31 = vmul.f32 %v1858_v30, %v1853_v12  ;;  %1432 = vrot.lane.b32.xlu0 %v2509_v5, %s2561_s12  ;;  %v2511_v49 = vpop.eup %2510 }
0x164d   :  { %v2070_v58 = vmul.f32 0.5, %v2511_v49 }
0x164e   :  { %1862 = vrot.lane.b32.xlu1 %v1860_v31, %s2561_s12 }
0x164f   :  { %v2071_v11 = vadd.f32 0.5, %v2070_v58 }
0x1651   :  { %v2073_v52 = vmul.f32 %v2071_v11, %v3149_v29 }
0x167e   :  { %v2076_v37 = vpop.permute.xlu1 %2075 }
0x167f   :  { %v2078_v39 = vmul.f32 %v2076_v37, %v2071_v11 }
0x1681   :  { %2080 = vrot.lane.b32.xlu2 %v2078_v39, %s2561_s12 }
0x1686   :  { %v1645_v24 = vpop.permute.xlu0 %1644 }
0x1687   :  { %v3197_v46 = vadd.f32 %v1645_v24, %v1637_v40 }
0x1689   :  { %2512 = vtanh.f32 %v3197_v46 }
0x168f   :  { %v2513_v10 = vpop.eup %2512 }
0x1690   :  { %1650 = vrot.lane.b32.xlu1 %v2513_v10, %s2561_s12 }
0x16be   :  { %v1433_v51 = vpop.permute.xlu0 %1432 }
0x16bf   :  { %v3206_v62 = vmul.f32 %v1433_v51, %v1417_v44 }
0x16c0   :  { %v1863_v45 = vpop.permute.xlu1 %1862 }
0x16c1   :  { %v3202_v50 = vadd.f32 %v1863_v45, %v1855_v42 }
0x16c3   :  { %2514 = vtanh.f32 %v3202_v50 }
0x16c9   :  { %v2515_v41 = vpop.eup %2514 }
0x16ca   :  { %1868 = vrot.lane.b32.xlu2 %v2515_v41, %s2561_s12 }
0x16d2   :  { %1658 = vrot.lane.b32.xlu2 %v3206_v62, %s2564_s21 }
0x16db   :  { %v2081_v53 = vpop.permute.xlu2 %2080 }
0x16dc   :  { %v2083_v17 = vadd.f32 %v2081_v53, %v2073_v52 }
0x16de   :  { %2516 = vtanh.f32 %v2083_v17 }
0x16e4   :  { %v2517_v26 = vpop.eup %2516 }
0x16e5   :  { %2086 = vrot.lane.b32.xlu0 %v2517_v26, %s2561_s12 }
0x1702   :  { %v1651_v47 = vpop.permute.xlu1 %1650 }
0x1703   :  { %v1653_v55 = vmul.f32 %v1651_v47, %v1635_v34 }
0x1705   :  { %1655 = vrot.lane.b32.xlu1 %v1653_v55, %s2562_s17 }
0x170d   :  { %1876 = vrot.lane.b32.xlu1 %v1653_v55, %s2564_s21 }
0x1724   :  { %v1869_v59 = vpop.permute.xlu2 %1868 }
0x1725   :  { %v1871_v18 = vmul.f32 %v1869_v59, %v1853_v12 }
0x1727   :  { %1873 = vrot.lane.b32.xlu0 %v1871_v18, %s2562_s17 }
0x172c   :  { %v1659_v61 = vpop.permute.xlu2 %1658 }
0x172f   :  { %2094 = vrot.lane.b32.xlu0 %v1871_v18, %s2564_s21 }
0x1757   :  { %v2087_v19 = vpop.permute.xlu0 %2086 }
0x1758   :  { %v2089_v29 = vmul.f32 %v2087_v19, %v2071_v11 }
0x175a   :  { %2091 = vrot.lane.b32.xlu2 %v2089_v29, %s2562_s17 }
0x1777   :  { %v1656_v13 = vpop.permute.xlu1 %1655 }
0x1778   :  { %v1661_v57 = vsel %vm42_vm0, %v1656_v13, %v1659_v61 }
0x1779   :  { %2290 = vmatmul.msk.f32.vlgmr.msra.gmra.mxu0 %vm167_vm2, %v1661_v57 }
0x177a   :  { %2115 = vmatpush.msra.mxu0 %v2994_v7 }
0x177c   :  { %2116 = vmatpush.msra.mxu0 %v3000_v63 }
0x177f   :  { %v1877_v2 = vpop.permute.xlu1 %1876 }
0x1799   :  { %v1874_v8 = vpop.permute.xlu0 %1873 }
0x179a   :  { %v1879_v56 = vsel %vm42_vm0, %v1874_v8, %v1877_v2 }
0x179b   :  { %2294 = vmatmul.msk.f32.vlgmr.msrb.gmra.mxu0 %vm167_vm2, %v1879_v56 }
0x17a1   :  { %v2095_v27 = vpop.permute.xlu0 %2094 }
0x17b4   :  { %v2092_v44 = vpop.permute.xlu2 %2091 }
0x17b5   :  { %v2097_v14 = vsel %vm42_vm0, %v2092_v44, %v2095_v27 }
0x17b6   :  { %2298 = vmatmul.msk.f32.vlgmr.msra.gmra.mxu0 %vm167_vm2, %v2097_v14 }
0x17f6   :  { %v1682_v16 = vpop.f32.mrf.mxu0 }
0x17f7   :  { %v1683_v3 = vadd.f32 %v1682_v16, %v2844_v43 }
0x17f9   :  { %2518 = vtanh.f32 %v1683_v3  ;;  %v1685_v34 = vmul.f32 0.5, %v1683_v3 }
0x17ff   :  { %v2519_v23 = vpop.eup %2518 }
0x1800   :  { %1692 = vrot.lane.b32.xlu1 %v2519_v23, %s2560_s11 }
0x1818   :  { %v1900_v7 = vpop.f32.mrf.mxu0 }
0x1819   :  { %v1901_v63 = vadd.f32 %v1900_v7, %v2756_v9 }
0x181b   :  { %2520 = vtanh.f32 %v1901_v63  ;;  %v1903_v32 = vmul.f32 0.5, %v1901_v63 }
0x1821   :  { %v2521_v20 = vpop.eup %2520 }
0x1822   :  { %1910 = vrot.lane.b32.xlu2 %v2521_v20, %s2560_s11 }
0x1833   :  { %v2118_v25 = vpop.f32.mrf.mxu0 }
0x1834   :  { %v2119_v1 = vadd.f32 %v2118_v25, %v2707_v15 }
0x1836   :  { %2522 = vtanh.f32 %v2119_v1  ;;  %v2121_v31 = vmul.f32 0.5, %v2119_v1 }
0x1837   :  { %2524 = vtanh.f32 %v1685_v34 }
0x1838   :  { %2526 = vtanh.f32 %v1903_v32 }
0x1839   :  { %2528 = vtanh.f32 %v2121_v31 }
0x183c   :  { %v2523_v28 = vpop.eup %2522 }
0x183d   :  { %2128 = vrot.lane.b32.xlu0 %v2523_v28, %s2560_s11  ;;  %v2525_v54 = vpop.eup %2524 }
0x183e   :  { %v1687_v48 = vmul.f32 0.5, %v2525_v54  ;;  %v2527_v38 = vpop.eup %2526 }
0x183f   :  { %v1905_v12 = vmul.f32 0.5, %v2527_v38  ;;  %v2529_v6 = vpop.eup %2528 }
0x1840   :  { %v1688_v60 = vadd.f32 0.5, %v1687_v48  ;;  %v2123_v49 = vmul.f32 0.5, %v2529_v6 }
0x1841   :  { %v1906_v5 = vadd.f32 0.5, %v1905_v12 }
0x1842   :  { %v2124_v58 = vadd.f32 0.5, %v2123_v49  ;;  %v1690_v42 = vmul.f32 %v1688_v60, %v3190_v4 }
0x1843   :  { %v1908_v39 = vmul.f32 %v1906_v5, %v3197_v46 }
0x1844   :  { %v2126_v52 = vmul.f32 %v2124_v58, %v3202_v50 }
0x1872   :  { %v1693_v21 = vpop.permute.xlu1 %1692 }
0x1873   :  { %v1695_v33 = vmul.f32 %v1693_v21, %v1688_v60 }
0x1875   :  { %1697 = vrot.lane.b32.xlu1 %v1695_v33, %s2561_s12 }
0x187c   :  { %v1911_v30 = vpop.permute.xlu2 %1910 }
0x187d   :  { %v1913_v15 = vmul.f32 %v1911_v30, %v1906_v5 }
0x187f   :  { %1915 = vrot.lane.b32.xlu2 %v1913_v15, %s2561_s12 }
0x18af   :  { %v2129_v11 = vpop.permute.xlu0 %2128 }
0x18b0   :  { %v2131_v37 = vmul.f32 %v2129_v11, %v2124_v58 }
0x18b2   :  { %2133 = vrot.lane.b32.xlu0 %v2131_v37, %s2561_s12 }
0x18d9   :  { %v1916_v40 = vpop.permute.xlu2 %1915 }
0x18da   :  { %v3235_v24 = vadd.f32 %v1916_v40, %v1908_v39 }
0x18dc   :  { %2530 = vtanh.f32 %v3235_v24 }
0x18e2   :  { %v2531_v10 = vpop.eup %2530 }
0x18e3   :  { %1921 = vrot.lane.b32.xlu2 %v2531_v10, %s2561_s12 }
0x18e7   :  { %v1698_v45 = vpop.permute.xlu1 %1697 }
0x18e8   :  { %v1700_v41 = vadd.f32 %v1698_v45, %v1690_v42 }
0x18ea   :  { %2532 = vtanh.f32 %v1700_v41 }
0x18f0   :  { %v2533_v51 = vpop.eup %2532 }
0x18f1   :  { %1703 = vrot.lane.b32.xlu1 %v2533_v51, %s2561_s12 }
0x1924   :  { %v2134_v53 = vpop.permute.xlu0 %2133 }
0x1925   :  { %v2136_v46 = vadd.f32 %v2134_v53, %v2126_v52 }
0x1927   :  { %2534 = vtanh.f32 %v2136_v46 }
0x192d   :  { %v2535_v17 = vpop.eup %2534 }
0x192e   :  { %2139 = vrot.lane.b32.xlu0 %v2535_v17, %s2561_s12 }
0x193d   :  { %v1922_v26 = vpop.permute.xlu2 %1921 }
0x193e   :  { %v1924_v47 = vmul.f32 %v1922_v26, %v1906_v5 }
0x1940   :  { %1926 = vrot.lane.b32.xlu1 %v1924_v47, %s2562_s17 }
0x1948   :  { %2147 = vrot.lane.b32.xlu1 %v1924_v47, %s2564_s21 }
0x1963   :  { %v1704_v4 = vpop.permute.xlu1 %1703 }
0x1964   :  { %v3245_v55 = vmul.f32 %v1704_v4, %v1688_v60 }
0x1966   :  { %1929 = vrot.lane.b32.xlu2 %v3245_v55, %s2564_s21 }
0x19a0   :  { %v2140_v59 = vpop.permute.xlu0 %2139 }
0x19a1   :  { %v2142_v50 = vmul.f32 %v2140_v59, %v2124_v58 }
0x19a3   :  { %2144 = vrot.lane.b32.xlu0 %v2142_v50, %s2562_s17 }
0x19b2   :  { %v1927_v18 = vpop.permute.xlu1 %1926 }
0x19ba   :  { %v2148_v61 = vpop.permute.xlu1 %2147 }
0x19c0   :  { %v1930_v19 = vpop.permute.xlu2 %1929 }
0x19c1   :  { %v1932_v29 = vsel %vm42_vm0, %v1927_v18, %v1930_v19 }
0x19c2   :  { %2295 = vmatmul.msk.f32.vlgmr.msrb.gmra.mxu3 %vm167_vm2, %v1932_v29 }
0x1a15   :  { %v2145_v13 = vpop.permute.xlu0 %2144 }
0x1a16   :  { %v2150_v57 = vsel %vm42_vm0, %v2145_v13, %v2148_v61 }
0x1a17   :  { %2299 = vmatmul.msk.f32.vlgmr.msra.gmra.mxu3 %vm167_vm2, %v2150_v57 }
0x1a45   :  { %v1953_v2 = vpop.f32.mrf.mxu3 }
0x1a46   :  { %v1954_v8 = vadd.f32 %v1953_v2, %v2844_v43 }
0x1a48   :  { %2536 = vtanh.f32 %v1954_v8  ;;  %v1956_v27 = vmul.f32 0.5, %v1954_v8 }
0x1a4a   :  { %2538 = vtanh.f32 %v1956_v27 }
0x1a4e   :  { %v2537_v56 = vpop.eup %2536 }
0x1a4f   :  { %1963 = vrot.lane.b32.xlu2 %v2537_v56, %s2560_s11 }
0x1a50   :  { %v2539_v16 = vpop.eup %2538 }
0x1a51   :  { %v1958_v23 = vmul.f32 0.5, %v2539_v16 }
0x1a53   :  { %v1959_v7 = vadd.f32 0.5, %v1958_v23 }
0x1a9a   :  { %v2171_v44 = vpop.f32.mrf.mxu3 }
0x1a9b   :  { %v2172_v14 = vadd.f32 %v2171_v44, %v2756_v9  ;;  %v1961_v9 = vmul.f32 %v1959_v7, %v1700_v41 }
0x1a9d   :  { %2540 = vtanh.f32 %v2172_v14  ;;  %v2174_v25 = vmul.f32 0.5, %v2172_v14 }
0x1a9f   :  { %2542 = vtanh.f32 %v2174_v25 }
0x1aa3   :  { %v2541_v3 = vpop.eup %2540 }
0x1aa4   :  { %2181 = vrot.lane.b32.xlu0 %v2541_v3, %s2560_s11 }
0x1aa5   :  { %v2543_v1 = vpop.eup %2542 }
0x1aa6   :  { %v2176_v28 = vmul.f32 0.5, %v2543_v1 }
0x1aa8   :  { %v2177_v34 = vadd.f32 0.5, %v2176_v28 }
0x1aa9   :  { %v1964_v63 = vpop.permute.xlu2 %1963 }
0x1aaa   :  { %v1966_v20 = vmul.f32 %v1964_v63, %v1959_v7  ;;  %v2179_v33 = vmul.f32 %v2177_v34, %v3235_v24 }
0x1aac   :  { %1968 = vrot.lane.b32.xlu1 %v1966_v20, %s2561_s12 }
0x1b16   :  { %v2182_v54 = vpop.permute.xlu0 %2181 }
0x1b17   :  { %v2184_v32 = vmul.f32 %v2182_v54, %v2177_v34 }
0x1b19   :  { %2186 = vrot.lane.b32.xlu2 %v2184_v32, %s2561_s12 }
0x1b1e   :  { %v1969_v48 = vpop.permute.xlu1 %1968 }
0x1b1f   :  { %v1971_v60 = vadd.f32 %v1969_v48, %v1961_v9 }
0x1b21   :  { %2544 = vtanh.f32 %v1971_v60 }
0x1b27   :  { %v2545_v21 = vpop.eup %2544 }
0x1b28   :  { %1974 = vrot.lane.b32.xlu0 %v2545_v21, %s2561_s12 }
0x1b73   :  { %v2187_v38 = vpop.permute.xlu2 %2186 }
0x1b74   :  { %v2189_v12 = vadd.f32 %v2187_v38, %v2179_v33 }
0x1b76   :  { %2546 = vtanh.f32 %v2189_v12 }
0x1b7c   :  { %v2547_v5 = vpop.eup %2546 }
0x1b7d   :  { %2192 = vrot.lane.b32.xlu1 %v2547_v5, %s2561_s12 }
0x1b9a   :  { %v1975_v30 = vpop.permute.xlu0 %1974 }
0x1b9b   :  { %v1977_v15 = vmul.f32 %v1975_v30, %v1959_v7 }
0x1b9d   :  { %2200 = vrot.lane.b32.xlu0 %v1977_v15, %s2564_s21 }
0x1bef   :  { %v2193_v31 = vpop.permute.xlu1 %2192 }
0x1bf0   :  { %v2195_v6 = vmul.f32 %v2193_v31, %v2177_v34 }
0x1bf2   :  { %2197 = vrot.lane.b32.xlu2 %v2195_v6, %s2562_s17 }
0x1c0f   :  { %v2201_v49 = vpop.permute.xlu0 %2200 }
0x1c4c   :  { %v2198_v58 = vpop.permute.xlu2 %2197 }
0x1c4d   :  { %v2203_v11 = vsel %vm42_vm0, %v2198_v58, %v2201_v49 }
0x1c4e   :  { %2300 = vmatmul.msk.f32.vlgmr.msra.gmra.mxu1 %vm167_vm2, %v2203_v11 }
0x1ccb   :  { %v2224_v37 = vpop.f32.mrf.mxu1 }
0x1ccc   :  { %v2225_v39 = vadd.f32 %v2224_v37, %v2844_v43 }
0x1cce   :  { %2548 = vtanh.f32 %v2225_v39  ;;  %v2227_v24 = vmul.f32 0.5, %v2225_v39 }
0x1cd0   :  { %2550 = vtanh.f32 %v2227_v24 }
0x1cd4   :  { %v2549_v40 = vpop.eup %2548 }
0x1cd5   :  { %2234 = vrot.lane.b32.xlu1 %v2549_v40, %s2560_s11 }
0x1cd6   :  { %v2551_v10 = vpop.eup %2550 }
0x1cd7   :  { %v2229_v42 = vmul.f32 0.5, %v2551_v10 }
0x1cd9   :  { %v2230_v45 = vadd.f32 0.5, %v2229_v42 }
0x1cdd   :  { %364 = vrot.lane.b32.xlu1 %v2908_v22, %s2562_s17  ;;  %v2232_v22 = vmul.f32 %v2230_v45, %v1971_v60 }
0x1ce5   :  { %1708 = vrot.lane.b32.xlu1 %v3245_v55, %s2570_s3 }
0x1d47   :  { %v2235_v41 = vpop.permute.xlu1 %2234 }
0x1d48   :  { %v2237_v51 = vmul.f32 %v2235_v41, %v2230_v45 }
0x1d4a   :  { %2239 = vrot.lane.b32.xlu2 %v2237_v51, %s2561_s12 }
0x1d4f   :  { %v365_v43 = vpop.permute.xlu1 %364 }
0x1d50   :  { %367 = vst.msk [vmem:[%s3310_s4] sm:$0xff] %vm42_vm0, %v365_v43 }
0x1d51   :  { %638 = vst.msk [vmem:[%s3310_s4] sm:$0xff] %vm637_vm3, %v2985_v0 }
0x1d52   :  { %1170 = vrot.lane.b32.xlu2 %v3155_v35, %s2561_s12  ;;  %902 = vst.msk [vmem:[%s3310_s4] sm:$0xff] %vm901_vm4, %v3073_v36 }
0x1d57   :  { %v1709_v26 = vpop.permute.xlu1 %1708 }
0x1d5a   :  { %1979 = vrot.lane.b32.xlu2 %v1977_v15, %s2563_s20 }
0x1da4   :  { %v2240_v52 = vpop.permute.xlu2 %2239 }
0x1da5   :  { %v2242_v53 = vadd.f32 %v2240_v52, %v2232_v22 }
0x1da7   :  { %2552 = vtanh.f32 %v2242_v53 }
0x1dac   :  { %v1171_v46 = vpop.permute.xlu2 %1170 }
0x1dad   :  { %v2553_v17 = vpop.eup %2552  ;;  %1174 = vst.msk [vmem:[%s3310_s4] sm:$0xff] %vm1173_vm5, %v1171_v46 }
0x1dae   :  { %2245 = vrot.lane.b32.xlu0 %v2553_v17, %s2561_s12 }
0x1db4   :  { %v1980_v47 = vpop.permute.xlu2 %1979 }
0x1db6   :  { %1437 = vrot.lane.b32.xlu0 %v3206_v62, %s2569_s16 }
0x1e20   :  { %v2246_v0 = vpop.permute.xlu0 %2245 }
0x1e21   :  { %v2248_v36 = vmul.f32 %v2246_v0, %v2230_v45 }
0x1e23   :  { %2250 = vrot.lane.b32.xlu0 %v2248_v36, %s2571_s10 }
0x1e28   :  { %v1438_v35 = vpop.permute.xlu0 %1437 }
0x1e29   :  { %1441 = vst.msk [vmem:[%s3310_s4] sm:$0xff] %vm1440_vm6, %v1438_v35 }
0x1e2a   :  { %1712 = vst.msk [vmem:[%s3310_s4] sm:$0xff] %vm1711_vm7, %v1709_v26 }
0x1e2b   :  { %1983 = vst.msk [vmem:[%s3310_s4] sm:$0xff] %vm1982_vm8, %v1980_v47 }
0x1e95   :  { %v2251_v62 = vpop.permute.xlu0 %2250 }
0x1e96   :  { %2254 = vst.msk [vmem:[%s3310_s4] sm:$0xff] %vm2253_vm9, %v2251_v62 }

</bundles_post_ra>
